<compile_context>
chip_gen: v7x
topology: tpu7x:2x2x1
jax: 0.10.0
libtpu: 0.0.40
codegen_flags: <defaults>
</compile_context>

<pallas_src>
import jax
import jax.numpy as jnp
from jax.experimental import pallas as pl
from jax.experimental.pallas import tpu as pltpu

EPS = 1e-5
FC1 = 128        # first hidden width (already lane aligned)
H_REAL = 1000    # true hidden width of the PyTorch model
H_PAD = 1024     # lane-dense padded hidden width


def _round_up(v, m):
    return (v + m - 1) // m * m


def _layernorm(h, gamma, beta, n):
    """One-pass LayerNorm over the last axis.

    `n` is the REAL (unpadded) feature count; padded lanes are exactly zero by
    construction (zero-padded weight columns / biases), so sum and sum-of-squares
    over the padded width equal the sums over the real width.
    """
    s = jnp.sum(h, axis=-1, keepdims=True)
    ss = jnp.sum(h * h, axis=-1, keepdims=True)
    mu = s * (1.0 / n)
    var = ss * (1.0 / n) - mu * mu
    return (h - mu) * jax.lax.rsqrt(var + EPS) * gamma + beta


def mlp_kernel(x_ref,
               w1_ref, b1_ref, g1_ref, bt1_ref,
               w2_ref, b2_ref, g2_ref, bt2_ref,
               w3_ref, b3_ref, g3_ref, bt3_ref,
               w4_ref, b4_ref,
               o_ref):
    # fc1: Linear(input_size, 128) -> LayerNorm(128) -> Dropout(identity)
    h = jnp.dot(x_ref[...].astype(jnp.bfloat16), w1_ref[...],
                preferred_element_type=jnp.float32) + b1_ref[...]
    h = _layernorm(h, g1_ref[...], bt1_ref[...], FC1)

    # Linear(128, 1000) -> LayerNorm(1000) -> ReLU -> Dropout(identity)
    h = jnp.dot(h.astype(jnp.bfloat16), w2_ref[...],
                preferred_element_type=jnp.float32) + b2_ref[...]
    h = jnp.maximum(_layernorm(h, g2_ref[...], bt2_ref[...], H_REAL), 0.0)

    # Linear(1000, 1000) -> LayerNorm(1000) -> ReLU -> Dropout(identity)
    h = jnp.dot(h.astype(jnp.bfloat16), w3_ref[...],
                preferred_element_type=jnp.float32) + b3_ref[...]
    h = jnp.maximum(_layernorm(h, g3_ref[...], bt3_ref[...], H_REAL), 0.0)

    # Linear(1000, num_classes)  (padded to a 128-wide lane-dense slab)
    o_ref[...] = jnp.dot(h.astype(jnp.bfloat16), w4_ref[...],
                         preferred_element_type=jnp.float32) + b4_ref[...]


def old_mlp_forward(x, params, num_classes):
    """x: [B, input_size] float32. params: dict from init_params (padded, bf16 weights)."""
    batch, input_size = x.shape
    h_pad = params["w3"].shape[1]
    out_pad = params["w4"].shape[1]

    # Batch tile: biggest tile that fits comfortably in scoped VMEM on every
    # generation (v7x only has 64 MiB physical per TensorCore).
    tb = min(512, _round_up(batch, 8))
    b_pad = _round_up(batch, tb)
    if b_pad != batch:
        x = jnp.pad(x, ((0, b_pad - batch), (0, 0)))
    grid = (b_pad // tb,)

    def resident(shape):
        # Same block on every grid step -> stays in VMEM, not re-fetched.
        return pl.BlockSpec(shape, lambda i: (0, 0))

    in_specs = [
        pl.BlockSpec((tb, input_size), lambda i: (i, 0)),        # x tile (pipelined)
        resident((input_size, FC1)), resident((1, FC1)),          # w1, b1
        resident((1, FC1)), resident((1, FC1)),                   # g1, bt1
        resident((FC1, h_pad)), resident((1, h_pad)),             # w2, b2
        resident((1, h_pad)), resident((1, h_pad)),               # g2, bt2
        resident((h_pad, h_pad)), resident((1, h_pad)),           # w3, b3
        resident((1, h_pad)), resident((1, h_pad)),               # g3, bt3
        resident((h_pad, out_pad)), resident((1, out_pad)),       # w4, b4
    ]
    out_specs = pl.BlockSpec((tb, out_pad), lambda i: (i, 0))

    args = (x,
            params["w1"], params["b1"], params["g1"], params["bt1"],
            params["w2"], params["b2"], params["g2"], params["bt2"],
            params["w3"], params["b3"], params["g3"], params["bt3"],
            params["w4"], params["b4"])

    flops = 2 * b_pad * (input_size * FC1 + FC1 * h_pad + h_pad * h_pad
                         + h_pad * out_pad)
    bytes_accessed = sum(int(a.size) * a.dtype.itemsize for a in args)
    bytes_accessed += b_pad * out_pad * 4

    out = pl.pallas_call(
        mlp_kernel,
        out_shape=jax.ShapeDtypeStruct((b_pad, out_pad), jnp.float32),
        grid=grid,
        in_specs=in_specs,
        out_specs=out_specs,
        compiler_params=pltpu.CompilerParams(
            dimension_semantics=("parallel",),          # v7x: shard batch over 2 TCs
            vmem_limit_bytes=32 * 1024 * 1024,          # fits v7x's 64 MiB physical
        ),
        cost_estimate=pl.CostEstimate(
            flops=flops,
            transcendentals=3 * b_pad,                  # one rsqrt per LN row
            bytes_accessed=bytes_accessed,
        ),
    )(*args)

    return out[:batch, :num_classes]


def init_params(key, input_size, num_classes):
    """Deterministic synthetic init mirroring PyTorch nn.Linear defaults, packed
    for the kernel: weights as bf16 [in, out] (transposed), hidden dims zero-
    padded 1000 -> 1024, logits padded to a multiple of 128."""
    out_pad = _round_up(num_classes, 128)
    dims_real = [(input_size, FC1), (FC1, H_REAL), (H_REAL, H_REAL), (H_REAL, num_classes)]
    dims_pad = [(input_size, FC1), (FC1, H_PAD), (H_PAD, H_PAD), (H_PAD, out_pad)]

    params = {}
    keys = jax.random.split(key, 8)
    for i, ((din, dout), (dinp, doutp)) in enumerate(zip(dims_real, dims_pad), start=1):
        scale = 1.0 / jnp.sqrt(jnp.float32(din))
        w = jax.random.uniform(keys[2 * (i - 1)], (din, dout), jnp.float32, -scale, scale)
        b = jax.random.uniform(keys[2 * (i - 1) + 1], (1, dout), jnp.float32, -scale, scale)
        w = jnp.pad(w, ((0, dinp - din), (0, doutp - dout)))   # zero-pad -> inert lanes
        b = jnp.pad(b, ((0, 0), (0, doutp - dout)))
        params[f"w{i}"] = w.astype(jnp.bfloat16)   # bf16 weights: halve HBM traffic
        params[f"b{i}"] = b                        # biases stay f32 (added post-accumulate)

    # LayerNorm affine params: gamma=1 / beta=0 over the REAL width, 0 on padding.
    for i, (n, npad) in enumerate([(FC1, FC1), (H_REAL, H_PAD), (H_REAL, H_PAD)], start=1):
        params[f"g{i}"] = jnp.pad(jnp.ones((1, n), jnp.float32), ((0, 0), (0, npad - n)))
        params[f"bt{i}"] = jnp.zeros((1, npad), jnp.float32)
    return params


def reference_forward(x, p):
    """Pure-JAX reference mirroring the kernel's numerics (bf16 weights, bf16
    activation rounding at matmul inputs, f32 accumulation, f32 LN math)."""
    def mm(a, w):
        a = a.astype(jnp.bfloat16).astype(jnp.float32)
        return jnp.dot(a, w.astype(jnp.float32), precision=jax.lax.Precision.HIGHEST)

    h = _layernorm(mm(x, p["w1"]) + p["b1"], p["g1"], p["bt1"], FC1)
    h = jnp.maximum(_layernorm(mm(h, p["w2"]) + p["b2"], p["g2"], p["bt2"], H_REAL), 0.0)
    h = jnp.maximum(_layernorm(mm(h, p["w3"]) + p["b3"], p["g3"], p["bt3"], H_REAL), 0.0)
    return mm(h, p["w4"]) + p["b4"]


if __name__ == "__main__":
    key = jax.random.PRNGKey(0)
    k_x, k_p = jax.random.split(key)

    batch, input_size, num_classes = 8, 64, 10
    x = jax.random.normal(k_x, (batch, input_size), jnp.float32)
    params = init_params(k_p, input_size, num_classes)

    out = old_mlp_forward(x, params, num_classes)
    out = jax.block_until_ready(out)

    ref = reference_forward(x, params)[:batch, :num_classes]
    assert out.shape == (batch, num_classes)
    assert jnp.allclose(out, ref, atol=1e-2, rtol=1e-2), "mismatch vs reference"

    print("KERNEL_OK")
</pallas_src>

<mosaic_0001>
module attributes {stable_mosaic.version = 11 : i64} {
  func.func @mlp_kernel(%arg0: i32, %arg1: memref<8x64xf32, #tpu.memory_space<vmem>>, %arg2: memref<64x128xbf16, #tpu.memory_space<vmem>>, %arg3: memref<1x128xf32, #tpu.memory_space<vmem>>, %arg4: memref<1x128xf32, #tpu.memory_space<vmem>>, %arg5: memref<1x128xf32, #tpu.memory_space<vmem>>, %arg6: memref<128x1024xbf16, #tpu.memory_space<vmem>>, %arg7: memref<1x1024xf32, #tpu.memory_space<vmem>>, %arg8: memref<1x1024xf32, #tpu.memory_space<vmem>>, %arg9: memref<1x1024xf32, #tpu.memory_space<vmem>>, %arg10: memref<1024x1024xbf16, #tpu.memory_space<vmem>>, %arg11: memref<1x1024xf32, #tpu.memory_space<vmem>>, %arg12: memref<1x1024xf32, #tpu.memory_space<vmem>>, %arg13: memref<1x1024xf32, #tpu.memory_space<vmem>>, %arg14: memref<1024x128xbf16, #tpu.memory_space<vmem>>, %arg15: memref<1x128xf32, #tpu.memory_space<vmem>>, %arg16: memref<8x128xf32, #tpu.memory_space<vmem>>) attributes {dimension_semantics = [#tpu.dimension_semantics<parallel>], iteration_bounds = array<i64: 1>, scalar_prefetch = 0 : i64, scratch_operands = 0 : i64, tpu.core_type = #tpu.core_type<tc>, window_params = [{transform_indices = @transform_0, window_bounds = array<i64: 8, 64>}, {pipeline_mode = #tpu.pipeline_mode<synchronous>, transform_indices = @transform_1, window_bounds = array<i64: 64, 128>}, {pipeline_mode = #tpu.pipeline_mode<synchronous>, transform_indices = @transform_2, window_bounds = array<i64: 1, 128>}, {pipeline_mode = #tpu.pipeline_mode<synchronous>, transform_indices = @transform_3, window_bounds = array<i64: 1, 128>}, {pipeline_mode = #tpu.pipeline_mode<synchronous>, transform_indices = @transform_4, window_bounds = array<i64: 1, 128>}, {pipeline_mode = #tpu.pipeline_mode<synchronous>, transform_indices = @transform_5, window_bounds = array<i64: 128, 1024>}, {pipeline_mode = #tpu.pipeline_mode<synchronous>, transform_indices = @transform_6, window_bounds = array<i64: 1, 1024>}, {pipeline_mode = #tpu.pipeline_mode<synchronous>, transform_indices = @transform_7, window_bounds = array<i64: 1, 1024>}, {pipeline_mode = #tpu.pipeline_mode<synchronous>, transform_indices = @transform_8, window_bounds = array<i64: 1, 1024>}, {pipeline_mode = #tpu.pipeline_mode<synchronous>, transform_indices = @transform_9, window_bounds = array<i64: 1024, 1024>}, {pipeline_mode = #tpu.pipeline_mode<synchronous>, transform_indices = @transform_10, window_bounds = array<i64: 1, 1024>}, {pipeline_mode = #tpu.pipeline_mode<synchronous>, transform_indices = @transform_11, window_bounds = array<i64: 1, 1024>}, {pipeline_mode = #tpu.pipeline_mode<synchronous>, transform_indices = @transform_12, window_bounds = array<i64: 1, 1024>}, {pipeline_mode = #tpu.pipeline_mode<synchronous>, transform_indices = @transform_13, window_bounds = array<i64: 1024, 128>}, {pipeline_mode = #tpu.pipeline_mode<synchronous>, transform_indices = @transform_14, window_bounds = array<i64: 1, 128>}, {transform_indices = @transform_15, window_bounds = array<i64: 8, 128>}]} {
    %c0 = arith.constant 0 : index
    %c0_0 = arith.constant 0 : index
    %0 = vector.load %arg1[%c0, %c0_0] : memref<8x64xf32, #tpu.memory_space<vmem>>, vector<8x64xf32>
    %1 = arith.truncf %0 : vector<8x64xf32> to vector<8x64xbf16>
    %c0_1 = arith.constant 0 : index
    %c0_2 = arith.constant 0 : index
    %2 = vector.load %arg2[%c0_1, %c0_2] : memref<64x128xbf16, #tpu.memory_space<vmem>>, vector<64x128xbf16>
    %cst = arith.constant dense<0.000000e+00> : vector<8x128xf32>
    %3 = tpu.matmul %1, %2, %cst {dimension_numbers = #tpu.dot_dimension_numbers<[1], [0], [0], [1], [0, 0, 1, 1], [], []>} : vector<8x64xbf16>, vector<64x128xbf16>, vector<8x128xf32> -> vector<8x128xf32>
    %c0_3 = arith.constant 0 : index
    %c0_4 = arith.constant 0 : index
    %4 = vector.load %arg3[%c0_3, %c0_4] : memref<1x128xf32, #tpu.memory_space<vmem>>, vector<1x128xf32>
    %5 = vector.broadcast %4 : vector<1x128xf32> to vector<8x128xf32>
    %6 = arith.addf %3, %5 : vector<8x128xf32>
    %c0_5 = arith.constant 0 : index
    %c0_6 = arith.constant 0 : index
    %7 = vector.load %arg4[%c0_5, %c0_6] : memref<1x128xf32, #tpu.memory_space<vmem>>, vector<1x128xf32>
    %c0_7 = arith.constant 0 : index
    %c0_8 = arith.constant 0 : index
    %8 = vector.load %arg5[%c0_7, %c0_8] : memref<1x128xf32, #tpu.memory_space<vmem>>, vector<1x128xf32>
    %cst_9 = arith.constant dense<0.000000e+00> : vector<8xf32>
    %9 = vector.multi_reduction <add>, %6, %cst_9 [1] : vector<8x128xf32> to vector<8xf32>
    %10 = vector.shape_cast %9 : vector<8xf32> to vector<8x1xf32>
    %11 = arith.mulf %6, %6 : vector<8x128xf32>
    %cst_10 = arith.constant dense<0.000000e+00> : vector<8xf32>
    %12 = vector.multi_reduction <add>, %11, %cst_10 [1] : vector<8x128xf32> to vector<8xf32>
    %13 = vector.shape_cast %12 : vector<8xf32> to vector<8x1xf32>
    %cst_11 = arith.constant 7.812500e-03 : f32
    %14 = vector.broadcast %cst_11 : f32 to vector<8x1xf32>
    %15 = arith.mulf %10, %14 : vector<8x1xf32>
    %cst_12 = arith.constant 7.812500e-03 : f32
    %16 = vector.broadcast %cst_12 : f32 to vector<8x1xf32>
    %17 = arith.mulf %13, %16 : vector<8x1xf32>
    %18 = arith.mulf %15, %15 : vector<8x1xf32>
    %19 = arith.subf %17, %18 : vector<8x1xf32>
    %20 = vector.broadcast %15 : vector<8x1xf32> to vector<8x128xf32>
    %21 = arith.subf %6, %20 : vector<8x128xf32>
    %cst_13 = arith.constant 9.99999974E-6 : f32
    %22 = vector.broadcast %cst_13 : f32 to vector<8x1xf32>
    %23 = arith.addf %19, %22 : vector<8x1xf32>
    %24 = math.rsqrt %23 : vector<8x1xf32>
    %25 = vector.broadcast %24 : vector<8x1xf32> to vector<8x128xf32>
    %26 = arith.mulf %21, %25 : vector<8x128xf32>
    %27 = vector.broadcast %7 : vector<1x128xf32> to vector<8x128xf32>
    %28 = arith.mulf %26, %27 : vector<8x128xf32>
    %29 = vector.broadcast %8 : vector<1x128xf32> to vector<8x128xf32>
    %30 = arith.addf %28, %29 : vector<8x128xf32>
    %31 = arith.truncf %30 : vector<8x128xf32> to vector<8x128xbf16>
    %c0_14 = arith.constant 0 : index
    %c0_15 = arith.constant 0 : index
    %32 = vector.load %arg6[%c0_14, %c0_15] : memref<128x1024xbf16, #tpu.memory_space<vmem>>, vector<128x1024xbf16>
    %cst_16 = arith.constant dense<0.000000e+00> : vector<8x1024xf32>
    %33 = tpu.matmul %31, %32, %cst_16 {dimension_numbers = #tpu.dot_dimension_numbers<[1], [0], [0], [1], [0, 0, 1, 1], [], []>} : vector<8x128xbf16>, vector<128x1024xbf16>, vector<8x1024xf32> -> vector<8x1024xf32>
    %c0_17 = arith.constant 0 : index
    %c0_18 = arith.constant 0 : index
    %34 = vector.load %arg7[%c0_17, %c0_18] : memref<1x1024xf32, #tpu.memory_space<vmem>>, vector<1x1024xf32>
    %35 = vector.broadcast %34 : vector<1x1024xf32> to vector<8x1024xf32>
    %36 = arith.addf %33, %35 : vector<8x1024xf32>
    %c0_19 = arith.constant 0 : index
    %c0_20 = arith.constant 0 : index
    %37 = vector.load %arg8[%c0_19, %c0_20] : memref<1x1024xf32, #tpu.memory_space<vmem>>, vector<1x1024xf32>
    %c0_21 = arith.constant 0 : index
    %c0_22 = arith.constant 0 : index
    %38 = vector.load %arg9[%c0_21, %c0_22] : memref<1x1024xf32, #tpu.memory_space<vmem>>, vector<1x1024xf32>
    %cst_23 = arith.constant dense<0.000000e+00> : vector<8xf32>
    %39 = vector.multi_reduction <add>, %36, %cst_23 [1] : vector<8x1024xf32> to vector<8xf32>
    %40 = vector.shape_cast %39 : vector<8xf32> to vector<8x1xf32>
    %41 = arith.mulf %36, %36 : vector<8x1024xf32>
    %cst_24 = arith.constant dense<0.000000e+00> : vector<8xf32>
    %42 = vector.multi_reduction <add>, %41, %cst_24 [1] : vector<8x1024xf32> to vector<8xf32>
    %43 = vector.shape_cast %42 : vector<8xf32> to vector<8x1xf32>
    %cst_25 = arith.constant 1.000000e-03 : f32
    %44 = vector.broadcast %cst_25 : f32 to vector<8x1xf32>
    %45 = arith.mulf %40, %44 : vector<8x1xf32>
    %cst_26 = arith.constant 1.000000e-03 : f32
    %46 = vector.broadcast %cst_26 : f32 to vector<8x1xf32>
    %47 = arith.mulf %43, %46 : vector<8x1xf32>
    %48 = arith.mulf %45, %45 : vector<8x1xf32>
    %49 = arith.subf %47, %48 : vector<8x1xf32>
    %50 = vector.broadcast %45 : vector<8x1xf32> to vector<8x1024xf32>
    %51 = arith.subf %36, %50 : vector<8x1024xf32>
    %cst_27 = arith.constant 9.99999974E-6 : f32
    %52 = vector.broadcast %cst_27 : f32 to vector<8x1xf32>
    %53 = arith.addf %49, %52 : vector<8x1xf32>
    %54 = math.rsqrt %53 : vector<8x1xf32>
    %55 = vector.broadcast %54 : vector<8x1xf32> to vector<8x1024xf32>
    %56 = arith.mulf %51, %55 : vector<8x1024xf32>
    %57 = vector.broadcast %37 : vector<1x1024xf32> to vector<8x1024xf32>
    %58 = arith.mulf %56, %57 : vector<8x1024xf32>
    %59 = vector.broadcast %38 : vector<1x1024xf32> to vector<8x1024xf32>
    %60 = arith.addf %58, %59 : vector<8x1024xf32>
    %cst_28 = arith.constant 0.000000e+00 : f32
    %61 = vector.broadcast %cst_28 : f32 to vector<8x1024xf32>
    %62 = arith.maximumf %60, %61 : vector<8x1024xf32>
    %63 = arith.truncf %62 : vector<8x1024xf32> to vector<8x1024xbf16>
    %c0_29 = arith.constant 0 : index
    %c0_30 = arith.constant 0 : index
    %64 = vector.load %arg10[%c0_29, %c0_30] : memref<1024x1024xbf16, #tpu.memory_space<vmem>>, vector<1024x1024xbf16>
    %cst_31 = arith.constant dense<0.000000e+00> : vector<8x1024xf32>
    %65 = tpu.matmul %63, %64, %cst_31 {dimension_numbers = #tpu.dot_dimension_numbers<[1], [0], [0], [1], [0, 0, 1, 1], [], []>} : vector<8x1024xbf16>, vector<1024x1024xbf16>, vector<8x1024xf32> -> vector<8x1024xf32>
    %c0_32 = arith.constant 0 : index
    %c0_33 = arith.constant 0 : index
    %66 = vector.load %arg11[%c0_32, %c0_33] : memref<1x1024xf32, #tpu.memory_space<vmem>>, vector<1x1024xf32>
    %67 = vector.broadcast %66 : vector<1x1024xf32> to vector<8x1024xf32>
    %68 = arith.addf %65, %67 : vector<8x1024xf32>
    %c0_34 = arith.constant 0 : index
    %c0_35 = arith.constant 0 : index
    %69 = vector.load %arg12[%c0_34, %c0_35] : memref<1x1024xf32, #tpu.memory_space<vmem>>, vector<1x1024xf32>
    %c0_36 = arith.constant 0 : index
    %c0_37 = arith.constant 0 : index
    %70 = vector.load %arg13[%c0_36, %c0_37] : memref<1x1024xf32, #tpu.memory_space<vmem>>, vector<1x1024xf32>
    %cst_38 = arith.constant dense<0.000000e+00> : vector<8xf32>
    %71 = vector.multi_reduction <add>, %68, %cst_38 [1] : vector<8x1024xf32> to vector<8xf32>
    %72 = vector.shape_cast %71 : vector<8xf32> to vector<8x1xf32>
    %73 = arith.mulf %68, %68 : vector<8x1024xf32>
    %cst_39 = arith.constant dense<0.000000e+00> : vector<8xf32>
    %74 = vector.multi_reduction <add>, %73, %cst_39 [1] : vector<8x1024xf32> to vector<8xf32>
    %75 = vector.shape_cast %74 : vector<8xf32> to vector<8x1xf32>
    %cst_40 = arith.constant 1.000000e-03 : f32
    %76 = vector.broadcast %cst_40 : f32 to vector<8x1xf32>
    %77 = arith.mulf %72, %76 : vector<8x1xf32>
    %cst_41 = arith.constant 1.000000e-03 : f32
    %78 = vector.broadcast %cst_41 : f32 to vector<8x1xf32>
    %79 = arith.mulf %75, %78 : vector<8x1xf32>
    %80 = arith.mulf %77, %77 : vector<8x1xf32>
    %81 = arith.subf %79, %80 : vector<8x1xf32>
    %82 = vector.broadcast %77 : vector<8x1xf32> to vector<8x1024xf32>
    %83 = arith.subf %68, %82 : vector<8x1024xf32>
    %cst_42 = arith.constant 9.99999974E-6 : f32
    %84 = vector.broadcast %cst_42 : f32 to vector<8x1xf32>
    %85 = arith.addf %81, %84 : vector<8x1xf32>
    %86 = math.rsqrt %85 : vector<8x1xf32>
    %87 = vector.broadcast %86 : vector<8x1xf32> to vector<8x1024xf32>
    %88 = arith.mulf %83, %87 : vector<8x1024xf32>
    %89 = vector.broadcast %69 : vector<1x1024xf32> to vector<8x1024xf32>
    %90 = arith.mulf %88, %89 : vector<8x1024xf32>
    %91 = vector.broadcast %70 : vector<1x1024xf32> to vector<8x1024xf32>
    %92 = arith.addf %90, %91 : vector<8x1024xf32>
    %cst_43 = arith.constant 0.000000e+00 : f32
    %93 = vector.broadcast %cst_43 : f32 to vector<8x1024xf32>
    %94 = arith.maximumf %92, %93 : vector<8x1024xf32>
    %95 = arith.truncf %94 : vector<8x1024xf32> to vector<8x1024xbf16>
    %c0_44 = arith.constant 0 : index
    %c0_45 = arith.constant 0 : index
    %96 = vector.load %arg14[%c0_44, %c0_45] : memref<1024x128xbf16, #tpu.memory_space<vmem>>, vector<1024x128xbf16>
    %cst_46 = arith.constant dense<0.000000e+00> : vector<8x128xf32>
    %97 = tpu.matmul %95, %96, %cst_46 {dimension_numbers = #tpu.dot_dimension_numbers<[1], [0], [0], [1], [0, 0, 1, 1], [], []>} : vector<8x1024xbf16>, vector<1024x128xbf16>, vector<8x128xf32> -> vector<8x128xf32>
    %c0_47 = arith.constant 0 : index
    %c0_48 = arith.constant 0 : index
    %98 = vector.load %arg15[%c0_47, %c0_48] : memref<1x128xf32, #tpu.memory_space<vmem>>, vector<1x128xf32>
    %99 = vector.broadcast %98 : vector<1x128xf32> to vector<8x128xf32>
    %100 = arith.addf %97, %99 : vector<8x128xf32>
    %c0_49 = arith.constant 0 : index
    %c0_50 = arith.constant 0 : index
    %101 = vector.load %arg16[%c0_49, %c0_50] : memref<8x128xf32, #tpu.memory_space<vmem>>, vector<8x128xf32>
    tpu.vector_store %arg16[%c0_49, %c0_50], %100 {strides = array<i32>} : memref<8x128xf32, #tpu.memory_space<vmem>>, vector<8x128xf32>,
    return
  }
  func.func @transform_0(%arg0: i32) -> (i32, i32) {
    %c0_i32 = arith.constant 0 : i32
    %c0_i32_0 = arith.constant 0 : i32
    return %arg0, %c0_i32 : i32, i32
  }
  func.func @transform_1(%arg0: i32) -> (i32, i32) {
    %c0_i32 = arith.constant 0 : i32
    %c0_i32_0 = arith.constant 0 : i32
    %c0_i32_1 = arith.constant 0 : i32
    return %c0_i32, %c0_i32_0 : i32, i32
  }
  func.func @transform_2(%arg0: i32) -> (i32, i32) {
    %c0_i32 = arith.constant 0 : i32
    %c0_i32_0 = arith.constant 0 : i32
    %c0_i32_1 = arith.constant 0 : i32
    return %c0_i32, %c0_i32_0 : i32, i32
  }
  func.func @transform_3(%arg0: i32) -> (i32, i32) {
    %c0_i32 = arith.constant 0 : i32
    %c0_i32_0 = arith.constant 0 : i32
    %c0_i32_1 = arith.constant 0 : i32
    return %c0_i32, %c0_i32_0 : i32, i32
  }
  func.func @transform_4(%arg0: i32) -> (i32, i32) {
    %c0_i32 = arith.constant 0 : i32
    %c0_i32_0 = arith.constant 0 : i32
    %c0_i32_1 = arith.constant 0 : i32
    return %c0_i32, %c0_i32_0 : i32, i32
  }
  func.func @transform_5(%arg0: i32) -> (i32, i32) {
    %c0_i32 = arith.constant 0 : i32
    %c0_i32_0 = arith.constant 0 : i32
    %c0_i32_1 = arith.constant 0 : i32
    return %c0_i32, %c0_i32_0 : i32, i32
  }
  func.func @transform_6(%arg0: i32) -> (i32, i32) {
    %c0_i32 = arith.constant 0 : i32
    %c0_i32_0 = arith.constant 0 : i32
    %c0_i32_1 = arith.constant 0 : i32
    return %c0_i32, %c0_i32_0 : i32, i32
  }
  func.func @transform_7(%arg0: i32) -> (i32, i32) {
    %c0_i32 = arith.constant 0 : i32
    %c0_i32_0 = arith.constant 0 : i32
    %c0_i32_1 = arith.constant 0 : i32
    return %c0_i32, %c0_i32_0 : i32, i32
  }
  func.func @transform_8(%arg0: i32) -> (i32, i32) {
    %c0_i32 = arith.constant 0 : i32
    %c0_i32_0 = arith.constant 0 : i32
    %c0_i32_1 = arith.constant 0 : i32
    return %c0_i32, %c0_i32_0 : i32, i32
  }
  func.func @transform_9(%arg0: i32) -> (i32, i32) {
    %c0_i32 = arith.constant 0 : i32
    %c0_i32_0 = arith.constant 0 : i32
    %c0_i32_1 = arith.constant 0 : i32
    return %c0_i32, %c0_i32_0 : i32, i32
  }
  func.func @transform_10(%arg0: i32) -> (i32, i32) {
    %c0_i32 = arith.constant 0 : i32
    %c0_i32_0 = arith.constant 0 : i32
    %c0_i32_1 = arith.constant 0 : i32
    return %c0_i32, %c0_i32_0 : i32, i32
  }
  func.func @transform_11(%arg0: i32) -> (i32, i32) {
    %c0_i32 = arith.constant 0 : i32
    %c0_i32_0 = arith.constant 0 : i32
    %c0_i32_1 = arith.constant 0 : i32
    return %c0_i32, %c0_i32_0 : i32, i32
  }
  func.func @transform_12(%arg0: i32) -> (i32, i32) {
    %c0_i32 = arith.constant 0 : i32
    %c0_i32_0 = arith.constant 0 : i32
    %c0_i32_1 = arith.constant 0 : i32
    return %c0_i32, %c0_i32_0 : i32, i32
  }
  func.func @transform_13(%arg0: i32) -> (i32, i32) {
    %c0_i32 = arith.constant 0 : i32
    %c0_i32_0 = arith.constant 0 : i32
    %c0_i32_1 = arith.constant 0 : i32
    return %c0_i32, %c0_i32_0 : i32, i32
  }
  func.func @transform_14(%arg0: i32) -> (i32, i32) {
    %c0_i32 = arith.constant 0 : i32
    %c0_i32_0 = arith.constant 0 : i32
    %c0_i32_1 = arith.constant 0 : i32
    return %c0_i32, %c0_i32_0 : i32, i32
  }
  func.func @transform_15(%arg0: i32) -> (i32, i32) {
    %c0_i32 = arith.constant 0 : i32
    %c0_i32_0 = arith.constant 0 : i32
    return %arg0, %c0_i32 : i32, i32
  }
}

</mosaic_0001>

<bundles_post_ra>
// kernel: tpu_custom_call.1
= control target key start
LH: loop header
LB: loop body
LE: loop exit
PB: predicated region body
PF: predicated region fallthrough
CT: control target
= control target key end

     0   :  { %s7657_s0 = inlined_call_operand.hbm [shape: f32[8,64], index: 0, kind: input, shape index: {}]   ;;  %s7658_s1 = inlined_call_operand.hbm [shape: bf16[64,128], index: 1, kind: input, shape index: {}]   ;;  %s7659_s2 = inlined_call_operand.hbm [shape: f32[1,128], index: 2, kind: input, shape index: {}]   ;;  %s7660_s3 = inlined_call_operand.hbm [shape: f32[1,128], index: 3, kind: input, shape index: {}]   ;;  %s7661_s4 = inlined_call_operand.hbm [shape: f32[1,128], index: 4, kind: input, shape index: {}]   ;;  %s7662_s5 = inlined_call_operand.hbm [shape: bf16[128,1024], index: 5, kind: input, shape index: {}]   ;;  %s7663_s6 = inlined_call_operand.hbm [shape: f32[1,1024], index: 6, kind: input, shape index: {}]   ;;  %s7664_s7 = inlined_call_operand.hbm [shape: f32[1,1024], index: 7, kind: input, shape index: {}]   ;;  %s7665_s8 = inlined_call_operand.hbm [shape: f32[1,1024], index: 8, kind: input, shape index: {}]   ;;  %s7666_s9 = inlined_call_operand.hbm [shape: bf16[1024,1024], index: 9, kind: input, shape index: {}]   ;;  %s7667_s10 = inlined_call_operand.hbm [shape: f32[1,1024], index: 10, kind: input, shape index: {}]   ;;  %s7668_s11 = inlined_call_operand.hbm [shape: f32[1,1024], index: 11, kind: input, shape index: {}]   ;;  %s7669_s12 = inlined_call_operand.hbm [shape: f32[1,1024], index: 12, kind: input, shape index: {}]   ;;  %s7670_s13 = inlined_call_operand.hbm [shape: bf16[1024,128], index: 13, kind: input, shape index: {}]   ;;  %s7671_s14 = inlined_call_operand.hbm [shape: f32[1,128], index: 14, kind: input, shape index: {}]   ;;  %s7672_s15 = inlined_call_operand.hbm [shape: f32[8,128], index: 15, kind: output, shape index: {}]  }
   0x1   :  { %7674 = sst [smem:[#allocation36_spill]] %s7672_s15 }
   0x2   :  { %20 = vsyncpa [#allocation3], 0 }
   0x3   :  { %21 = vsyncpa [#allocation6], 0 }
   0x4   :  { %22 = vsyncpa [#allocation9], 0 }
   0x5   :  { %23 = vsyncpa [#allocation12], 0 }
   0x6   :  { %24 = vsyncpa [#allocation15], 0 }
   0x7   :  { %25 = vsyncpa [#allocation18], 0 }
   0x8   :  { %26 = vsyncpa [#allocation21], 0 }
   0x9   :  { %27 = vsyncpa [#allocation24], 0 }
   0xa   :  { %28 = vsyncpa [#allocation4], 0  ;;  %s7015_s18 = smov [#allocation5]   ;;  %s6645_s22 = scalar_lea.hbm %s7658_s1, 512 }
   0xb   :  { %s44_s19 = sshll.u32 %s7015_s18, 4  ;;  %p6646_p0 = scmp.ne.s32.totalorder %s7658_s1, %s6645_s22  ;;  %s45_s19 = int_to_ptr.vmem [resolvable:$true] %s44_s19 }
   0xc   :  { %p6649_p1 = scmp.lt.u32.totalorder %s6645_s22, %s7658_s1 }
   0xe   :  { %p6651_p2 = pnand %p6649_p1, %p6646_p0 }
  0x10   :  { %6654 = shalt.err (!%p6651_p2)
}
  0x11   :  { %s6655_s27 = scalar_lea.vmem %s45_s19, 512  ;;  %p6660_p4 = scmp.lt.s32.totalorder %s45_s19, %s45_s19 }
  0x12   :  { %p6656_p3 = scmp.ne.s32.totalorder %s45_s19, %s6655_s27  ;;  %p6661_p5 = scmp.lt.s32.totalorder %s6655_s27, %s6655_s27 }
  0x14   :  { %p6662_p6 = por %p6661_p5, %p6660_p4 }
  0x16   :  { %p6663_p7 = pnand %p6662_p6, %p6656_p3 }
  0x18   :  { %6666 = shalt.err (!%p6663_p7)
}
  0x19   :  { %s7016_s28 = smov 64   ;;  %s7017_s29 = smov 4  }
  0x1a   :  { %50 = dma.hbm_to_vmem [thread:$0]  %s7658_s1, 512, %s45_s19, [#allocation6], %s7016_s28, %s7016_s28, %s7017_s29  }
  0x1b   :  { %s7018_s17 = smov [#allocation8]   ;;  %s7019_s20 = smov [#allocation11]  }
  0x1c   :  { %s67_s18 = sshll.u32 %s7018_s17, 4  ;;  %s86_s21 = sshll.u32 %s7019_s20, 4  ;;  %s68_s18 = int_to_ptr.vmem [resolvable:$true] %s67_s18  ;;  %s87_s21 = int_to_ptr.vmem [resolvable:$true] %s86_s21 }
  0x1d   :  { %s6667_s24 = scalar_lea.hbm %s7660_s3, 16 }
  0x1e   :  { %p6668_p8 = scmp.ne.s32.totalorder %s7660_s3, %s6667_s24  ;;  %p6671_p9 = scmp.lt.u32.totalorder %s6667_s24, %s7660_s3 }
  0x20   :  { %p6673_p10 = pnand %p6671_p9, %p6668_p8 }
  0x22   :  { %6676 = shalt.err (!%p6673_p10)
}
  0x23   :  { %s6677_s1 = scalar_lea.vmem %s68_s18, 16  ;;  %s6681_s19 = scalar_lea.vmem %s68_s18, 32 }
  0x24   :  { %p6678_p11 = scmp.ne.s32.totalorder %s68_s18, %s6677_s1  ;;  %p6682_p12 = scmp.lt.s32.totalorder %s68_s18, %s68_s18 }
  0x25   :  { %p6683_p13 = scmp.lt.s32.totalorder %s6681_s19, %s6677_s1 }
  0x27   :  { %p6684_p0 = por %p6683_p13, %p6682_p12 }
  0x29   :  { %p6685_p1 = pnand %p6684_p0, %p6678_p11 }
  0x2b   :  { %6688 = shalt.err (!%p6685_p1)
}
  0x2c   :  { %70 = dma.hbm_to_vmem [thread:$0]  %s7660_s3, 16, %s68_s18, [#allocation9]  }
  0x2d   :  { %s6689_s15 = scalar_lea.hbm %s7662_s5, 8192 }
  0x2e   :  { %p6690_p2 = scmp.ne.s32.totalorder %s7662_s5, %s6689_s15  ;;  %p6693_p3 = scmp.lt.u32.totalorder %s6689_s15, %s7662_s5 }
  0x30   :  { %p6695_p4 = pnand %p6693_p3, %p6690_p2 }
  0x32   :  { %6698 = shalt.err (!%p6695_p4)
}
  0x33   :  { %s6699_s26 = scalar_lea.vmem %s87_s21, 8192  ;;  %p6704_p6 = scmp.lt.s32.totalorder %s87_s21, %s87_s21 }
  0x34   :  { %p6700_p5 = scmp.ne.s32.totalorder %s87_s21, %s6699_s26  ;;  %p6705_p7 = scmp.lt.s32.totalorder %s6699_s26, %s6699_s26 }
  0x36   :  { %p6706_p8 = por %p6705_p7, %p6704_p6 }
  0x38   :  { %p6707_p9 = pnand %p6706_p8, %p6700_p5 }
  0x3a   :  { %6710 = shalt.err (!%p6707_p9)
}
  0x3b   :  { %s7020_s3 = smov 512   ;;  %s7021_s18 = smov 32  }
  0x3c   :  { %92 = dma.hbm_to_vmem [thread:$0]  %s7662_s5, 8192, %s87_s21, [#allocation12], %s7020_s3, %s7020_s3, %s7021_s18  }
  0x3d   :  { %s7022_s19 = smov [#allocation14]   ;;  %s7023_s16 = smov [#allocation17]  }
  0x3e   :  { %s109_s30 = sshll.u32 %s7022_s19, 4  ;;  %s128_s17 = sshll.u32 %s7023_s16, 4  ;;  %s110_s30 = int_to_ptr.vmem [resolvable:$true] %s109_s30  ;;  %s129_s17 = int_to_ptr.vmem [resolvable:$true] %s128_s17 }
  0x3f   :  { %s6711_s22 = scalar_lea.hbm %s7664_s7, 128 }
  0x40   :  { %p6712_p10 = scmp.ne.s32.totalorder %s7664_s7, %s6711_s22  ;;  %p6715_p11 = scmp.lt.u32.totalorder %s6711_s22, %s7664_s7 }
  0x42   :  { %p6717_p12 = pnand %p6715_p11, %p6712_p10 }
  0x44   :  { %6720 = shalt.err (!%p6717_p12)
}
  0x45   :  { %s6721_s5 = scalar_lea.vmem %s110_s30, 128  ;;  %p6726_p0 = scmp.lt.s32.totalorder %s110_s30, %s110_s30 }
  0x46   :  { %p6722_p13 = scmp.ne.s32.totalorder %s110_s30, %s6721_s5  ;;  %p6727_p1 = scmp.lt.s32.totalorder %s6721_s5, %s6721_s5 }
  0x48   :  { %p6728_p2 = por %p6727_p1, %p6726_p0 }
  0x4a   :  { %p6729_p3 = pnand %p6728_p2, %p6722_p13 }
  0x4c   :  { %6732 = shalt.err (!%p6729_p3)
}
  0x4d   :  { %112 = dma.hbm_to_vmem [thread:$0]  %s7664_s7, 128, %s110_s30, [#allocation15]  }
  0x4e   :  { %s6733_s16 = scalar_lea.hbm %s7666_s9, 65536 }
  0x4f   :  { %p6734_p4 = scmp.ne.s32.totalorder %s7666_s9, %s6733_s16  ;;  %p6737_p5 = scmp.lt.u32.totalorder %s6733_s16, %s7666_s9 }
  0x51   :  { %p6739_p6 = pnand %p6737_p5, %p6734_p4 }
  0x53   :  { %6742 = shalt.err (!%p6739_p6)
}
  0x54   :  { %s6743_s24 = scalar_lea.vmem %s129_s17, 65536  ;;  %p6748_p8 = scmp.lt.s32.totalorder %s129_s17, %s129_s17 }
  0x55   :  { %p6744_p7 = scmp.ne.s32.totalorder %s129_s17, %s6743_s24  ;;  %p6749_p9 = scmp.lt.s32.totalorder %s6743_s24, %s6743_s24 }
  0x57   :  { %p6750_p10 = por %p6749_p9, %p6748_p8 }
  0x59   :  { %p6751_p11 = pnand %p6750_p10, %p6744_p7 }
  0x5b   :  { %6754 = shalt.err (!%p6751_p11)
}
  0x5c   :  { %134 = dma.hbm_to_vmem [thread:$0]  %s7666_s9, 65536, %s129_s17, [#allocation18], %s7020_s3, %s7020_s3, %s7021_s18  }
  0x5d   :  { %s7024_s25 = smov [#allocation20]   ;;  %s7025_s5 = smov [#allocation23]  }
  0x5e   :  { %s151_s26 = sshll.u32 %s7024_s25, 4  ;;  %s170_s21 = sshll.u32 %s7025_s5, 4  ;;  %s152_s26 = int_to_ptr.vmem [resolvable:$true] %s151_s26  ;;  %s171_s21 = int_to_ptr.vmem [resolvable:$true] %s170_s21 }
  0x5f   :  { %s6755_s19 = scalar_lea.hbm %s7668_s11, 128 }
  0x60   :  { %p6756_p12 = scmp.ne.s32.totalorder %s7668_s11, %s6755_s19  ;;  %p6759_p13 = scmp.lt.u32.totalorder %s6755_s19, %s7668_s11 }
  0x62   :  { %p6761_p0 = pnand %p6759_p13, %p6756_p12 }
  0x64   :  { %6764 = shalt.err (!%p6761_p0)
}
  0x65   :  { %s6765_s9 = scalar_lea.vmem %s152_s26, 128  ;;  %p6770_p2 = scmp.lt.s32.totalorder %s152_s26, %s152_s26 }
  0x66   :  { %p6766_p1 = scmp.ne.s32.totalorder %s152_s26, %s6765_s9  ;;  %p6771_p3 = scmp.lt.s32.totalorder %s6765_s9, %s6765_s9 }
  0x68   :  { %p6772_p4 = por %p6771_p3, %p6770_p2 }
  0x6a   :  { %p6773_p5 = pnand %p6772_p4, %p6766_p1 }
  0x6c   :  { %6776 = shalt.err (!%p6773_p5)
}
  0x6d   :  { %154 = dma.hbm_to_vmem [thread:$0]  %s7668_s11, 128, %s152_s26, [#allocation21]  }
  0x6e   :  { %s6777_s24 = scalar_lea.hbm %s7670_s13, 8192 }
  0x6f   :  { %p6778_p6 = scmp.ne.s32.totalorder %s7670_s13, %s6777_s24  ;;  %p6781_p7 = scmp.lt.u32.totalorder %s6777_s24, %s7670_s13 }
  0x71   :  { %p6783_p8 = pnand %p6781_p7, %p6778_p6 }
  0x73   :  { %6786 = shalt.err (!%p6783_p8)
}
  0x74   :  { %s6787_s27 = scalar_lea.vmem %s171_s21, 8192  ;;  %p6792_p10 = scmp.lt.s32.totalorder %s171_s21, %s171_s21 }
  0x75   :  { %p6788_p9 = scmp.ne.s32.totalorder %s171_s21, %s6787_s27  ;;  %p6793_p11 = scmp.lt.s32.totalorder %s6787_s27, %s6787_s27 }
  0x77   :  { %p6794_p12 = por %p6793_p11, %p6792_p10 }
  0x79   :  { %p6795_p13 = pnand %p6794_p12, %p6788_p9 }
  0x7b   :  { %6798 = shalt.err (!%p6795_p13)
}
  0x7c   :  { %176 = dma.hbm_to_vmem [thread:$0]  %s7670_s13, 8192, %s171_s21, [#allocation24], %s7016_s28, %s7016_s28, %s7017_s29  }
  0x7d   :  { %s7026_s1 = smov [#allocation2]   ;;  %s7027_s16 = smov [#allocation7]  }
  0x7e   :  { %s35_s19 = sshll.u32 %s7026_s1, 4  ;;  %s57_s20 = sshll.u32 %s7027_s16, 4  ;;  %s36_s19 = int_to_ptr.vmem [resolvable:$true] %s35_s19  ;;  %s58_s20 = int_to_ptr.vmem [resolvable:$true] %s57_s20 }
  0x7f   :  { %s6799_s9 = scalar_lea.hbm %s7657_s0, 128 }
  0x80   :  { %p6800_p0 = scmp.ne.s32.totalorder %s7657_s0, %s6799_s9  ;;  %p6803_p1 = scmp.lt.u32.totalorder %s6799_s9, %s7657_s0 }
  0x82   :  { %p6805_p2 = pnand %p6803_p1, %p6800_p0 }
  0x84   :  { %6808 = shalt.err (!%p6805_p2)
}
  0x85   :  { %s6809_s13 = scalar_lea.vmem %s36_s19, 128  ;;  %p6814_p4 = scmp.lt.s32.totalorder %s36_s19, %s36_s19 }
  0x86   :  { %p6810_p3 = scmp.ne.s32.totalorder %s36_s19, %s6809_s13  ;;  %p6815_p5 = scmp.lt.s32.totalorder %s6809_s13, %s6809_s13 }
  0x88   :  { %p6816_p6 = por %p6815_p5, %p6814_p4 }
  0x8a   :  { %p6817_p7 = pnand %p6816_p6, %p6810_p3 }
  0x8c   :  { %6820 = shalt.err (!%p6817_p7)
}
  0x8d   :  { %38 = dma.hbm_to_vmem [thread:$0]  %s7657_s0, 128, %s36_s19, [#allocation3]  }
  0x8e   :  { %s6821_s7 = scalar_lea.hbm %s7659_s2, 16 }
  0x8f   :  { %p6822_p8 = scmp.ne.s32.totalorder %s7659_s2, %s6821_s7  ;;  %p6825_p9 = scmp.lt.u32.totalorder %s6821_s7, %s7659_s2 }
  0x91   :  { %p6827_p10 = pnand %p6825_p9, %p6822_p8 }
  0x93   :  { %6830 = shalt.err (!%p6827_p10)
}
  0x94   :  { %s6831_s11 = scalar_lea.vmem %s58_s20, 16  ;;  %s6835_s26 = scalar_lea.vmem %s58_s20, 32 }
  0x95   :  { %p6832_p11 = scmp.ne.s32.totalorder %s58_s20, %s6831_s11  ;;  %p6836_p12 = scmp.lt.s32.totalorder %s58_s20, %s58_s20 }
  0x96   :  { %p6837_p13 = scmp.lt.s32.totalorder %s6835_s26, %s6831_s11 }
  0x98   :  { %p6838_p0 = por %p6837_p13, %p6836_p12 }
  0x9a   :  { %p6839_p1 = pnand %p6838_p0, %p6832_p11 }
  0x9c   :  { %6842 = shalt.err (!%p6839_p1)
}
  0x9d   :  { %60 = dma.hbm_to_vmem [thread:$0]  %s7659_s2, 16, %s58_s20, [#allocation6]  }
  0x9e   :  { %s7028_s19 = smov [#allocation10]   ;;  %s7029_s15 = smov [#allocation13]  }
  0x9f   :  { %s77_s16 = sshll.u32 %s7028_s19, 4  ;;  %s99_s22 = sshll.u32 %s7029_s15, 4  ;;  %s78_s16 = int_to_ptr.vmem [resolvable:$true] %s77_s16  ;;  %s100_s22 = int_to_ptr.vmem [resolvable:$true] %s99_s22 }
  0xa0   :  { %s6843_s18 = scalar_lea.hbm %s7661_s4, 16 }
  0xa1   :  { %p6844_p2 = scmp.ne.s32.totalorder %s7661_s4, %s6843_s18  ;;  %p6847_p3 = scmp.lt.u32.totalorder %s6843_s18, %s7661_s4 }
  0xa3   :  { %p6849_p4 = pnand %p6847_p3, %p6844_p2 }
  0xa5   :  { %6852 = shalt.err (!%p6849_p4)
}
  0xa6   :  { %s6853_s2 = scalar_lea.vmem %s78_s16, 16  ;;  %s6857_s20 = scalar_lea.vmem %s78_s16, 32 }
  0xa7   :  { %p6854_p5 = scmp.ne.s32.totalorder %s78_s16, %s6853_s2  ;;  %p6858_p6 = scmp.lt.s32.totalorder %s78_s16, %s78_s16 }
  0xa8   :  { %p6859_p7 = scmp.lt.s32.totalorder %s6857_s20, %s6853_s2 }
  0xaa   :  { %p6860_p8 = por %p6859_p7, %p6858_p6 }
  0xac   :  { %p6861_p9 = pnand %p6860_p8, %p6854_p5 }
  0xae   :  { %6864 = shalt.err (!%p6861_p9)
}
  0xaf   :  { %80 = dma.hbm_to_vmem [thread:$0]  %s7661_s4, 16, %s78_s16, [#allocation9]  }
  0xb0   :  { %s6865_s30 = scalar_lea.hbm %s7663_s6, 128 }
  0xb1   :  { %p6866_p10 = scmp.ne.s32.totalorder %s7663_s6, %s6865_s30  ;;  %p6869_p11 = scmp.lt.u32.totalorder %s6865_s30, %s7663_s6 }
  0xb3   :  { %p6871_p12 = pnand %p6869_p11, %p6866_p10 }
  0xb5   :  { %6874 = shalt.err (!%p6871_p12)
}
  0xb6   :  { %s6875_s26 = scalar_lea.vmem %s100_s22, 128  ;;  %p6880_p0 = scmp.lt.s32.totalorder %s100_s22, %s100_s22 }
  0xb7   :  { %p6876_p13 = scmp.ne.s32.totalorder %s100_s22, %s6875_s26  ;;  %p6881_p1 = scmp.lt.s32.totalorder %s6875_s26, %s6875_s26 }
  0xb9   :  { %p6882_p2 = por %p6881_p1, %p6880_p0 }
  0xbb   :  { %p6883_p3 = pnand %p6882_p2, %p6876_p13 }
  0xbd   :  { %6886 = shalt.err (!%p6883_p3)
}
  0xbe   :  { %102 = dma.hbm_to_vmem [thread:$0]  %s7663_s6, 128, %s100_s22, [#allocation12]  }
  0xbf   :  { %s7030_s1 = smov [#allocation16]   ;;  %s7031_s16 = smov [#allocation19]  }
  0xc0   :  { %s119_s19 = sshll.u32 %s7030_s1, 4  ;;  %s141_s15 = sshll.u32 %s7031_s16, 4  ;;  %s120_s19 = int_to_ptr.vmem [resolvable:$true] %s119_s19  ;;  %s142_s15 = int_to_ptr.vmem [resolvable:$true] %s141_s15 }
  0xc1   :  { %s6887_s18 = scalar_lea.hbm %s7665_s8, 128 }
  0xc2   :  { %p6888_p4 = scmp.ne.s32.totalorder %s7665_s8, %s6887_s18  ;;  %p6891_p5 = scmp.lt.u32.totalorder %s6887_s18, %s7665_s8 }
  0xc4   :  { %p6893_p6 = pnand %p6891_p5, %p6888_p4 }
  0xc6   :  { %6896 = shalt.err (!%p6893_p6)
}
  0xc7   :  { %s6897_s6 = scalar_lea.vmem %s120_s19, 128  ;;  %p6902_p8 = scmp.lt.s32.totalorder %s120_s19, %s120_s19 }
  0xc8   :  { %p6898_p7 = scmp.ne.s32.totalorder %s120_s19, %s6897_s6  ;;  %p6903_p9 = scmp.lt.s32.totalorder %s6897_s6, %s6897_s6 }
  0xca   :  { %p6904_p10 = por %p6903_p9, %p6902_p8 }
  0xcc   :  { %p6905_p11 = pnand %p6904_p10, %p6898_p7 }
  0xce   :  { %6908 = shalt.err (!%p6905_p11)
}
  0xcf   :  { %122 = dma.hbm_to_vmem [thread:$0]  %s7665_s8, 128, %s120_s19, [#allocation15]  }
  0xd0   :  { %s6909_s21 = scalar_lea.hbm %s7667_s10, 128 }
  0xd1   :  { %p6910_p12 = scmp.ne.s32.totalorder %s7667_s10, %s6909_s21  ;;  %p6913_p13 = scmp.lt.u32.totalorder %s6909_s21, %s7667_s10 }
  0xd3   :  { %p6915_p0 = pnand %p6913_p13, %p6910_p12 }
  0xd5   :  { %6918 = shalt.err (!%p6915_p0)
}
  0xd6   :  { %s6919_s5 = scalar_lea.vmem %s142_s15, 128  ;;  %p6924_p2 = scmp.lt.s32.totalorder %s142_s15, %s142_s15 }
  0xd7   :  { %p6920_p1 = scmp.ne.s32.totalorder %s142_s15, %s6919_s5  ;;  %p6925_p3 = scmp.lt.s32.totalorder %s6919_s5, %s6919_s5 }
  0xd9   :  { %p6926_p4 = por %p6925_p3, %p6924_p2 }
  0xdb   :  { %p6927_p5 = pnand %p6926_p4, %p6920_p1 }
  0xdd   :  { %6930 = shalt.err (!%p6927_p5)
}
  0xde   :  { %144 = dma.hbm_to_vmem [thread:$0]  %s7667_s10, 128, %s142_s15, [#allocation18]  }
  0xdf   :  { %s7032_s11 = smov [#allocation22]   ;;  %s7033_s4 = smov [#allocation25]  }
  0xe0   :  { %s161_s26 = sshll.u32 %s7032_s11, 4  ;;  %s183_s0 = sshll.u32 %s7033_s4, 4  ;;  %s162_s26 = int_to_ptr.vmem [resolvable:$true] %s161_s26  ;;  %s184_s0 = int_to_ptr.vmem [resolvable:$true] %s183_s0 }
  0xe1   :  { %s6931_s16 = scalar_lea.hbm %s7669_s12, 128 }
  0xe2   :  { %p6932_p6 = scmp.ne.s32.totalorder %s7669_s12, %s6931_s16  ;;  %p6935_p7 = scmp.lt.u32.totalorder %s6931_s16, %s7669_s12 }
  0xe4   :  { %p6937_p8 = pnand %p6935_p7, %p6932_p6 }
  0xe6   :  { %6940 = shalt.err (!%p6937_p8)
}
  0xe7   :  { %s6941_s10 = scalar_lea.vmem %s162_s26, 128  ;;  %p6946_p10 = scmp.lt.s32.totalorder %s162_s26, %s162_s26 }
  0xe8   :  { %p6942_p9 = scmp.ne.s32.totalorder %s162_s26, %s6941_s10  ;;  %p6947_p11 = scmp.lt.s32.totalorder %s6941_s10, %s6941_s10 }
  0xea   :  { %p6948_p12 = por %p6947_p11, %p6946_p10 }
  0xec   :  { %p6949_p13 = pnand %p6948_p12, %p6942_p9 }
  0xee   :  { %6952 = shalt.err (!%p6949_p13)
}
  0xef   :  { %164 = dma.hbm_to_vmem [thread:$0]  %s7669_s12, 128, %s162_s26, [#allocation21]  }
  0xf0   :  { %s6953_s6 = scalar_lea.hbm %s7671_s14, 16 }
  0xf1   :  { %p6954_p0 = scmp.ne.s32.totalorder %s7671_s14, %s6953_s6  ;;  %p6957_p1 = scmp.lt.u32.totalorder %s6953_s6, %s7671_s14 }
  0xf3   :  { %p6959_p2 = pnand %p6957_p1, %p6954_p0 }
  0xf5   :  { %6962 = shalt.err (!%p6959_p2)
}
  0xf6   :  { %s6963_s21 = scalar_lea.vmem %s184_s0, 16  ;;  %s6967_s24 = scalar_lea.vmem %s184_s0, 32 }
  0xf7   :  { %p6964_p3 = scmp.ne.s32.totalorder %s184_s0, %s6963_s21  ;;  %p6968_p4 = scmp.lt.s32.totalorder %s184_s0, %s184_s0 }
  0xf8   :  { %p6969_p5 = scmp.lt.s32.totalorder %s6967_s24, %s6963_s21 }
  0xfa   :  { %p6970_p6 = por %p6969_p5, %p6968_p4 }
  0xfc   :  { %p6971_p7 = pnand %p6970_p6, %p6964_p3 }
  0xfe   :  { %6974 = shalt.err (!%p6971_p7)
}
  0xff   :  { %186 = dma.hbm_to_vmem [thread:$0]  %s7671_s14, 16, %s184_s0, [#allocation24]  }
 0x100   :  { %6997 = dma.done.wait [#allocation3], 128  }
 0x101   :  { %6998 = vsyncadd [#allocation3], 4294967168 }
 0x102   :  { %6999 = dma.done.wait [#allocation6], 528  }
 0x103   :  { %7000 = vsyncadd [#allocation6], 4294966768 }
 0x104   :  { %7001 = dma.done.wait [#allocation9], 32  }
 0x105   :  { %7002 = vsyncadd [#allocation9], 4294967264 }
 0x106   :  { %7003 = dma.done.wait [#allocation12], 8320  }
 0x107   :  { %7004 = vsyncadd [#allocation12], 4294958976 }
 0x108   :  { %7005 = dma.done.wait [#allocation15], 256  }
 0x109   :  { %7006 = vsyncadd [#allocation15], 4294967040 }
 0x10a   :  { %7007 = dma.done.wait [#allocation18], 65664  }
 0x10b   :  { %7008 = vsyncadd [#allocation18], 4294901632 }
 0x10c   :  { %7009 = dma.done.wait [#allocation21], 256  }
 0x10d   :  { %7010 = vsyncadd [#allocation21], 4294967040 }
 0x10e   :  { %7011 = dma.done.wait [#allocation24], 8208  }
 0x10f   :  { %7012 = vsyncadd [#allocation24], 4294959088  ;;  %v7034_v0 = vmov 0.0   ;;  %vm7035_vm0 = vmmov 0   ;;  %v6571_v1 = vld [vmem:[#allocation5] sm:$0xff]   ;;  %v6572_v2 = vld [vmem:[#allocation5 + $0x8] sm:$0xff]  }
 0x110   :  { %6480 = vmatprep.subr.bf16.mxu0 %v7034_v0  ;;  %6488 = vmatprep.mubr.msk.bf16.mxu0 %vm7035_vm0, %v7034_v0  ;;  %v6573_v3 = vld [vmem:[#allocation5 + $0x10] sm:$0xff]   ;;  %vm274_vm1 = vcmask 523264   ;;  %v6574_v4 = vld [vmem:[#allocation5 + $0x18] sm:$0xff]   ;;  %v348_v7 = vld [vmem:[#allocation11] sm:$0xff]  ;;  %v7036_v60 = vmov 0   ;;  %s7037_s14 = smov [#allocation26]  }
 0x111   :  { %6481 = vmatpush3.bf16.msra.mxu0 %v6571_v1  ;;  %v233_v5 = vld [vmem:[#allocation2] sm:$0xff]  ;;  %v352_v8 = vld [vmem:[#allocation11 + $0x20] sm:$0xff]  ;;  %v349_v9 = vld [vmem:[#allocation11 + $0x8] sm:$0xff]  ;;  %806 = vmatprep.mubr.bf16.mxu1 %v7036_v60  ;;  %s5722_s30 = sshll.u32 %s7037_s14, 4  ;;  %s5723_s30 = int_to_ptr.vmem [resolvable:$true] %s5722_s30 }
 0x112   :  { %6482 = vmatprep.subr.bf16.mxu0 %v7034_v0  ;;  %v234_v6 = vpack.c.bf16 %v233_v5, %v233_v5  ;;  %v5747_v10 = vcombine.high %v348_v7, %v352_v8  ;;  %v353_v11 = vld [vmem:[#allocation11 + $0x28] sm:$0xff]  ;;  %v5746_v12 = vcombine.low %v348_v7, %v352_v8  ;;  %v5738_v15 = vld [vmem:[#allocation7] ss:$0 sm:$0xff]  ;;  %v356_v22 = vld [vmem:[#allocation11 + $0x40] sm:$0xff]  ;;  %s6975_s25 = scalar_lea.vmem %s5723_s30, 128  ;;  %p6980_p9 = scmp.lt.s32.totalorder %s5723_s30, %s5723_s30 }
 0x113   :  { %v5748_v13 = vcombine.low %v349_v9, %v353_v11  ;;  %v5749_v14 = vcombine.high %v349_v9, %v353_v11  ;;  %v360_v23 = vld [vmem:[#allocation11 + $0x60] sm:$0xff]  ;;  %v357_v24 = vld [vmem:[#allocation11 + $0x48] sm:$0xff]  ;;  %v350_v5 = vld [vmem:[#allocation11 + $0x10] sm:$0xff]  ;;  %p6976_p8 = scmp.ne.s32.totalorder %s5723_s30, %s6975_s25  ;;  %p6981_p10 = scmp.lt.s32.totalorder %s6975_s25, %s6975_s25 }
 0x114   :  { %774 = vmatprep.subr.bf16.mxu1 %v5747_v10  ;;  %v5755_v25 = vcombine.high %v356_v22, %v360_v23  ;;  %v361_v26 = vld [vmem:[#allocation11 + $0x68] sm:$0xff]  ;;  %v5754_v29 = vcombine.low %v356_v22, %v360_v23  ;;  %v364_v30 = vld [vmem:[#allocation11 + $0x80] sm:$0xff]  ;;  %v351_v10 = vld [vmem:[#allocation11 + $0x18] sm:$0xff] }
 0x115   :  { %6483 = vmatpush3.bf16.msra.mxu0 %v6572_v2  ;;  %775 = vmatpush1.bf16.msra.mxu1 %v5746_v12  ;;  %v5756_v27 = vcombine.low %v357_v24, %v361_v26  ;;  %v5757_v28 = vcombine.high %v357_v24, %v361_v26  ;;  %v368_v31 = vld [vmem:[#allocation11 + $0xa0] sm:$0xff]  ;;  %v365_v32 = vld [vmem:[#allocation11 + $0x88] sm:$0xff]  ;;  %v355_v11 = vld [vmem:[#allocation11 + $0x38] sm:$0xff]  ;;  %p6982_p11 = por %p6981_p10, %p6980_p9 }
 0x116   :  { %6484 = vmatprep.subr.bf16.mxu0 %v7034_v0  ;;  %776 = vmatprep.subr.bf16.mxu1 %v5755_v25  ;;  %v5763_v33 = vcombine.high %v364_v30, %v368_v31  ;;  %v369_v34 = vld [vmem:[#allocation11 + $0xa8] sm:$0xff]  ;;  %v5762_v37 = vcombine.low %v364_v30, %v368_v31  ;;  %v372_v38 = vld [vmem:[#allocation11 + $0xc0] sm:$0xff]  ;;  %v5753_v23 = vcombine.high %v351_v10, %v355_v11 }
 0x117   :  { %v5764_v35 = vcombine.low %v365_v32, %v369_v34  ;;  %v5765_v36 = vcombine.high %v365_v32, %v369_v34  ;;  %v376_v39 = vld [vmem:[#allocation11 + $0xe0] sm:$0xff]  ;;  %v373_v40 = vld [vmem:[#allocation11 + $0xc8] sm:$0xff]  ;;  %p6983_p12 = pnand %p6982_p11, %p6976_p8 }
 0x118   :  { %v5771_v41 = vcombine.high %v372_v38, %v376_v39  ;;  %v377_v42 = vld [vmem:[#allocation11 + $0xe8] sm:$0xff]  ;;  %v5770_v45 = vcombine.low %v372_v38, %v376_v39  ;;  %v380_v46 = vld [vmem:[#allocation11 + $0x100] sm:$0xff]  ;;  %v362_v38 = vld [vmem:[#allocation11 + $0x70] sm:$0xff] }
 0x119   :  { %6485 = vmatpush3.bf16.msra.mxu0 %v6573_v3  ;;  %777 = vmatpush1.bf16.msra.mxu1 %v5754_v29  ;;  %v5772_v43 = vcombine.low %v373_v40, %v377_v42  ;;  %v5773_v44 = vcombine.high %v373_v40, %v377_v42  ;;  %v384_v47 = vld [vmem:[#allocation11 + $0x120] sm:$0xff]  ;;  %v381_v48 = vld [vmem:[#allocation11 + $0x108] sm:$0xff]  ;;  %v359_v39 = vld [vmem:[#allocation11 + $0x58] sm:$0xff] }
 0x11a   :  { %6486 = vmatprep.subr.bf16.mxu0 %v7034_v0  ;;  %778 = vmatprep.subr.bf16.mxu1 %v5763_v33  ;;  %v5779_v49 = vcombine.high %v380_v46, %v384_v47  ;;  %v385_v50 = vld [vmem:[#allocation11 + $0x128] sm:$0xff]  ;;  %v5778_v51 = vcombine.low %v380_v46, %v384_v47  ;;  %v388_v52 = vld [vmem:[#allocation11 + $0x140] sm:$0xff]  ;;  %v5744_v33 = vld [vmem:[#allocation8] ss:$0 sm:$0xff] }
 0x11b   :  { %v392_v53 = vld [vmem:[#allocation11 + $0x160] sm:$0xff]  ;;  %v5780_v54 = vcombine.low %v381_v48, %v385_v50  ;;  %v5781_v55 = vcombine.high %v381_v48, %v385_v50  ;;  %v389_v57 = vld [vmem:[#allocation11 + $0x148] sm:$0xff]  ;;  %v363_v40 = vld [vmem:[#allocation11 + $0x78] sm:$0xff] }
 0x11c   :  { %v5787_v56 = vcombine.high %v388_v52, %v392_v53  ;;  %v393_v58 = vld [vmem:[#allocation11 + $0x168] sm:$0xff]  ;;  %v396_v59 = vld [vmem:[#allocation11 + $0x180] sm:$0xff]  ;;  %v5786_v1 = vcombine.low %v388_v52, %v392_v53  ;;  %v370_v46 = vld [vmem:[#allocation11 + $0xb0] sm:$0xff] }
 0x11d   :  { %6487 = vmatpush3.bf16.msra.mxu0 %v6574_v4  ;;  %779 = vmatpush1.bf16.msra.mxu1 %v5762_v37  ;;  %v5789_v61 = vcombine.high %v389_v57, %v393_v58  ;;  %v400_v62 = vld [vmem:[#allocation11 + $0x1a0] sm:$0xff]  ;;  %v397_v63 = vld [vmem:[#allocation11 + $0x188] sm:$0xff]  ;;  %v5788_v2 = vcombine.low %v389_v57, %v393_v58  ;;  %v358_v37 = vld [vmem:[#allocation11 + $0x50] sm:$0xff] }
 0x11e   :  { %815 = vmatprep.subr.bf16.mxu0 %v5749_v14  ;;  %780 = vmatprep.subr.bf16.mxu1 %v5771_v41  ;;  %v401_v0 = vld [vmem:[#allocation11 + $0x1a8] sm:$0xff]  ;;  %v5795_v3 = vcombine.high %v396_v59, %v400_v62  ;;  %v404_v4 = vld [vmem:[#allocation11 + $0x1c0] sm:$0xff]  ;;  %v5752_v14 = vcombine.low %v351_v10, %v355_v11  ;;  %v367_v47 = vld [vmem:[#allocation11 + $0x98] sm:$0xff] }
 0x11f   :  { %v5797_v7 = vcombine.high %v397_v63, %v401_v0  ;;  %v408_v8 = vld [vmem:[#allocation11 + $0x1e0] sm:$0xff]  ;;  %v405_v12 = vld [vmem:[#allocation11 + $0x1c8] sm:$0xff]  ;;  %v371_v48 = vld [vmem:[#allocation11 + $0xb8] sm:$0xff] }
 0x120   :  { %6489 = vmatmul.mubr.msk.bf16.vlgmr.msra.gmra.mrb[0].mxu0 %vm274_vm1, %v234_v6  ;;  %v354_v6 = vld [vmem:[#allocation11 + $0x30] sm:$0xff]  ;;  %v5768_v57 = vcombine.low %v367_v47, %v371_v48 }
 0x121   :  { %816 = vmatpush1.bf16.msra.mxu0 %v5748_v13  ;;  %781 = vmatpush1.bf16.msra.mxu1 %v5770_v45  ;;  %v5750_v9 = vcombine.low %v350_v5, %v354_v6  ;;  %v409_v13 = vld [vmem:[#allocation11 + $0x1e8] sm:$0xff]  ;;  %v5751_v22 = vcombine.high %v350_v5, %v354_v6  ;;  %v366_v45 = vld [vmem:[#allocation11 + $0x90] sm:$0xff]  ;;  %v391_v6 = vld [vmem:[#allocation11 + $0x158] sm:$0xff] }
 0x122   :  { %817 = vmatprep.subr.bf16.mxu0 %v5757_v28  ;;  %782 = vmatprep.subr.bf16.mxu1 %v5779_v49  ;;  %v5760_v49 = vcombine.low %v359_v39, %v363_v40  ;;  %v5767_v50 = vcombine.high %v366_v45, %v370_v46  ;;  %v374_v52 = vld [vmem:[#allocation11 + $0xd0] sm:$0xff] }
 0x123   :  { %847 = vmatprep.mubr.bf16.mxu0 %v7036_v60  ;;  %v378_v53 = vld [vmem:[#allocation11 + $0xf0] sm:$0xff] }
 0x124   :  { %v5775_v58 = vcombine.high %v374_v52, %v378_v53  ;;  %v394_v5 = vld [vmem:[#allocation11 + $0x170] sm:$0xff] }
 0x125   :  { %818 = vmatpush1.bf16.msra.mxu0 %v5756_v27  ;;  %783 = vmatpush1.bf16.msra.mxu1 %v5778_v51  ;;  %v5769_v51 = vcombine.high %v367_v47, %v371_v48  ;;  %v1122_v47 = vld [vmem:[#allocation17 + $0xa0] sm:$0xff]  ;;  %v1119_v48 = vld [vmem:[#allocation17 + $0x88] sm:$0xff] }
 0x126   :  { %819 = vmatprep.subr.bf16.mxu0 %v5765_v36  ;;  %784 = vmatprep.subr.bf16.mxu1 %v5787_v56  ;;  %v5766_v56 = vcombine.low %v366_v45, %v370_v46  ;;  %v1118_v45 = vld [vmem:[#allocation17 + $0x80] sm:$0xff] }
 0x129   :  { %820 = vmatpush1.bf16.msra.mxu0 %v5764_v35  ;;  %785 = vmatpush1.bf16.msra.mxu1 %v5786_v1  ;;  %v5745_v35 = vld [vmem:[#allocation10] ss:$0 sm:$0xff]  ;;  %v5774_v1 = vcombine.low %v374_v52, %v378_v53 }
 0x12a   :  { %821 = vmatprep.subr.bf16.mxu0 %v5773_v44  ;;  %786 = vmatprep.subr.bf16.mxu1 %v5795_v3  ;;  %v5761_v44 = vcombine.high %v359_v39, %v363_v40  ;;  %v1126_v52 = vld [vmem:[#allocation17 + $0xc0] sm:$0xff] }
 0x12b   :  { %v1130_v53 = vld [vmem:[#allocation17 + $0xe0] sm:$0xff] }
 0x12d   :  { %822 = vmatpush1.bf16.msra.mxu0 %v5772_v43  ;;  %v5759_v43 = vcombine.high %v358_v37, %v362_v38 }
 0x12e   :  { %823 = vmatprep.subr.bf16.mxu0 %v5781_v55  ;;  %v379_v55 = vld [vmem:[#allocation11 + $0xf8] sm:$0xff] }
 0x131   :  { %824 = vmatpush1.bf16.msra.mxu0 %v5780_v54  ;;  %v375_v54 = vld [vmem:[#allocation11 + $0xd8] sm:$0xff] }
 0x132   :  { %825 = vmatprep.subr.bf16.mxu0 %v5789_v61  ;;  %v382_v61 = vld [vmem:[#allocation11 + $0x110] sm:$0xff] }
 0x135   :  { %826 = vmatpush1.bf16.msra.mxu0 %v5788_v2  ;;  %v5776_v2 = vcombine.low %v375_v54, %v379_v55 }
 0x136   :  { %827 = vmatprep.subr.bf16.mxu0 %v5797_v7  ;;  %v395_v7 = vld [vmem:[#allocation11 + $0x178] sm:$0xff] }
 0x137   :  { %v5793_v11 = vcombine.high %v391_v6, %v395_v7 }
 0x1f3   :  { %v312_v16 = vpop.f32.mrb[0].mxu0 }
 0x1f4   :  { %v7310_v17 = vadd.f32 %v5738_v15, %v312_v16  ;;  %v6490_v18 = vpop.f32.mrb[1].mxu0  ;;  %v5794_v15 = vcombine.low %v396_v59, %v400_v62  ;;  %v5796_v16 = vcombine.low %v397_v63, %v401_v0  ;;  %v5777_v59 = vcombine.high %v375_v54, %v379_v55  ;;  %v386_v62 = vld [vmem:[#allocation11 + $0x130] sm:$0xff]  ;;  %v383_v63 = vld [vmem:[#allocation11 + $0x118] sm:$0xff]  ;;  %v1127_v54 = vld [vmem:[#allocation17 + $0xc8] sm:$0xff] }
 0x1f5   :  { %v315_v19 = vpop.f32.mrb[2].mxu0  ;;  %v5803_v18 = vcombine.high %v404_v4, %v408_v8  ;;  %v387_v0 = vld [vmem:[#allocation11 + $0x138] sm:$0xff]  ;;  %v5783_v3 = vcombine.high %v382_v61, %v386_v62  ;;  %v1131_v55 = vld [vmem:[#allocation17 + $0xe8] sm:$0xff] }
 0x1f6   :  { %320 = vadd.xlane.f32.xlu0 %v7310_v17  ;;  %v6491_v20 = vpop.f32.mrb[3].mxu0  ;;  %v322_v21 = vmul.f32 %v7310_v17, %v7310_v17  ;;  %v5805_v19 = vcombine.high %v405_v12, %v409_v13  ;;  %787 = vmatpush1.bf16.msra.mxu1 %v5794_v15  ;;  %v403_v15 = vld [vmem:[#allocation11 + $0x1b8] sm:$0xff] }
 0x1f7   :  { %v5802_v20 = vcombine.low %v404_v4, %v408_v8  ;;  %828 = vmatpush1.bf16.msra.mxu0 %v5796_v16  ;;  %788 = vmatprep.subr.bf16.mxu1 %v5803_v18  ;;  %v390_v4 = vld [vmem:[#allocation11 + $0x150] sm:$0xff]  ;;  %v5782_v8 = vcombine.low %v382_v61, %v386_v62  ;;  %v5792_v18 = vcombine.low %v391_v6, %v395_v7  ;;  %v1134_v61 = vld [vmem:[#allocation17 + $0x100] sm:$0xff]  ;;  %v1143_v6 = vld [vmem:[#allocation17 + $0x148] sm:$0xff] }
 0x1f8   :  { %829 = vmatprep.subr.bf16.mxu0 %v5805_v19  ;;  %v5791_v10 = vcombine.high %v390_v4, %v394_v5  ;;  %v5790_v16 = vcombine.low %v390_v4, %v394_v5  ;;  %v1138_v62 = vld [vmem:[#allocation17 + $0x120] sm:$0xff]  ;;  %v1147_v7 = vld [vmem:[#allocation17 + $0x168] sm:$0xff] }
 0x1f9   :  { %v1142_v4 = vld [vmem:[#allocation17 + $0x140] sm:$0xff] }
 0x1fa   :  { %323 = vadd.xlane.f32.xlu0 %v322_v21  ;;  %v5804_v21 = vcombine.low %v405_v12, %v409_v13  ;;  %789 = vmatpush1.bf16.msra.mxu1 %v5802_v20  ;;  %v398_v12 = vld [vmem:[#allocation11 + $0x190] sm:$0xff]  ;;  %v1146_v5 = vld [vmem:[#allocation17 + $0x160] sm:$0xff] }
 0x1fb   :  { %856 = vmatprep.subr.bf16.mxu1 %v5751_v22  ;;  %v402_v13 = vld [vmem:[#allocation11 + $0x1b0] sm:$0xff] }
 0x1fc   :  { %830 = vmatpush1.bf16.msra.mxu0 %v5804_v21  ;;  %v5799_v19 = vcombine.high %v398_v12, %v402_v13  ;;  %v406_v21 = vld [vmem:[#allocation11 + $0x1d0] sm:$0xff] }
 0x1fd   :  { %897 = vmatprep.subr.bf16.mxu0 %v5753_v23  ;;  %v410_v22 = vld [vmem:[#allocation11 + $0x1f0] sm:$0xff]  ;;  %v407_v23 = vld [vmem:[#allocation11 + $0x1d8] sm:$0xff] }
 0x283   :  { %v321_v24 = vpop.xlane.xlu0 %320 }
 0x284   :  { %v325_v25 = vmul.f32 0.0078125, %v321_v24  ;;  %v411_v24 = vld [vmem:[#allocation11 + $0x1f8] sm:$0xff] }
 0x286   :  { %v327_v27 = vmul.f32 %v325_v25, %v325_v25  ;;  %v329_v31 = vsub.f32 %v7310_v17, %v325_v25  ;;  %v5758_v17 = vcombine.low %v358_v37, %v362_v38  ;;  %v5798_v25 = vcombine.low %v398_v12, %v402_v13  ;;  %v1110_v37 = vld [vmem:[#allocation17 + $0x40] sm:$0xff] }
 0x287   :  { %v324_v26 = vpop.xlane.xlu0 %323  ;;  %v1114_v38 = vld [vmem:[#allocation17 + $0x60] sm:$0xff] }
 0x288   :  { %v326_v28 = vmul.f32 0.0078125, %v324_v26  ;;  %v1150_v12 = vld [vmem:[#allocation17 + $0x180] sm:$0xff] }
 0x289   :  { %v1154_v13 = vld [vmem:[#allocation17 + $0x1a0] sm:$0xff] }
 0x28a   :  { %v328_v29 = vsub.f32 %v326_v28, %v327_v27  ;;  %v5807_v27 = vcombine.high %v406_v21, %v410_v22  ;;  %v5809_v28 = vcombine.high %v407_v23, %v411_v24 }
 0x28c   :  { %v330_v30 = vadd.f32 1e-05, %v328_v29  ;;  %v5806_v29 = vcombine.low %v406_v21, %v410_v22  ;;  %v1158_v21 = vld [vmem:[#allocation17 + $0x1c0] sm:$0xff] }
 0x28d   :  { %v1162_v22 = vld [vmem:[#allocation17 + $0x1e0] sm:$0xff] }
 0x28e   :  { %6639 = vrsqrt.f32 %v330_v30  ;;  %v5808_v30 = vcombine.low %v407_v23, %v411_v24  ;;  %v1159_v23 = vld [vmem:[#allocation17 + $0x1c8] sm:$0xff] }
 0x28f   :  { %v1163_v24 = vld [vmem:[#allocation17 + $0x1e8] sm:$0xff] }
 0x298   :  { %v6640_v32 = vpop.eup %6639 }
 0x299   :  { %v332_v34 = vmul.f32 %v6640_v32, %v329_v31  ;;  %v1102_v31 = vld [vmem:[#allocation17] sm:$0xff] }
 0x29a   :  { %v1106_v32 = vld [vmem:[#allocation17 + $0x20] sm:$0xff] }
 0x29b   :  { %v339_v36 = vmul.f32 %v5744_v33, %v332_v34  ;;  %v1103_v33 = vld [vmem:[#allocation17 + $0x8] sm:$0xff]  ;;  %v5810_v34 = vcombine.low %v1102_v31, %v1106_v32 }
 0x29d   :  { %v346_v41 = vadd.f32 %v5745_v35, %v339_v36  ;;  %v5811_v35 = vcombine.high %v1102_v31, %v1106_v32  ;;  %v1107_v36 = vld [vmem:[#allocation17 + $0x28] sm:$0xff] }
 0x29e   :  { %v5812_v39 = vcombine.low %v1103_v33, %v1107_v36  ;;  %v5813_v40 = vcombine.high %v1103_v33, %v1107_v36  ;;  %v1167_v31 = vld [vmem:[#allocation17 + $0x208] sm:$0xff]  ;;  %v5866_v33 = vcombine.low %v1158_v21, %v1162_v22 }
 0x29f   :  { %v7318_v42 = vpack.c.bf16 %v346_v41, %v346_v41  ;;  %v5819_v41 = vcombine.high %v1110_v37, %v1114_v38  ;;  %v1171_v32 = vld [vmem:[#allocation17 + $0x228] sm:$0xff] }
 0x2a0   :  { %v5877_v36 = vcombine.high %v1167_v31, %v1171_v32 }
 0x2a1   :  { %807 = vmatmul.mubr.bf16.vlgmr.msra.gmra.mrb[0].mxu1 %v7318_v42  ;;  %848 = vmatmul.mubr.bf16.vlgmr.msra.gmra.mrb[4].mxu0 %v7318_v42 }
 0x2a2   :  { %857 = vmatpush1.bf16.msra.mxu1 %v5750_v9  ;;  %898 = vmatpush1.bf16.msra.mxu0 %v5752_v14  ;;  %v5784_v9 = vcombine.low %v383_v63, %v387_v0  ;;  %v399_v14 = vld [vmem:[#allocation11 + $0x198] sm:$0xff] }
 0x2a3   :  { %858 = vmatprep.subr.bf16.mxu1 %v5759_v43  ;;  %899 = vmatprep.subr.bf16.mxu0 %v5761_v44  ;;  %v5801_v20 = vcombine.high %v399_v14, %v403_v15  ;;  %v5800_v26 = vcombine.low %v399_v14, %v403_v15  ;;  %v1111_v43 = vld [vmem:[#allocation17 + $0x48] sm:$0xff] }
 0x2a4   :  { %888 = vmatprep.mubr.bf16.mxu1 %v7036_v60  ;;  %929 = vmatprep.mubr.bf16.mxu0 %v7036_v60  ;;  %v5785_v60 = vcombine.high %v383_v63, %v387_v0  ;;  %v1115_v44 = vld [vmem:[#allocation17 + $0x68] sm:$0xff] }
 0x2a5   :  { %v5821_v46 = vcombine.high %v1111_v43, %v1115_v44  ;;  %v1135_v63 = vld [vmem:[#allocation17 + $0x108] sm:$0xff] }
 0x2a6   :  { %859 = vmatpush1.bf16.msra.mxu1 %v5758_v17  ;;  %900 = vmatpush1.bf16.msra.mxu0 %v5760_v49  ;;  %v1123_v17 = vld [vmem:[#allocation17 + $0xa8] sm:$0xff]  ;;  %v5820_v49 = vcombine.low %v1111_v43, %v1115_v44 }
 0x2a7   :  { %860 = vmatprep.subr.bf16.mxu1 %v5767_v50  ;;  %901 = vmatprep.subr.bf16.mxu0 %v5769_v51  ;;  %v5827_v50 = vcombine.high %v1118_v45, %v1122_v47  ;;  %v5829_v51 = vcombine.high %v1119_v48, %v1123_v17  ;;  %v1139_v0 = vld [vmem:[#allocation17 + $0x128] sm:$0xff] }
 0x2a8   :  { %v1151_v14 = vld [vmem:[#allocation17 + $0x188] sm:$0xff] }
 0x2a9   :  { %v1155_v15 = vld [vmem:[#allocation17 + $0x1a8] sm:$0xff] }
 0x2aa   :  { %861 = vmatpush1.bf16.msra.mxu1 %v5766_v56  ;;  %902 = vmatpush1.bf16.msra.mxu0 %v5768_v57  ;;  %v5826_v56 = vcombine.low %v1118_v45, %v1122_v47  ;;  %v5828_v57 = vcombine.low %v1119_v48, %v1123_v17 }
 0x2ab   :  { %862 = vmatprep.subr.bf16.mxu1 %v5775_v58  ;;  %903 = vmatprep.subr.bf16.mxu0 %v5777_v59  ;;  %v5835_v58 = vcombine.high %v1126_v52, %v1130_v53  ;;  %v5837_v59 = vcombine.high %v1127_v54, %v1131_v55 }
 0x2ae   :  { %863 = vmatpush1.bf16.msra.mxu1 %v5774_v1  ;;  %904 = vmatpush1.bf16.msra.mxu0 %v5776_v2  ;;  %v5834_v1 = vcombine.low %v1126_v52, %v1130_v53  ;;  %v5836_v2 = vcombine.low %v1127_v54, %v1131_v55 }
 0x2af   :  { %864 = vmatprep.subr.bf16.mxu1 %v5783_v3  ;;  %905 = vmatprep.subr.bf16.mxu0 %v5785_v60  ;;  %v5843_v3 = vcombine.high %v1134_v61, %v1138_v62  ;;  %v5845_v60 = vcombine.high %v1135_v63, %v1139_v0 }
 0x2b2   :  { %865 = vmatpush1.bf16.msra.mxu1 %v5782_v8  ;;  %906 = vmatpush1.bf16.msra.mxu0 %v5784_v9  ;;  %v5842_v8 = vcombine.low %v1134_v61, %v1138_v62  ;;  %v5844_v9 = vcombine.low %v1135_v63, %v1139_v0 }
 0x2b3   :  { %866 = vmatprep.subr.bf16.mxu1 %v5791_v10  ;;  %907 = vmatprep.subr.bf16.mxu0 %v5793_v11  ;;  %v5851_v10 = vcombine.high %v1142_v4, %v1146_v5  ;;  %v5853_v11 = vcombine.high %v1143_v6, %v1147_v7 }
 0x2b6   :  { %867 = vmatpush1.bf16.msra.mxu1 %v5790_v16  ;;  %908 = vmatpush1.bf16.msra.mxu0 %v5792_v18  ;;  %v5850_v16 = vcombine.low %v1142_v4, %v1146_v5  ;;  %v5852_v18 = vcombine.low %v1143_v6, %v1147_v7 }
 0x2b7   :  { %868 = vmatprep.subr.bf16.mxu1 %v5799_v19  ;;  %909 = vmatprep.subr.bf16.mxu0 %v5801_v20  ;;  %v5859_v19 = vcombine.high %v1150_v12, %v1154_v13  ;;  %v5861_v20 = vcombine.high %v1151_v14, %v1155_v15 }
 0x2ba   :  { %869 = vmatpush1.bf16.msra.mxu1 %v5798_v25  ;;  %910 = vmatpush1.bf16.msra.mxu0 %v5800_v26  ;;  %v5858_v25 = vcombine.low %v1150_v12, %v1154_v13  ;;  %v5860_v26 = vcombine.low %v1151_v14, %v1155_v15 }
 0x2bb   :  { %870 = vmatprep.subr.bf16.mxu1 %v5807_v27  ;;  %911 = vmatprep.subr.bf16.mxu0 %v5809_v28  ;;  %v5867_v27 = vcombine.high %v1158_v21, %v1162_v22  ;;  %v5869_v28 = vcombine.high %v1159_v23, %v1163_v24 }
 0x2be   :  { %871 = vmatpush1.bf16.msra.mxu1 %v5806_v29  ;;  %912 = vmatpush1.bf16.msra.mxu0 %v5808_v30  ;;  %v1166_v29 = vld [vmem:[#allocation17 + $0x200] sm:$0xff] }
 0x2bf   :  { %4216 = vmatprep.subr.bf16.mxu1 %v5811_v35  ;;  %4380 = vmatprep.subr.bf16.mxu0 %v5813_v40  ;;  %v1170_v30 = vld [vmem:[#allocation17 + $0x220] sm:$0xff] }
 0x2c0   :  { %v5875_v35 = vcombine.high %v1166_v29, %v1170_v30 }
 0x2c1   :  { %889 = vmatmul.mubr.bf16.vlgmr.msra.gmra.mrb[4].mxu1 %v7318_v42  ;;  %930 = vmatmul.mubr.bf16.vlgmr.msra.gmra.mrb[8].mxu0 %v7318_v42  ;;  %v5818_v42 = vcombine.low %v1110_v37, %v1114_v38  ;;  %v5874_v37 = vcombine.low %v1166_v29, %v1170_v30  ;;  %v5876_v38 = vcombine.low %v1167_v31, %v1171_v32 }
 0x2c2   :  { %4217 = vmatpush1.bf16.msra.mxu1 %v5810_v34  ;;  %4381 = vmatpush1.bf16.msra.mxu0 %v5812_v39  ;;  %v5868_v34 = vcombine.low %v1159_v23, %v1163_v24 }
 0x2c3   :  { %4218 = vmatprep.subr.bf16.mxu1 %v5819_v41  ;;  %4382 = vmatprep.subr.bf16.mxu0 %v5821_v46  ;;  %v414_v46 = vlaneseq }
 0x2c5   :  { %v415_v17 = vshrl.u32 %v414_v46, 7  ;;  %v1179_v46 = vld [vmem:[#allocation17 + $0x268] sm:$0xff] }
 0x2c6   :  { %4219 = vmatpush1.bf16.msra.mxu1 %v5818_v42  ;;  %4383 = vmatpush1.bf16.msra.mxu0 %v5820_v49 }
 0x2c7   :  { %4220 = vmatprep.subr.bf16.mxu1 %v5827_v50  ;;  %4384 = vmatprep.subr.bf16.mxu0 %v5829_v51  ;;  %v7326_v42 = vsub.s32 0, %v415_v17  ;;  %v7328_v49 = vsub.s32 1, %v415_v17  ;;  %v412_v50 = vld [vmem:[#allocation13] sm:$0xff]  ;;  %v7332_v53 = vsub.s32 2, %v415_v17  ;;  %v7350_v0 = vsub.s32 4, %v415_v17 }
 0x2c9   :  { %v417_v51 = vrot.slane %v412_v50, %v7326_v42  ;;  %v421_v52 = vrot.slane %v412_v50, %v7328_v49  ;;  %v433_v6 = vrot.slane %v412_v50, %v7350_v0 }
 0x2ca   :  { %4221 = vmatpush1.bf16.msra.mxu1 %v5826_v56  ;;  %4385 = vmatpush1.bf16.msra.mxu0 %v5828_v57  ;;  %v425_v56 = vrot.slane %v412_v50, %v7332_v53  ;;  %v7339_v57 = vsub.s32 3, %v415_v17 }
 0x2cb   :  { %4222 = vmatprep.subr.bf16.mxu1 %v5835_v58  ;;  %4386 = vmatprep.subr.bf16.mxu0 %v5837_v59 }
 0x2cc   :  { %v429_v63 = vrot.slane %v412_v50, %v7339_v57 }
 0x2ce   :  { %4223 = vmatpush1.bf16.msra.mxu1 %v5834_v1  ;;  %4387 = vmatpush1.bf16.msra.mxu0 %v5836_v2  ;;  %v7352_v1 = vsub.s32 5, %v415_v17 }
 0x2cf   :  { %4224 = vmatprep.subr.bf16.mxu1 %v5843_v3  ;;  %4388 = vmatprep.subr.bf16.mxu0 %v5845_v60  ;;  %v7354_v3 = vsub.s32 6, %v415_v17 }
 0x2d0   :  { %v437_v7 = vrot.slane %v412_v50, %v7352_v1 }
 0x2d2   :  { %4225 = vmatpush1.bf16.msra.mxu1 %v5842_v8  ;;  %4389 = vmatpush1.bf16.msra.mxu0 %v5844_v9  ;;  %v7363_v8 = vsub.s32 7, %v415_v17  ;;  %v1182_v17 = vld [vmem:[#allocation17 + $0x280] sm:$0xff] }
 0x2d3   :  { %4226 = vmatprep.subr.bf16.mxu1 %v5851_v10  ;;  %4390 = vmatprep.subr.bf16.mxu0 %v5853_v11  ;;  %v441_v10 = vrot.slane %v412_v50, %v7354_v3 }
 0x2d6   :  { %4227 = vmatpush1.bf16.msra.mxu1 %v5850_v16  ;;  %4391 = vmatpush1.bf16.msra.mxu0 %v5852_v18 }
 0x2d7   :  { %4228 = vmatprep.subr.bf16.mxu1 %v5859_v19  ;;  %4392 = vmatprep.subr.bf16.mxu0 %v5861_v20  ;;  %v445_v20 = vrot.slane %v412_v50, %v7363_v8  ;;  %v1186_v50 = vld [vmem:[#allocation17 + $0x2a0] sm:$0xff] }
 0x2da   :  { %4229 = vmatpush1.bf16.msra.mxu1 %v5858_v25  ;;  %4393 = vmatpush1.bf16.msra.mxu0 %v5860_v26 }
 0x2db   :  { %4230 = vmatprep.subr.bf16.mxu1 %v5867_v27  ;;  %4394 = vmatprep.subr.bf16.mxu0 %v5869_v28 }
 0x2de   :  { %4231 = vmatpush1.bf16.msra.mxu1 %v5866_v33  ;;  %4395 = vmatpush1.bf16.msra.mxu0 %v5868_v34 }
 0x2df   :  { %4232 = vmatprep.subr.bf16.mxu1 %v5875_v35  ;;  %4396 = vmatprep.subr.bf16.mxu0 %v5877_v36 }
 0x2e2   :  { %4233 = vmatpush1.bf16.msra.mxu1 %v5874_v37  ;;  %4397 = vmatpush1.bf16.msra.mxu0 %v5876_v38 }
 0x374   :  { %v808_v39 = vpop.f32.mrb[0].mxu1  ;;  %v849_v40 = vpop.f32.mrb[4].mxu0 }
 0x375   :  { %v810_v41 = vpop.f32.mrb[1].mxu1  ;;  %v851_v43 = vpop.f32.mrb[5].mxu0  ;;  %v7334_v54 = vadd.f32 %v808_v39, %v417_v51  ;;  %v7345_v61 = vadd.f32 %v849_v40, %v425_v56  ;;  %v1174_v40 = vld [vmem:[#allocation17 + $0x240] sm:$0xff]  ;;  %v1183_v51 = vld [vmem:[#allocation17 + $0x288] sm:$0xff] }
 0x376   :  { %v812_v44 = vpop.f32.mrb[2].mxu1  ;;  %v853_v45 = vpop.f32.mrb[6].mxu0  ;;  %v7336_v55 = vadd.f32 %v810_v41, %v421_v52  ;;  %v7358_v4 = vadd.f32 %v851_v43, %v429_v63  ;;  %v1178_v41 = vld [vmem:[#allocation17 + $0x260] sm:$0xff]  ;;  %v1175_v43 = vld [vmem:[#allocation17 + $0x248] sm:$0xff]  ;;  %v5891_v52 = vcombine.high %v1182_v17, %v1186_v50 }
 0x377   :  { %v813_v47 = vpop.f32.mrb[3].mxu1  ;;  %v854_v48 = vpop.f32.mrb[7].mxu0  ;;  %v949_v58 = vmul.f32 %v7334_v54, %v7334_v54  ;;  %v951_v60 = vmul.f32 %v7345_v61, %v7345_v61  ;;  %v5882_v44 = vcombine.low %v1174_v40, %v1178_v41  ;;  %v5883_v45 = vcombine.high %v1174_v40, %v1178_v41  ;;  %v1187_v56 = vld [vmem:[#allocation17 + $0x2a8] sm:$0xff]  ;;  %v1190_v63 = vld [vmem:[#allocation17 + $0x2c0] sm:$0xff] }
 0x378   :  { %v950_v59 = vmul.f32 %v7336_v55, %v7336_v55  ;;  %v940_v62 = vadd.f32 %v7336_v55, %v7334_v54  ;;  %v952_v14 = vmul.f32 %v7358_v4, %v7358_v4  ;;  %v5884_v47 = vcombine.low %v1175_v43, %v1179_v46  ;;  %v1223_v40 = vld [vmem:[#allocation17 + $0x3c8] sm:$0xff] }
 0x379   :  { %v5885_v48 = vcombine.high %v1175_v43, %v1179_v46  ;;  %4234 = vmatprep.subr.bf16.mxu1 %v5883_v45  ;;  %v1227_v41 = vld [vmem:[#allocation17 + $0x3e8] sm:$0xff] }
 0x37a   :  { %v957_v2 = vadd.f32 %v950_v59, %v949_v58  ;;  %v941_v5 = vadd.f32 %v940_v62, %v7345_v61  ;;  %4235 = vmatpush1.bf16.msra.mxu1 %v5882_v44  ;;  %v5890_v58 = vcombine.low %v1182_v17, %v1186_v50  ;;  %v5892_v59 = vcombine.low %v1183_v51, %v1187_v56  ;;  %v7390_v17 = vld [vmem:[#allocation17 + $0x400] sm:$0xff] }
 0x37b   :  { %4398 = vmatprep.subr.bf16.mxu0 %v5885_v48  ;;  %v5893_v62 = vcombine.high %v1183_v51, %v1187_v56  ;;  %4236 = vmatprep.subr.bf16.mxu1 %v5891_v52  ;;  %v5933_v46 = vcombine.high %v1223_v40, %v1227_v41  ;;  %v5932_v48 = vcombine.low %v1223_v40, %v1227_v41  ;;  %v7392_v50 = vld [vmem:[#allocation17 + $0x420] sm:$0xff]  ;;  %v7394_v51 = vld [vmem:[#allocation17 + $0x408] sm:$0xff] }
 0x37c   :  { %v958_v9 = vadd.f32 %v957_v2, %v951_v60  ;;  %v942_v13 = vadd.f32 %v941_v5, %v7358_v4  ;;  %4399 = vmatpush1.bf16.msra.mxu0 %v5884_v47  ;;  %v1194_v2 = vld [vmem:[#allocation17 + $0x2e0] sm:$0xff]  ;;  %v1191_v60 = vld [vmem:[#allocation17 + $0x2c8] sm:$0xff]  ;;  %v5939_v52 = vcombine.high %v7390_v17, %v7392_v50 }
 0x37d   :  { %4400 = vmatprep.subr.bf16.mxu0 %v5893_v62  ;;  %v5899_v5 = vcombine.high %v1190_v63, %v1194_v2  ;;  %v7398_v56 = vld [vmem:[#allocation17 + $0x428] sm:$0xff] }
 0x37e   :  { %v959_v23 = vadd.f32 %v958_v9, %v952_v14  ;;  %4237 = vmatpush1.bf16.msra.mxu1 %v5890_v58  ;;  %v5938_v58 = vcombine.low %v7390_v17, %v7392_v50  ;;  %v5941_v62 = vcombine.high %v7394_v51, %v7398_v56  ;;  %v1255_v17 = vld [vmem:[#allocation17 + $0x4c8] sm:$0xff] }
 0x37f   :  { %4238 = vmatprep.subr.bf16.mxu1 %v5899_v5  ;;  %v1259_v50 = vld [vmem:[#allocation17 + $0x4e8] sm:$0xff] }
 0x380   :  { %4401 = vmatpush1.bf16.msra.mxu0 %v5892_v59  ;;  %v5940_v59 = vcombine.low %v7394_v51, %v7398_v56 }
 0x394   :  { %v890_v11 = vpop.f32.mrb[4].mxu1  ;;  %v931_v12 = vpop.f32.mrb[8].mxu0 }
 0x395   :  { %v7369_v15 = vadd.f32 %v890_v11, %v433_v6  ;;  %v892_v16 = vpop.f32.mrb[5].mxu1  ;;  %v933_v18 = vpop.f32.mrb[9].mxu0  ;;  %v7377_v26 = vadd.f32 %v931_v12, %v441_v10  ;;  %v1195_v6 = vld [vmem:[#allocation17 + $0x2e8] sm:$0xff]  ;;  %v1198_v11 = vld [vmem:[#allocation17 + $0x300] sm:$0xff] }
 0x396   :  { %v7371_v19 = vadd.f32 %v892_v16, %v437_v7  ;;  %v894_v21 = vpop.f32.mrb[6].mxu1  ;;  %v935_v22 = vpop.f32.mrb[10].mxu0  ;;  %v7384_v33 = vadd.f32 %v933_v18, %v445_v20  ;;  %v5898_v7 = vcombine.low %v1190_v63, %v1194_v2  ;;  %v5900_v9 = vcombine.low %v1191_v60, %v1195_v6  ;;  %v1202_v12 = vld [vmem:[#allocation17 + $0x320] sm:$0xff]  ;;  %v1203_v16 = vld [vmem:[#allocation17 + $0x328] sm:$0xff] }
 0x397   :  { %v943_v24 = vadd.f32 %v942_v13, %v7369_v15  ;;  %v953_v25 = vmul.f32 %v7369_v15, %v7369_v15  ;;  %v895_v27 = vpop.f32.mrb[7].mxu1  ;;  %v936_v28 = vpop.f32.mrb[11].mxu0  ;;  %v955_v32 = vmul.f32 %v7377_v26, %v7377_v26  ;;  %v5901_v10 = vcombine.high %v1191_v60, %v1195_v6  ;;  %v1199_v13 = vld [vmem:[#allocation17 + $0x308] sm:$0xff]  ;;  %v1206_v18 = vld [vmem:[#allocation17 + $0x340] sm:$0xff] }
 0x398   :  { %v954_v29 = vmul.f32 %v7371_v19, %v7371_v19  ;;  %v956_v38 = vmul.f32 %v7384_v33, %v7384_v33  ;;  %v5907_v14 = vcombine.high %v1198_v11, %v1202_v12  ;;  %v1210_v20 = vld [vmem:[#allocation17 + $0x360] sm:$0xff]  ;;  %4239 = vmatpush1.bf16.msra.mxu1 %v5898_v7  ;;  %v5906_v21 = vcombine.low %v1198_v11, %v1202_v12  ;;  %v7408_v11 = vld [vmem:[#allocation16] sm:$0xff] }
 0x399   :  { %v960_v30 = vadd.f32 %v959_v23, %v953_v25  ;;  %v944_v31 = vadd.f32 %v943_v24, %v7371_v19  ;;  %4402 = vmatprep.subr.bf16.mxu0 %v5901_v10  ;;  %v5909_v22 = vcombine.high %v1199_v13, %v1203_v16  ;;  %v1207_v23 = vld [vmem:[#allocation17 + $0x348] sm:$0xff]  ;;  %v5908_v25 = vcombine.low %v1199_v13, %v1203_v16  ;;  %v7406_v10 = vld [vmem:[#allocation14] sm:$0xff] }
 0x39a   :  { %v1211_v24 = vld [vmem:[#allocation17 + $0x368] sm:$0xff]  ;;  %4403 = vmatpush1.bf16.msra.mxu0 %v5900_v9  ;;  %4240 = vmatprep.subr.bf16.mxu1 %v5907_v14  ;;  %v5915_v27 = vcombine.high %v1206_v18, %v1210_v20  ;;  %v996_v12 = vrot.slane %v7406_v10, %v7328_v49  ;;  %v992_v13 = vrot.slane %v7406_v10, %v7326_v42 }
 0x39b   :  { %v945_v34 = vadd.f32 %v944_v31, %v7377_v26  ;;  %v961_v35 = vadd.f32 %v960_v30, %v954_v29  ;;  %4404 = vmatprep.subr.bf16.mxu0 %v5909_v22  ;;  %v5917_v28 = vcombine.high %v1207_v23, %v1211_v24  ;;  %v1214_v29 = vld [vmem:[#allocation17 + $0x380] sm:$0xff]  ;;  %v1215_v31 = vld [vmem:[#allocation17 + $0x388] sm:$0xff]  ;;  %v1004_v14 = vrot.slane %v7406_v10, %v7339_v57 }
 0x39c   :  { %v1218_v30 = vld [vmem:[#allocation17 + $0x3a0] sm:$0xff]  ;;  %4241 = vmatpush1.bf16.msra.mxu1 %v5906_v21  ;;  %v1000_v16 = vrot.slane %v7406_v10, %v7332_v53  ;;  %v1012_v21 = vrot.slane %v7406_v10, %v7352_v1  ;;  %v1008_v22 = vrot.slane %v7406_v10, %v7350_v0 }
 0x39d   :  { %v946_v36 = vadd.f32 %v945_v34, %v7384_v33  ;;  %v962_v37 = vadd.f32 %v961_v35, %v955_v32  ;;  %v1219_v32 = vld [vmem:[#allocation17 + $0x3a8] sm:$0xff]  ;;  %v5914_v34 = vcombine.low %v1206_v18, %v1210_v20  ;;  %4242 = vmatprep.subr.bf16.mxu1 %v5915_v27  ;;  %v5916_v35 = vcombine.low %v1207_v23, %v1211_v24 }
 0x39e   :  { %4405 = vmatpush1.bf16.msra.mxu0 %v5908_v25  ;;  %v5922_v43 = vcombine.low %v1214_v29, %v1218_v30  ;;  %v5924_v44 = vcombine.low %v1215_v31, %v1219_v32  ;;  %v1045_v18 = vrot.slane %v7408_v11, %v7328_v49  ;;  %v1041_v20 = vrot.slane %v7408_v11, %v7326_v42 }
 0x39f   :  { %947 = vadd.xlane.f32.xlu1 %v946_v36  ;;  %v963_v39 = vadd.f32 %v962_v37, %v956_v38  ;;  %v5923_v36 = vcombine.high %v1214_v29, %v1218_v30  ;;  %4406 = vmatprep.subr.bf16.mxu0 %v5917_v28  ;;  %v5925_v37 = vcombine.high %v1215_v31, %v1219_v32  ;;  %v1222_v38 = vld [vmem:[#allocation17 + $0x3c0] sm:$0xff] }
 0x3a0   :  { %4243 = vmatpush1.bf16.msra.mxu1 %v5914_v34  ;;  %v1053_v23 = vrot.slane %v7408_v11, %v7339_v57  ;;  %v1049_v24 = vrot.slane %v7408_v11, %v7332_v53  ;;  %v1061_v25 = vrot.slane %v7408_v11, %v7352_v1  ;;  %v1020_v27 = vrot.slane %v7406_v10, %v7363_v8 }
 0x3a1   :  { %4244 = vmatprep.subr.bf16.mxu1 %v5923_v36 }
 0x3a2   :  { %4407 = vmatpush1.bf16.msra.mxu0 %v5916_v35 }
 0x3a3   :  { %964 = vadd.xlane.f32.xlu1 %v963_v39  ;;  %v1226_v39 = vld [vmem:[#allocation17 + $0x3e0] sm:$0xff]  ;;  %4408 = vmatprep.subr.bf16.mxu0 %v5925_v37 }
 0x3a4   :  { %v5931_v45 = vcombine.high %v1222_v38, %v1226_v39  ;;  %4245 = vmatpush1.bf16.msra.mxu1 %v5922_v43  ;;  %v5930_v47 = vcombine.low %v1222_v38, %v1226_v39 }
 0x3a6   :  { %4409 = vmatpush1.bf16.msra.mxu0 %v5924_v44  ;;  %4246 = vmatprep.subr.bf16.mxu1 %v5931_v45 }
 0x3a7   :  { %4410 = vmatprep.subr.bf16.mxu0 %v5933_v46 }
 0x3a8   :  { %4247 = vmatpush1.bf16.msra.mxu1 %v5930_v47 }
 0x3a9   :  { %4257 = vmatprep.subr.bf16.mxu1 %v5939_v52 }
 0x3aa   :  { %4411 = vmatpush1.bf16.msra.mxu0 %v5932_v48 }
 0x3ab   :  { %4421 = vmatprep.subr.bf16.mxu0 %v5941_v62 }
 0x42c   :  { %v948_v63 = vpop.xlane.xlu1 %947 }
 0x42d   :  { %v966_v2 = vmul.f32 0.001, %v948_v63 }
 0x42f   :  { %v968_v5 = vmul.f32 %v966_v2, %v966_v2  ;;  %v971_v28 = vsub.f32 %v7336_v55, %v966_v2  ;;  %v970_v29 = vsub.f32 %v7334_v54, %v966_v2  ;;  %v973_v30 = vsub.f32 %v7358_v4, %v966_v2 }
 0x430   :  { %v965_v60 = vpop.xlane.xlu1 %964  ;;  %v972_v31 = vsub.f32 %v7345_v61, %v966_v2  ;;  %v975_v34 = vsub.f32 %v7371_v19, %v966_v2  ;;  %v974_v35 = vsub.f32 %v7369_v15, %v966_v2  ;;  %v977_v36 = vsub.f32 %v7384_v33, %v966_v2 }
 0x431   :  { %v967_v6 = vmul.f32 0.001, %v965_v60  ;;  %v976_v37 = vsub.f32 %v7377_v26, %v966_v2  ;;  %v1057_v15 = vrot.slane %v7408_v11, %v7350_v0  ;;  %v1069_v2 = vrot.slane %v7408_v11, %v7363_v8 }
 0x433   :  { %v969_v7 = vsub.f32 %v967_v6, %v968_v5  ;;  %v1238_v6 = vld [vmem:[#allocation17 + $0x440] sm:$0xff] }
 0x435   :  { %v978_v9 = vadd.f32 1e-05, %v969_v7  ;;  %v1016_v7 = vrot.slane %v7406_v10, %v7354_v3 }
 0x437   :  { %6641 = vrsqrt.f32 %v978_v9 }
 0x441   :  { %v6642_v32 = vpop.eup %6641 }
 0x442   :  { %v981_v38 = vmul.f32 %v6642_v32, %v971_v28  ;;  %v980_v39 = vmul.f32 %v6642_v32, %v970_v29  ;;  %v983_v40 = vmul.f32 %v6642_v32, %v973_v30  ;;  %v982_v41 = vmul.f32 %v6642_v32, %v972_v31  ;;  %v1251_v28 = vld [vmem:[#allocation17 + $0x4a8] sm:$0xff] }
 0x443   :  { %v985_v55 = vmul.f32 %v6642_v32, %v975_v34  ;;  %v984_v43 = vmul.f32 %v6642_v32, %v974_v35  ;;  %v987_v54 = vmul.f32 %v6642_v32, %v977_v36  ;;  %v986_v44 = vmul.f32 %v6642_v32, %v976_v37  ;;  %v1254_v36 = vld [vmem:[#allocation17 + $0x4c0] sm:$0xff] }
 0x444   :  { %v1030_v4 = vmul.f32 %v996_v12, %v981_v38  ;;  %v1029_v45 = vmul.f32 %v992_v13, %v980_v39  ;;  %v1032_v61 = vmul.f32 %v1004_v14, %v983_v40  ;;  %v1031_v46 = vmul.f32 %v1000_v16, %v982_v41  ;;  %v1242_v12 = vld [vmem:[#allocation17 + $0x460] sm:$0xff]  ;;  %v1239_v13 = vld [vmem:[#allocation17 + $0x448] sm:$0xff] }
 0x445   :  { %v1034_v47 = vmul.f32 %v1012_v21, %v985_v55  ;;  %v1033_v62 = vmul.f32 %v1008_v22, %v984_v43  ;;  %v1036_v63 = vmul.f32 %v1020_v27, %v987_v54  ;;  %v1243_v14 = vld [vmem:[#allocation17 + $0x468] sm:$0xff]  ;;  %v1246_v21 = vld [vmem:[#allocation17 + $0x480] sm:$0xff]  ;;  %v5947_v10 = vcombine.high %v1238_v6, %v1242_v12 }
 0x446   :  { %v1079_v19 = vadd.f32 %v1045_v18, %v1030_v4  ;;  %v1078_v33 = vadd.f32 %v1041_v20, %v1029_v45  ;;  %v1081_v48 = vadd.f32 %v1053_v23, %v1032_v61  ;;  %v7444_v26 = vadd.f32 %v1049_v24, %v1031_v46  ;;  %v1247_v27 = vld [vmem:[#allocation17 + $0x488] sm:$0xff]  ;;  %v1258_v37 = vld [vmem:[#allocation17 + $0x4e0] sm:$0xff] }
 0x447   :  { %v7446_v52 = vadd.f32 %v1061_v25, %v1034_v47  ;;  %v1065_v20 = vrot.slane %v7408_v11, %v7354_v3  ;;  %v7458_v22 = vadd.f32 %v1057_v15, %v1033_v62  ;;  %v7460_v23 = vadd.f32 %v1069_v2, %v1036_v63  ;;  %v1250_v25 = vld [vmem:[#allocation17 + $0x4a0] sm:$0xff]  ;;  %v1263_v40 = vld [vmem:[#allocation17 + $0x508] sm:$0xff] }
 0x448   :  { %v1087_v60 = vmax.f32 %v1079_v19, 0.0  ;;  %v1086_v5 = vmax.f32 %v1078_v33, 0.0  ;;  %v1089_v9 = vmax.f32 %v1081_v48, 0.0  ;;  %v5949_v24 = vcombine.high %v1239_v13, %v1243_v14  ;;  %v1262_v38 = vld [vmem:[#allocation17 + $0x500] sm:$0xff]  ;;  %v1267_v41 = vld [vmem:[#allocation17 + $0x528] sm:$0xff] }
 0x449   :  { %v1035_v29 = vmul.f32 %v1016_v7, %v986_v44  ;;  %v5946_v30 = vcombine.low %v1238_v6, %v1242_v12  ;;  %v5948_v31 = vcombine.low %v1239_v13, %v1243_v14  ;;  %v5955_v34 = vcombine.high %v1246_v21, %v1250_v25  ;;  %v1266_v39 = vld [vmem:[#allocation17 + $0x520] sm:$0xff]  ;;  %v1271_v61 = vld [vmem:[#allocation17 + $0x548] sm:$0xff] }
 0x44a   :  { %v7452_v16 = vpack.c.bf16 %v1087_v60, %v1087_v60  ;;  %v7454_v18 = vpack.c.bf16 %v1086_v5, %v1086_v5  ;;  %v7466_v11 = vpack.c.bf16 %v1089_v9, %v1089_v9  ;;  %v5957_v35 = vcombine.high %v1247_v27, %v1251_v28  ;;  %v1270_v4 = vld [vmem:[#allocation17 + $0x540] sm:$0xff]  ;;  %v1275_v46 = vld [vmem:[#allocation17 + $0x568] sm:$0xff] }
 0x44b   :  { %v7474_v32 = vadd.f32 %v1065_v20, %v1035_v29  ;;  %v5954_v51 = vcombine.low %v1246_v21, %v1250_v25  ;;  %v5956_v56 = vcombine.low %v1247_v27, %v1251_v28  ;;  %v5962_v55 = vcombine.low %v1254_v36, %v1258_v37  ;;  %v1274_v45 = vld [vmem:[#allocation17 + $0x560] sm:$0xff]  ;;  %v1279_v63 = vld [vmem:[#allocation17 + $0x588] sm:$0xff] }
 0x44c   :  { %4248 = vmatprep.mubr.bf16.mxu1 %v7452_v16  ;;  %4412 = vmatprep.mubr.bf16.mxu0 %v7452_v16  ;;  %v5964_v43 = vcombine.low %v1255_v17, %v1259_v50  ;;  %v5971_v54 = vcombine.high %v1262_v38, %v1266_v39  ;;  %v5973_v44 = vcombine.high %v1263_v40, %v1267_v41  ;;  %v1278_v48 = vld [vmem:[#allocation17 + $0x580] sm:$0xff]  ;;  %v1283_v2 = vld [vmem:[#allocation17 + $0x5a8] sm:$0xff] }
 0x44d   :  { %4249 = vmatmul.mubr.bf16.vlgmr.msra.gmra.mrb[8].mxu1 %v7454_v18  ;;  %4413 = vmatmul.mubr.bf16.vlgmr.msra.gmra.mrb[12].mxu0 %v7454_v18  ;;  %v5970_v47 = vcombine.low %v1262_v38, %v1266_v39  ;;  %v5972_v15 = vcombine.low %v1263_v40, %v1267_v41  ;;  %v5979_v19 = vcombine.high %v1270_v4, %v1274_v45  ;;  %v1282_v62 = vld [vmem:[#allocation17 + $0x5a0] sm:$0xff]  ;;  %v1287_v13 = vld [vmem:[#allocation17 + $0x5c8] sm:$0xff] }
 0x44e   :  { %4258 = vmatpush1.bf16.msra.mxu1 %v5938_v58  ;;  %4422 = vmatpush1.bf16.msra.mxu0 %v5940_v59  ;;  %v5963_v58 = vcombine.high %v1254_v36, %v1258_v37  ;;  %v5965_v59 = vcombine.high %v1255_v17, %v1259_v50  ;;  %v5981_v33 = vcombine.high %v1271_v61, %v1275_v46  ;;  %v1286_v9 = vld [vmem:[#allocation17 + $0x5c0] sm:$0xff]  ;;  %v1291_v14 = vld [vmem:[#allocation17 + $0x5e8] sm:$0xff] }
 0x44f   :  { %4289 = vmatprep.mubr.bf16.mxu1 %v7466_v11  ;;  %4453 = vmatprep.mubr.bf16.mxu0 %v7466_v11  ;;  %v5978_v60 = vcombine.low %v1270_v4, %v1274_v45  ;;  %v5980_v5 = vcombine.low %v1271_v61, %v1275_v46  ;;  %v5987_v6 = vcombine.high %v1278_v48, %v1282_v62  ;;  %v1290_v12 = vld [vmem:[#allocation17 + $0x5e0] sm:$0xff]  ;;  %v1295_v28 = vld [vmem:[#allocation17 + $0x608] sm:$0xff] }
 0x450   :  { %4259 = vmatprep.subr.bf16.mxu1 %v5947_v10  ;;  %4423 = vmatprep.subr.bf16.mxu0 %v5949_v24  ;;  %v5989_v7 = vcombine.high %v1279_v63, %v1283_v2  ;;  %v5986_v20 = vcombine.low %v1278_v48, %v1282_v62  ;;  %v5988_v21 = vcombine.low %v1279_v63, %v1283_v2  ;;  %v1294_v25 = vld [vmem:[#allocation17 + $0x600] sm:$0xff]  ;;  %v1299_v29 = vld [vmem:[#allocation17 + $0x628] sm:$0xff] }
 0x451   :  { %v5995_v10 = vcombine.high %v1286_v9, %v1290_v12  ;;  %v5997_v24 = vcombine.high %v1287_v13, %v1291_v14  ;;  %v1298_v27 = vld [vmem:[#allocation17 + $0x620] sm:$0xff]  ;;  %v1303_v17 = vld [vmem:[#allocation17 + $0x648] sm:$0xff] }
 0x452   :  { %4260 = vmatpush1.bf16.msra.mxu1 %v5946_v30  ;;  %4424 = vmatpush1.bf16.msra.mxu0 %v5948_v31  ;;  %v5994_v30 = vcombine.low %v1286_v9, %v1290_v12  ;;  %v5996_v31 = vcombine.low %v1287_v13, %v1291_v14  ;;  %v1302_v36 = vld [vmem:[#allocation17 + $0x640] sm:$0xff]  ;;  %v1307_v50 = vld [vmem:[#allocation17 + $0x668] sm:$0xff] }
 0x453   :  { %4261 = vmatprep.subr.bf16.mxu1 %v5955_v34  ;;  %4425 = vmatprep.subr.bf16.mxu0 %v5957_v35  ;;  %v6003_v34 = vcombine.high %v1294_v25, %v1298_v27  ;;  %v6005_v35 = vcombine.high %v1295_v28, %v1299_v29  ;;  %v1306_v37 = vld [vmem:[#allocation17 + $0x660] sm:$0xff]  ;;  %v1311_v40 = vld [vmem:[#allocation17 + $0x688] sm:$0xff] }
 0x454   :  { %v1310_v38 = vld [vmem:[#allocation17 + $0x680] sm:$0xff]  ;;  %v1315_v41 = vld [vmem:[#allocation17 + $0x6a8] sm:$0xff] }
 0x455   :  { %v1314_v39 = vld [vmem:[#allocation17 + $0x6a0] sm:$0xff]  ;;  %v1319_v61 = vld [vmem:[#allocation17 + $0x6c8] sm:$0xff] }
 0x456   :  { %4262 = vmatpush1.bf16.msra.mxu1 %v5954_v51  ;;  %4426 = vmatpush1.bf16.msra.mxu0 %v5956_v56  ;;  %v6002_v51 = vcombine.low %v1294_v25, %v1298_v27  ;;  %v6004_v56 = vcombine.low %v1295_v28, %v1299_v29  ;;  %v1318_v4 = vld [vmem:[#allocation17 + $0x6c0] sm:$0xff]  ;;  %v1323_v46 = vld [vmem:[#allocation17 + $0x6e8] sm:$0xff] }
 0x457   :  { %4263 = vmatprep.subr.bf16.mxu1 %v5963_v58  ;;  %4427 = vmatprep.subr.bf16.mxu0 %v5965_v59  ;;  %v6011_v58 = vcombine.high %v1302_v36, %v1306_v37  ;;  %v6013_v59 = vcombine.high %v1303_v17, %v1307_v50  ;;  %v1322_v45 = vld [vmem:[#allocation17 + $0x6e0] sm:$0xff]  ;;  %v1327_v63 = vld [vmem:[#allocation17 + $0x708] sm:$0xff] }
 0x458   :  { %v1326_v48 = vld [vmem:[#allocation17 + $0x700] sm:$0xff]  ;;  %v1331_v2 = vld [vmem:[#allocation17 + $0x728] sm:$0xff] }
 0x459   :  { %v1330_v62 = vld [vmem:[#allocation17 + $0x720] sm:$0xff]  ;;  %v1335_v13 = vld [vmem:[#allocation17 + $0x748] sm:$0xff] }
 0x45a   :  { %4264 = vmatpush1.bf16.msra.mxu1 %v5962_v55  ;;  %4428 = vmatpush1.bf16.msra.mxu0 %v5964_v43  ;;  %v6010_v55 = vcombine.low %v1302_v36, %v1306_v37  ;;  %v6012_v43 = vcombine.low %v1303_v17, %v1307_v50  ;;  %v1334_v9 = vld [vmem:[#allocation17 + $0x740] sm:$0xff]  ;;  %v1339_v14 = vld [vmem:[#allocation17 + $0x768] sm:$0xff] }
 0x45b   :  { %4265 = vmatprep.subr.bf16.mxu1 %v5971_v54  ;;  %4429 = vmatprep.subr.bf16.mxu0 %v5973_v44  ;;  %v6019_v54 = vcombine.high %v1310_v38, %v1314_v39  ;;  %v6021_v44 = vcombine.high %v1311_v40, %v1315_v41  ;;  %v1338_v12 = vld [vmem:[#allocation17 + $0x760] sm:$0xff]  ;;  %v1343_v28 = vld [vmem:[#allocation17 + $0x788] sm:$0xff] }
 0x45c   :  { %v1342_v25 = vld [vmem:[#allocation17 + $0x780] sm:$0xff]  ;;  %v1347_v29 = vld [vmem:[#allocation17 + $0x7a8] sm:$0xff] }
 0x45d   :  { %v1346_v27 = vld [vmem:[#allocation17 + $0x7a0] sm:$0xff]  ;;  %v1351_v17 = vld [vmem:[#allocation17 + $0x7c8] sm:$0xff] }
 0x45e   :  { %4266 = vmatpush1.bf16.msra.mxu1 %v5970_v47  ;;  %4430 = vmatpush1.bf16.msra.mxu0 %v5972_v15  ;;  %v6018_v47 = vcombine.low %v1310_v38, %v1314_v39  ;;  %v6020_v15 = vcombine.low %v1311_v40, %v1315_v41  ;;  %v1350_v36 = vld [vmem:[#allocation17 + $0x7c0] sm:$0xff]  ;;  %v1355_v50 = vld [vmem:[#allocation17 + $0x7e8] sm:$0xff] }
 0x45f   :  { %4267 = vmatprep.subr.bf16.mxu1 %v5979_v19  ;;  %4431 = vmatprep.subr.bf16.mxu0 %v5981_v33  ;;  %v6027_v19 = vcombine.high %v1318_v4, %v1322_v45  ;;  %v6029_v33 = vcombine.high %v1319_v61, %v1323_v46  ;;  %v1354_v37 = vld [vmem:[#allocation17 + $0x7e0] sm:$0xff]  ;;  %v1359_v40 = vld [vmem:[#allocation17 + $0x808] sm:$0xff] }
 0x460   :  { %v1358_v38 = vld [vmem:[#allocation17 + $0x800] sm:$0xff]  ;;  %v1363_v41 = vld [vmem:[#allocation17 + $0x828] sm:$0xff] }
 0x461   :  { %v1362_v39 = vld [vmem:[#allocation17 + $0x820] sm:$0xff] }
 0x462   :  { %4268 = vmatpush1.bf16.msra.mxu1 %v5978_v60  ;;  %4432 = vmatpush1.bf16.msra.mxu0 %v5980_v5  ;;  %v6026_v60 = vcombine.low %v1318_v4, %v1322_v45  ;;  %v6028_v5 = vcombine.low %v1319_v61, %v1323_v46  ;;  %v6069_v4 = vcombine.high %v1359_v40, %v1363_v41  ;;  %v1091_v45 = vmax.f32 %v7446_v52, 0.0  ;;  %v1366_v61 = vld [vmem:[#allocation17 + $0x840] sm:$0xff]  ;;  %v1375_v52 = vld [vmem:[#allocation17 + $0x888] sm:$0xff] }
 0x463   :  { %4269 = vmatprep.subr.bf16.mxu1 %v5987_v6  ;;  %4433 = vmatprep.subr.bf16.mxu0 %v5989_v7  ;;  %v6035_v6 = vcombine.high %v1326_v48, %v1330_v62  ;;  %v6037_v7 = vcombine.high %v1327_v63, %v1331_v2  ;;  %v1370_v46 = vld [vmem:[#allocation17 + $0x860] sm:$0xff] }
 0x466   :  { %4270 = vmatpush1.bf16.msra.mxu1 %v5986_v20  ;;  %4434 = vmatpush1.bf16.msra.mxu0 %v5988_v21  ;;  %v6034_v20 = vcombine.low %v1326_v48, %v1330_v62  ;;  %v6036_v21 = vcombine.low %v1327_v63, %v1331_v2  ;;  %v6068_v48 = vcombine.low %v1359_v40, %v1363_v41  ;;  %v1374_v2 = vld [vmem:[#allocation17 + $0x880] sm:$0xff] }
 0x467   :  { %4271 = vmatprep.subr.bf16.mxu1 %v5995_v10  ;;  %4435 = vmatprep.subr.bf16.mxu0 %v5997_v24  ;;  %v6043_v10 = vcombine.high %v1334_v9, %v1338_v12  ;;  %v6045_v24 = vcombine.high %v1335_v13, %v1339_v14  ;;  %v7482_v62 = vpack.c.bf16 %v1091_v45, %v1091_v45  ;;  %v1406_v40 = vld [vmem:[#allocation17 + $0x980] sm:$0xff] }
 0x468   :  { %v6075_v63 = vcombine.high %v1366_v61, %v1370_v46  ;;  %v1410_v41 = vld [vmem:[#allocation17 + $0x9a0] sm:$0xff] }
 0x46a   :  { %4272 = vmatpush1.bf16.msra.mxu1 %v5994_v30  ;;  %4436 = vmatpush1.bf16.msra.mxu0 %v5996_v31  ;;  %v6042_v30 = vcombine.low %v1334_v9, %v1338_v12  ;;  %v6044_v31 = vcombine.low %v1335_v13, %v1339_v14  ;;  %v1382_v13 = vld [vmem:[#allocation17 + $0x8c0] sm:$0xff] }
 0x46b   :  { %4273 = vmatprep.subr.bf16.mxu1 %v6003_v34  ;;  %4437 = vmatprep.subr.bf16.mxu0 %v6005_v35  ;;  %v6051_v34 = vcombine.high %v1342_v25, %v1346_v27  ;;  %v6053_v35 = vcombine.high %v1343_v28, %v1347_v29  ;;  %v1386_v14 = vld [vmem:[#allocation17 + $0x8e0] sm:$0xff] }
 0x46e   :  { %4274 = vmatpush1.bf16.msra.mxu1 %v6002_v51  ;;  %4438 = vmatpush1.bf16.msra.mxu0 %v6004_v56  ;;  %v6050_v51 = vcombine.low %v1342_v25, %v1346_v27  ;;  %v6052_v56 = vcombine.low %v1343_v28, %v1347_v29  ;;  %v6091_v25 = vcombine.high %v1382_v13, %v1386_v14  ;;  %v1390_v28 = vld [vmem:[#allocation17 + $0x900] sm:$0xff] }
 0x46f   :  { %4275 = vmatprep.subr.bf16.mxu1 %v6011_v58  ;;  %4439 = vmatprep.subr.bf16.mxu0 %v6013_v59  ;;  %v6059_v58 = vcombine.high %v1350_v36, %v1354_v37  ;;  %v6061_v59 = vcombine.high %v1351_v17, %v1355_v50  ;;  %v1394_v29 = vld [vmem:[#allocation17 + $0x920] sm:$0xff] }
 0x472   :  { %4276 = vmatpush1.bf16.msra.mxu1 %v6010_v55  ;;  %4440 = vmatpush1.bf16.msra.mxu0 %v6012_v43  ;;  %v6058_v55 = vcombine.low %v1350_v36, %v1354_v37  ;;  %v6060_v43 = vcombine.low %v1351_v17, %v1355_v50  ;;  %v6099_v36 = vcombine.high %v1390_v28, %v1394_v29  ;;  %v1398_v17 = vld [vmem:[#allocation17 + $0x940] sm:$0xff] }
 0x473   :  { %4277 = vmatprep.subr.bf16.mxu1 %v6019_v54  ;;  %4441 = vmatprep.subr.bf16.mxu0 %v6021_v44  ;;  %v1088_v54 = vmax.f32 %v7444_v26, 0.0  ;;  %v6067_v44 = vcombine.high %v1358_v38, %v1362_v39  ;;  %v1402_v50 = vld [vmem:[#allocation17 + $0x960] sm:$0xff] }
 0x476   :  { %4278 = vmatpush1.bf16.msra.mxu1 %v6018_v47  ;;  %4442 = vmatpush1.bf16.msra.mxu0 %v6020_v15  ;;  %v1367_v47 = vld [vmem:[#allocation17 + $0x848] sm:$0xff] }
 0x477   :  { %4279 = vmatprep.subr.bf16.mxu1 %v6027_v19  ;;  %4443 = vmatprep.subr.bf16.mxu0 %v6029_v33  ;;  %v1371_v15 = vld [vmem:[#allocation17 + $0x868] sm:$0xff]  ;;  %v6066_v19 = vcombine.low %v1358_v38, %v1362_v39  ;;  %v7480_v33 = vpack.c.bf16 %v1088_v54, %v1088_v54  ;;  %v6107_v38 = vcombine.high %v1398_v17, %v1402_v50 }
 0x478   :  { %v6077_v26 = vcombine.high %v1367_v47, %v1371_v15  ;;  %v6106_v54 = vcombine.low %v1398_v17, %v1402_v50  ;;  %v1446_v17 = vld [vmem:[#allocation17 + $0xac0] sm:$0xff] }
 0x479   :  { %v1450_v50 = vld [vmem:[#allocation17 + $0xae0] sm:$0xff] }
 0x47a   :  { %4280 = vmatpush1.bf16.msra.mxu1 %v6026_v60  ;;  %4444 = vmatpush1.bf16.msra.mxu0 %v6028_v5  ;;  %v1378_v60 = vld [vmem:[#allocation17 + $0x8a0] sm:$0xff]  ;;  %v1379_v5 = vld [vmem:[#allocation17 + $0x8a8] sm:$0xff] }
 0x47b   :  { %4281 = vmatprep.subr.bf16.mxu1 %v6035_v6  ;;  %4445 = vmatprep.subr.bf16.mxu0 %v6037_v7  ;;  %v6074_v6 = vcombine.low %v1366_v61, %v1370_v46  ;;  %v6076_v7 = vcombine.low %v1367_v47, %v1371_v15  ;;  %v6083_v9 = vcombine.high %v1374_v2, %v1378_v60  ;;  %v1414_v61 = vld [vmem:[#allocation17 + $0x9c0] sm:$0xff]  ;;  %v1415_v47 = vld [vmem:[#allocation17 + $0x9c8] sm:$0xff] }
 0x47c   :  { %v6085_v12 = vcombine.high %v1375_v52, %v1379_v5  ;;  %v1418_v46 = vld [vmem:[#allocation17 + $0x9e0] sm:$0xff]  ;;  %v1419_v15 = vld [vmem:[#allocation17 + $0x9e8] sm:$0xff] }
 0x47e   :  { %4282 = vmatpush1.bf16.msra.mxu1 %v6034_v20  ;;  %4446 = vmatpush1.bf16.msra.mxu0 %v6036_v21  ;;  %v1383_v20 = vld [vmem:[#allocation17 + $0x8c8] sm:$0xff] }
 0x47f   :  { %4283 = vmatprep.subr.bf16.mxu1 %v6043_v10  ;;  %4447 = vmatprep.subr.bf16.mxu0 %v6045_v24  ;;  %v1387_v21 = vld [vmem:[#allocation17 + $0x8e8] sm:$0xff]  ;;  %v6082_v10 = vcombine.low %v1374_v2, %v1378_v60  ;;  %v6084_v24 = vcombine.low %v1375_v52, %v1379_v5  ;;  %v1422_v2 = vld [vmem:[#allocation17 + $0xa00] sm:$0xff] }
 0x480   :  { %v6093_v27 = vcombine.high %v1383_v20, %v1387_v21  ;;  %v1426_v60 = vld [vmem:[#allocation17 + $0xa20] sm:$0xff]  ;;  %v1423_v52 = vld [vmem:[#allocation17 + $0xa08] sm:$0xff] }
 0x481   :  { %v1427_v5 = vld [vmem:[#allocation17 + $0xa28] sm:$0xff] }
 0x482   :  { %4284 = vmatpush1.bf16.msra.mxu1 %v6042_v30  ;;  %4448 = vmatpush1.bf16.msra.mxu0 %v6044_v31  ;;  %v1391_v30 = vld [vmem:[#allocation17 + $0x908] sm:$0xff] }
 0x483   :  { %4285 = vmatprep.subr.bf16.mxu1 %v6051_v34  ;;  %4449 = vmatprep.subr.bf16.mxu0 %v6053_v35  ;;  %v1395_v31 = vld [vmem:[#allocation17 + $0x928] sm:$0xff]  ;;  %v6090_v34 = vcombine.low %v1382_v13, %v1386_v14  ;;  %v6092_v35 = vcombine.low %v1383_v20, %v1387_v21  ;;  %v1430_v13 = vld [vmem:[#allocation17 + $0xa40] sm:$0xff] }
 0x484   :  { %v6101_v37 = vcombine.high %v1391_v30, %v1395_v31  ;;  %v1434_v14 = vld [vmem:[#allocation17 + $0xa60] sm:$0xff]  ;;  %v1431_v20 = vld [vmem:[#allocation17 + $0xa48] sm:$0xff] }
 0x485   :  { %v1435_v21 = vld [vmem:[#allocation17 + $0xa68] sm:$0xff] }
 0x486   :  { %4286 = vmatpush1.bf16.msra.mxu1 %v6050_v51  ;;  %4450 = vmatpush1.bf16.msra.mxu0 %v6052_v56  ;;  %v1399_v51 = vld [vmem:[#allocation17 + $0x948] sm:$0xff] }
 0x487   :  { %4287 = vmatprep.subr.bf16.mxu1 %v6059_v58  ;;  %4451 = vmatprep.subr.bf16.mxu0 %v6061_v59  ;;  %v1403_v56 = vld [vmem:[#allocation17 + $0x968] sm:$0xff]  ;;  %v6098_v58 = vcombine.low %v1390_v28, %v1394_v29  ;;  %v6100_v59 = vcombine.low %v1391_v30, %v1395_v31  ;;  %v1438_v28 = vld [vmem:[#allocation17 + $0xa80] sm:$0xff] }
 0x488   :  { %v6109_v39 = vcombine.high %v1399_v51, %v1403_v56  ;;  %v1442_v29 = vld [vmem:[#allocation17 + $0xaa0] sm:$0xff]  ;;  %v1439_v30 = vld [vmem:[#allocation17 + $0xa88] sm:$0xff] }
 0x489   :  { %v1443_v31 = vld [vmem:[#allocation17 + $0xaa8] sm:$0xff] }
 0x48a   :  { %4288 = vmatpush1.bf16.msra.mxu1 %v6058_v55  ;;  %4452 = vmatpush1.bf16.msra.mxu0 %v6060_v43  ;;  %v1407_v55 = vld [vmem:[#allocation17 + $0x988] sm:$0xff] }
 0x48b   :  { %4298 = vmatprep.subr.bf16.mxu1 %v6067_v44  ;;  %4462 = vmatprep.subr.bf16.mxu0 %v6069_v4  ;;  %v1411_v43 = vld [vmem:[#allocation17 + $0x9a8] sm:$0xff]  ;;  %v6108_v44 = vcombine.low %v1399_v51, %v1403_v56  ;;  %v6115_v4 = vcombine.high %v1406_v40, %v1410_v41 }
 0x48c   :  { %v6117_v45 = vcombine.high %v1407_v55, %v1411_v43  ;;  %v1447_v51 = vld [vmem:[#allocation17 + $0xac8] sm:$0xff] }
 0x48d   :  { %4290 = vmatmul.mubr.bf16.vlgmr.msra.gmra.mrb[8].mxu1 %v7480_v33  ;;  %4454 = vmatmul.mubr.bf16.vlgmr.msra.gmra.mrb[12].mxu0 %v7480_v33  ;;  %v1451_v56 = vld [vmem:[#allocation17 + $0xae8] sm:$0xff] }
 0x48e   :  { %4299 = vmatpush1.bf16.msra.mxu1 %v6066_v19  ;;  %4330 = vmatprep.mubr.bf16.mxu1 %v7482_v62  ;;  %v6114_v19 = vcombine.low %v1406_v40, %v1410_v41  ;;  %v1454_v40 = vld [vmem:[#allocation17 + $0xb00] sm:$0xff] }
 0x48f   :  { %4463 = vmatpush1.bf16.msra.mxu0 %v6068_v48  ;;  %4494 = vmatprep.mubr.bf16.mxu0 %v7482_v62  ;;  %v6116_v48 = vcombine.low %v1407_v55, %v1411_v43  ;;  %v1458_v41 = vld [vmem:[#allocation17 + $0xb20] sm:$0xff]  ;;  %v1455_v55 = vld [vmem:[#allocation17 + $0xb08] sm:$0xff] }
 0x490   :  { %4300 = vmatprep.subr.bf16.mxu1 %v6075_v63  ;;  %4464 = vmatprep.subr.bf16.mxu0 %v6077_v26  ;;  %v6123_v63 = vcombine.high %v1414_v61, %v1418_v46  ;;  %v6125_v26 = vcombine.high %v1415_v47, %v1419_v15  ;;  %v1459_v43 = vld [vmem:[#allocation17 + $0xb28] sm:$0xff] }
 0x492   :  { %4301 = vmatpush1.bf16.msra.mxu1 %v6074_v6  ;;  %v6122_v6 = vcombine.low %v1414_v61, %v1418_v46  ;;  %v1462_v61 = vld [vmem:[#allocation17 + $0xb40] sm:$0xff] }
 0x493   :  { %4465 = vmatpush1.bf16.msra.mxu0 %v6076_v7  ;;  %4302 = vmatprep.subr.bf16.mxu1 %v6083_v9  ;;  %v6124_v7 = vcombine.low %v1415_v47, %v1419_v15  ;;  %v6131_v9 = vcombine.high %v1422_v2, %v1426_v60  ;;  %v1466_v46 = vld [vmem:[#allocation17 + $0xb60] sm:$0xff]  ;;  %v1463_v47 = vld [vmem:[#allocation17 + $0xb48] sm:$0xff] }
 0x494   :  { %4466 = vmatprep.subr.bf16.mxu0 %v6085_v12  ;;  %v6133_v12 = vcombine.high %v1423_v52, %v1427_v5  ;;  %v1467_v15 = vld [vmem:[#allocation17 + $0xb68] sm:$0xff] }
 0x496   :  { %4303 = vmatpush1.bf16.msra.mxu1 %v6082_v10  ;;  %v6130_v10 = vcombine.low %v1422_v2, %v1426_v60  ;;  %v1470_v2 = vld [vmem:[#allocation17 + $0xb80] sm:$0xff] }
 0x497   :  { %4467 = vmatpush1.bf16.msra.mxu0 %v6084_v24  ;;  %4304 = vmatprep.subr.bf16.mxu1 %v6091_v25  ;;  %v6132_v24 = vcombine.low %v1423_v52, %v1427_v5  ;;  %v6139_v25 = vcombine.high %v1430_v13, %v1434_v14  ;;  %v1474_v60 = vld [vmem:[#allocation17 + $0xba0] sm:$0xff]  ;;  %v1471_v52 = vld [vmem:[#allocation17 + $0xb88] sm:$0xff] }
 0x498   :  { %4468 = vmatprep.subr.bf16.mxu0 %v6093_v27  ;;  %v6141_v27 = vcombine.high %v1431_v20, %v1435_v21  ;;  %v1475_v5 = vld [vmem:[#allocation17 + $0xba8] sm:$0xff] }
 0x49a   :  { %4305 = vmatpush1.bf16.msra.mxu1 %v6090_v34  ;;  %v6138_v34 = vcombine.low %v1430_v13, %v1434_v14  ;;  %v1478_v13 = vld [vmem:[#allocation17 + $0xbc0] sm:$0xff] }
 0x49b   :  { %4469 = vmatpush1.bf16.msra.mxu0 %v6092_v35  ;;  %4306 = vmatprep.subr.bf16.mxu1 %v6099_v36  ;;  %v6140_v35 = vcombine.low %v1431_v20, %v1435_v21  ;;  %v6147_v36 = vcombine.high %v1438_v28, %v1442_v29  ;;  %v1482_v14 = vld [vmem:[#allocation17 + $0xbe0] sm:$0xff]  ;;  %v1479_v20 = vld [vmem:[#allocation17 + $0xbc8] sm:$0xff] }
 0x49c   :  { %4470 = vmatprep.subr.bf16.mxu0 %v6101_v37  ;;  %v6149_v37 = vcombine.high %v1439_v30, %v1443_v31  ;;  %v1483_v21 = vld [vmem:[#allocation17 + $0xbe8] sm:$0xff] }
 0x49e   :  { %4307 = vmatpush1.bf16.msra.mxu1 %v6098_v58  ;;  %v6146_v58 = vcombine.low %v1438_v28, %v1442_v29  ;;  %v1486_v28 = vld [vmem:[#allocation17 + $0xc00] sm:$0xff] }
 0x49f   :  { %4471 = vmatpush1.bf16.msra.mxu0 %v6100_v59  ;;  %4308 = vmatprep.subr.bf16.mxu1 %v6107_v38  ;;  %v6148_v59 = vcombine.low %v1439_v30, %v1443_v31  ;;  %v6155_v38 = vcombine.high %v1446_v17, %v1450_v50  ;;  %v1490_v29 = vld [vmem:[#allocation17 + $0xc20] sm:$0xff]  ;;  %v1487_v30 = vld [vmem:[#allocation17 + $0xc08] sm:$0xff] }
 0x4a0   :  { %4472 = vmatprep.subr.bf16.mxu0 %v6109_v39  ;;  %v6157_v39 = vcombine.high %v1447_v51, %v1451_v56  ;;  %v1491_v31 = vld [vmem:[#allocation17 + $0xc28] sm:$0xff] }
 0x4a2   :  { %4309 = vmatpush1.bf16.msra.mxu1 %v6106_v54  ;;  %v6154_v54 = vcombine.low %v1446_v17, %v1450_v50  ;;  %v6197_v17 = vcombine.high %v1487_v30, %v1491_v31  ;;  %v1093_v50 = vmax.f32 %v7460_v23, 0.0 }
 0x4a3   :  { %4473 = vmatpush1.bf16.msra.mxu0 %v6108_v44  ;;  %4310 = vmatprep.subr.bf16.mxu1 %v6115_v4  ;;  %v6156_v44 = vcombine.low %v1447_v51, %v1451_v56  ;;  %v6163_v4 = vcombine.high %v1454_v40, %v1458_v41  ;;  %v1494_v51 = vld [vmem:[#allocation17 + $0xc40] sm:$0xff] }
 0x4a4   :  { %4474 = vmatprep.subr.bf16.mxu0 %v6117_v45  ;;  %v6165_v45 = vcombine.high %v1455_v55, %v1459_v43  ;;  %v1498_v56 = vld [vmem:[#allocation17 + $0xc60] sm:$0xff] }
 0x4a6   :  { %4311 = vmatpush1.bf16.msra.mxu1 %v6114_v19  ;;  %v6162_v19 = vcombine.low %v1454_v40, %v1458_v41  ;;  %v6196_v40 = vcombine.low %v1487_v30, %v1491_v31  ;;  %v6203_v41 = vcombine.high %v1494_v51, %v1498_v56  ;;  %v1534_v30 = vld [vmem:[#allocation17 + $0xd80] sm:$0xff] }
 0x4a7   :  { %4475 = vmatpush1.bf16.msra.mxu0 %v6116_v48  ;;  %4312 = vmatprep.subr.bf16.mxu1 %v6123_v63  ;;  %v6164_v48 = vcombine.low %v1455_v55, %v1459_v43  ;;  %v6171_v63 = vcombine.high %v1462_v61, %v1466_v46  ;;  %v1502_v55 = vld [vmem:[#allocation17 + $0xc80] sm:$0xff]  ;;  %v7493_v43 = vpack.c.bf16 %v1093_v50, %v1093_v50 }
 0x4a8   :  { %4476 = vmatprep.subr.bf16.mxu0 %v6125_v26  ;;  %v6173_v26 = vcombine.high %v1463_v47, %v1467_v15  ;;  %v1538_v31 = vld [vmem:[#allocation17 + $0xda0] sm:$0xff] }
 0x4aa   :  { %4313 = vmatpush1.bf16.msra.mxu1 %v6122_v6  ;;  %v6170_v6 = vcombine.low %v1462_v61, %v1466_v46 }
 0x4ab   :  { %4477 = vmatpush1.bf16.msra.mxu0 %v6124_v7  ;;  %4314 = vmatprep.subr.bf16.mxu1 %v6131_v9  ;;  %v6172_v7 = vcombine.low %v1463_v47, %v1467_v15  ;;  %v6179_v9 = vcombine.high %v1470_v2, %v1474_v60  ;;  %v1510_v47 = vld [vmem:[#allocation17 + $0xcc0] sm:$0xff] }
 0x4ac   :  { %4478 = vmatprep.subr.bf16.mxu0 %v6133_v12  ;;  %v6181_v12 = vcombine.high %v1471_v52, %v1475_v5  ;;  %v1514_v15 = vld [vmem:[#allocation17 + $0xce0] sm:$0xff] }
 0x4ae   :  { %4315 = vmatpush1.bf16.msra.mxu1 %v6130_v10  ;;  %v6178_v10 = vcombine.low %v1470_v2, %v1474_v60  ;;  %v6219_v2 = vcombine.high %v1510_v47, %v1514_v15 }
 0x4af   :  { %4479 = vmatpush1.bf16.msra.mxu0 %v6132_v24  ;;  %4316 = vmatprep.subr.bf16.mxu1 %v6139_v25  ;;  %v6180_v24 = vcombine.low %v1471_v52, %v1475_v5  ;;  %v6187_v25 = vcombine.high %v1478_v13, %v1482_v14  ;;  %v1518_v52 = vld [vmem:[#allocation17 + $0xd00] sm:$0xff] }
 0x4b0   :  { %4480 = vmatprep.subr.bf16.mxu0 %v6141_v27  ;;  %v6189_v27 = vcombine.high %v1479_v20, %v1483_v21  ;;  %v1522_v5 = vld [vmem:[#allocation17 + $0xd20] sm:$0xff] }
 0x4b2   :  { %4317 = vmatpush1.bf16.msra.mxu1 %v6138_v34  ;;  %v6186_v34 = vcombine.low %v1478_v13, %v1482_v14  ;;  %v6227_v13 = vcombine.high %v1518_v52, %v1522_v5 }
 0x4b3   :  { %4481 = vmatpush1.bf16.msra.mxu0 %v6140_v35  ;;  %4318 = vmatprep.subr.bf16.mxu1 %v6147_v36  ;;  %v6188_v35 = vcombine.low %v1479_v20, %v1483_v21  ;;  %v1090_v36 = vmax.f32 %v7458_v22, 0.0  ;;  %v1506_v22 = vld [vmem:[#allocation17 + $0xca0] sm:$0xff] }
 0x4b4   :  { %4482 = vmatprep.subr.bf16.mxu0 %v6149_v37  ;;  %v6195_v37 = vcombine.high %v1486_v28, %v1490_v29  ;;  %v6211_v61 = vcombine.high %v1502_v55, %v1506_v22  ;;  %v1526_v20 = vld [vmem:[#allocation17 + $0xd40] sm:$0xff] }
 0x4b5   :  { %v1530_v21 = vld [vmem:[#allocation17 + $0xd60] sm:$0xff] }
 0x4b6   :  { %4319 = vmatpush1.bf16.msra.mxu1 %v6146_v58  ;;  %v6194_v58 = vcombine.low %v1486_v28, %v1490_v29  ;;  %v6235_v28 = vcombine.high %v1526_v20, %v1530_v21 }
 0x4b7   :  { %4483 = vmatpush1.bf16.msra.mxu0 %v6148_v59  ;;  %4320 = vmatprep.subr.bf16.mxu1 %v6155_v38  ;;  %v1495_v59 = vld [vmem:[#allocation17 + $0xc48] sm:$0xff] }
 0x4b8   :  { %4484 = vmatprep.subr.bf16.mxu0 %v6157_v39  ;;  %v1499_v38 = vld [vmem:[#allocation17 + $0xc68] sm:$0xff]  ;;  %v7490_v39 = vpack.c.bf16 %v1090_v36, %v1090_v36  ;;  %v6234_v36 = vcombine.low %v1526_v20, %v1530_v21  ;;  %v1574_v20 = vld [vmem:[#allocation17 + $0xec0] sm:$0xff] }
 0x4b9   :  { %v6205_v23 = vcombine.high %v1495_v59, %v1499_v38  ;;  %v1578_v21 = vld [vmem:[#allocation17 + $0xee0] sm:$0xff] }
 0x4ba   :  { %4321 = vmatpush1.bf16.msra.mxu1 %v6154_v54  ;;  %v1503_v54 = vld [vmem:[#allocation17 + $0xc88] sm:$0xff] }
 0x4bb   :  { %4485 = vmatpush1.bf16.msra.mxu0 %v6156_v44  ;;  %4322 = vmatprep.subr.bf16.mxu1 %v6163_v4  ;;  %v1507_v44 = vld [vmem:[#allocation17 + $0xca8] sm:$0xff]  ;;  %v6202_v4 = vcombine.low %v1494_v51, %v1498_v56  ;;  %v1542_v51 = vld [vmem:[#allocation17 + $0xdc0] sm:$0xff] }
 0x4bc   :  { %4486 = vmatprep.subr.bf16.mxu0 %v6165_v45  ;;  %v6204_v45 = vcombine.low %v1495_v59, %v1499_v38  ;;  %v6213_v46 = vcombine.high %v1503_v54, %v1507_v44  ;;  %v1546_v56 = vld [vmem:[#allocation17 + $0xde0] sm:$0xff]  ;;  %v1547_v59 = vld [vmem:[#allocation17 + $0xde8] sm:$0xff]  ;;  %v6242_v38 = vcombine.low %v1534_v30, %v1538_v31 }
 0x4be   :  { %4323 = vmatpush1.bf16.msra.mxu1 %v6162_v19  ;;  %v1511_v19 = vld [vmem:[#allocation17 + $0xcc8] sm:$0xff] }
 0x4bf   :  { %4487 = vmatpush1.bf16.msra.mxu0 %v6164_v48  ;;  %4324 = vmatprep.subr.bf16.mxu1 %v6171_v63  ;;  %v1515_v48 = vld [vmem:[#allocation17 + $0xce8] sm:$0xff]  ;;  %v6210_v63 = vcombine.low %v1502_v55, %v1506_v22  ;;  %v1550_v22 = vld [vmem:[#allocation17 + $0xe00] sm:$0xff] }
 0x4c0   :  { %4488 = vmatprep.subr.bf16.mxu0 %v6173_v26  ;;  %v6212_v26 = vcombine.low %v1503_v54, %v1507_v44  ;;  %v6221_v60 = vcombine.high %v1511_v19, %v1515_v48  ;;  %v1551_v54 = vld [vmem:[#allocation17 + $0xe08] sm:$0xff] }
 0x4c1   :  { %v1555_v44 = vld [vmem:[#allocation17 + $0xe28] sm:$0xff] }
 0x4c2   :  { %4325 = vmatpush1.bf16.msra.mxu1 %v6170_v6  ;;  %v1519_v6 = vld [vmem:[#allocation17 + $0xd08] sm:$0xff] }
 0x4c3   :  { %4489 = vmatpush1.bf16.msra.mxu0 %v6172_v7  ;;  %4326 = vmatprep.subr.bf16.mxu1 %v6179_v9  ;;  %v1523_v7 = vld [vmem:[#allocation17 + $0xd28] sm:$0xff]  ;;  %v6218_v9 = vcombine.low %v1510_v47, %v1514_v15  ;;  %v1558_v47 = vld [vmem:[#allocation17 + $0xe40] sm:$0xff] }
 0x4c4   :  { %4490 = vmatprep.subr.bf16.mxu0 %v6181_v12  ;;  %v6220_v12 = vcombine.low %v1511_v19, %v1515_v48  ;;  %v6229_v14 = vcombine.high %v1519_v6, %v1523_v7  ;;  %v1562_v15 = vld [vmem:[#allocation17 + $0xe60] sm:$0xff]  ;;  %v1559_v19 = vld [vmem:[#allocation17 + $0xe48] sm:$0xff] }
 0x4c5   :  { %v1563_v48 = vld [vmem:[#allocation17 + $0xe68] sm:$0xff] }
 0x4c6   :  { %4327 = vmatpush1.bf16.msra.mxu1 %v6178_v10  ;;  %v1527_v10 = vld [vmem:[#allocation17 + $0xd48] sm:$0xff] }
 0x4c7   :  { %4491 = vmatpush1.bf16.msra.mxu0 %v6180_v24  ;;  %4328 = vmatprep.subr.bf16.mxu1 %v6187_v25  ;;  %v1531_v24 = vld [vmem:[#allocation17 + $0xd68] sm:$0xff]  ;;  %v6226_v25 = vcombine.low %v1518_v52, %v1522_v5  ;;  %v1566_v52 = vld [vmem:[#allocation17 + $0xe80] sm:$0xff] }
 0x4c8   :  { %4492 = vmatprep.subr.bf16.mxu0 %v6189_v27  ;;  %v6228_v27 = vcombine.low %v1519_v6, %v1523_v7  ;;  %v6237_v29 = vcombine.high %v1527_v10, %v1531_v24  ;;  %v1570_v5 = vld [vmem:[#allocation17 + $0xea0] sm:$0xff]  ;;  %v1567_v6 = vld [vmem:[#allocation17 + $0xe88] sm:$0xff] }
 0x4c9   :  { %v1571_v7 = vld [vmem:[#allocation17 + $0xea8] sm:$0xff] }
 0x4ca   :  { %4329 = vmatpush1.bf16.msra.mxu1 %v6186_v34  ;;  %v1535_v34 = vld [vmem:[#allocation17 + $0xd88] sm:$0xff] }
 0x4cb   :  { %4493 = vmatpush1.bf16.msra.mxu0 %v6188_v35  ;;  %4339 = vmatprep.subr.bf16.mxu1 %v6195_v37  ;;  %v1539_v35 = vld [vmem:[#allocation17 + $0xda8] sm:$0xff]  ;;  %v6236_v37 = vcombine.low %v1527_v10, %v1531_v24 }
 0x4cc   :  { %4503 = vmatprep.subr.bf16.mxu0 %v6197_v17  ;;  %v6243_v17 = vcombine.high %v1534_v30, %v1538_v31  ;;  %v6245_v50 = vcombine.high %v1535_v34, %v1539_v35  ;;  %v1575_v10 = vld [vmem:[#allocation17 + $0xec8] sm:$0xff]  ;;  %v1582_v30 = vld [vmem:[#allocation17 + $0xf00] sm:$0xff] }
 0x4cd   :  { %4331 = vmatmul.mubr.bf16.vlgmr.msra.gmra.mrb[8].mxu1 %v7490_v39  ;;  %v1579_v24 = vld [vmem:[#allocation17 + $0xee8] sm:$0xff]  ;;  %v1586_v31 = vld [vmem:[#allocation17 + $0xf20] sm:$0xff] }
 0x4ce   :  { %4495 = vmatmul.mubr.bf16.vlgmr.msra.gmra.mrb[12].mxu0 %v7490_v39  ;;  %4340 = vmatpush1.bf16.msra.mxu1 %v6194_v58  ;;  %v1543_v58 = vld [vmem:[#allocation17 + $0xdc8] sm:$0xff] }
 0x4cf   :  { %4371 = vmatprep.mubr.bf16.mxu1 %v7493_v43  ;;  %4504 = vmatpush1.bf16.msra.mxu0 %v6196_v40  ;;  %v6244_v40 = vcombine.low %v1535_v34, %v1539_v35  ;;  %v6253_v55 = vcombine.high %v1543_v58, %v1547_v59  ;;  %v1583_v34 = vld [vmem:[#allocation17 + $0xf08] sm:$0xff] }
 0x4d0   :  { %4535 = vmatprep.mubr.bf16.mxu0 %v7493_v43  ;;  %4341 = vmatprep.subr.bf16.mxu1 %v6203_v41  ;;  %v6251_v41 = vcombine.high %v1542_v51, %v1546_v56  ;;  %v1587_v35 = vld [vmem:[#allocation17 + $0xf28] sm:$0xff] }
 0x4d1   :  { %4505 = vmatprep.subr.bf16.mxu0 %v6205_v23  ;;  %v1554_v23 = vld [vmem:[#allocation17 + $0xe20] sm:$0xff] }
 0x4d2   :  { %4342 = vmatpush1.bf16.msra.mxu1 %v6202_v4  ;;  %v6250_v4 = vcombine.low %v1542_v51, %v1546_v56  ;;  %v1590_v51 = vld [vmem:[#allocation17 + $0xf40] sm:$0xff] }
 0x4d3   :  { %4506 = vmatpush1.bf16.msra.mxu0 %v6204_v45  ;;  %4343 = vmatprep.subr.bf16.mxu1 %v6211_v61  ;;  %v6252_v45 = vcombine.low %v1543_v58, %v1547_v59  ;;  %v6259_v61 = vcombine.high %v1550_v22, %v1554_v23  ;;  %v1594_v56 = vld [vmem:[#allocation17 + $0xf60] sm:$0xff]  ;;  %v1591_v58 = vld [vmem:[#allocation17 + $0xf48] sm:$0xff] }
 0x4d4   :  { %4507 = vmatprep.subr.bf16.mxu0 %v6213_v46  ;;  %v6261_v46 = vcombine.high %v1551_v54, %v1555_v44  ;;  %v1595_v59 = vld [vmem:[#allocation17 + $0xf68] sm:$0xff] }
 0x4d6   :  { %4344 = vmatpush1.bf16.msra.mxu1 %v6210_v63  ;;  %v6258_v63 = vcombine.low %v1550_v22, %v1554_v23  ;;  %v1598_v22 = vld [vmem:[#allocation17 + $0xf80] sm:$0xff] }
 0x4d7   :  { %4508 = vmatpush1.bf16.msra.mxu0 %v6212_v26  ;;  %4345 = vmatprep.subr.bf16.mxu1 %v6219_v2  ;;  %v6260_v26 = vcombine.low %v1551_v54, %v1555_v44  ;;  %v6267_v2 = vcombine.high %v1558_v47, %v1562_v15  ;;  %v1602_v23 = vld [vmem:[#allocation17 + $0xfa0] sm:$0xff]  ;;  %v1599_v54 = vld [vmem:[#allocation17 + $0xf88] sm:$0xff] }
 0x4d8   :  { %4509 = vmatprep.subr.bf16.mxu0 %v6221_v60  ;;  %v6269_v60 = vcombine.high %v1559_v19, %v1563_v48  ;;  %v1603_v44 = vld [vmem:[#allocation17 + $0xfa8] sm:$0xff] }
 0x4da   :  { %4346 = vmatpush1.bf16.msra.mxu1 %v6218_v9  ;;  %v6266_v9 = vcombine.low %v1558_v47, %v1562_v15  ;;  %v1606_v47 = vld [vmem:[#allocation17 + $0xfc0] sm:$0xff] }
 0x4db   :  { %4510 = vmatpush1.bf16.msra.mxu0 %v6220_v12  ;;  %4347 = vmatprep.subr.bf16.mxu1 %v6227_v13  ;;  %v6268_v12 = vcombine.low %v1559_v19, %v1563_v48  ;;  %v6275_v13 = vcombine.high %v1566_v52, %v1570_v5  ;;  %v1610_v15 = vld [vmem:[#allocation17 + $0xfe0] sm:$0xff]  ;;  %v1607_v19 = vld [vmem:[#allocation17 + $0xfc8] sm:$0xff] }
 0x4dc   :  { %4511 = vmatprep.subr.bf16.mxu0 %v6229_v14  ;;  %v6277_v14 = vcombine.high %v1567_v6, %v1571_v7  ;;  %v1611_v48 = vld [vmem:[#allocation17 + $0xfe8] sm:$0xff] }
 0x4de   :  { %4348 = vmatpush1.bf16.msra.mxu1 %v6226_v25  ;;  %v6274_v25 = vcombine.low %v1566_v52, %v1570_v5  ;;  %v1104_v52 = vld [vmem:[#allocation17 + $0x10] sm:$0xff] }
 0x4df   :  { %4512 = vmatpush1.bf16.msra.mxu0 %v6228_v27  ;;  %4349 = vmatprep.subr.bf16.mxu1 %v6235_v28  ;;  %v6276_v27 = vcombine.low %v1567_v6, %v1571_v7  ;;  %v6283_v28 = vcombine.high %v1574_v20, %v1578_v21  ;;  %v1108_v5 = vld [vmem:[#allocation17 + $0x30] sm:$0xff]  ;;  %v1105_v6 = vld [vmem:[#allocation17 + $0x18] sm:$0xff] }
 0x4e0   :  { %4513 = vmatprep.subr.bf16.mxu0 %v6237_v29  ;;  %v6285_v29 = vcombine.high %v1575_v10, %v1579_v24  ;;  %v1109_v7 = vld [vmem:[#allocation17 + $0x38] sm:$0xff] }
 0x4e2   :  { %4350 = vmatpush1.bf16.msra.mxu1 %v6234_v36  ;;  %v6282_v36 = vcombine.low %v1574_v20, %v1578_v21  ;;  %v5817_v20 = vcombine.high %v1105_v6, %v1109_v7  ;;  %v1112_v21 = vld [vmem:[#allocation17 + $0x50] sm:$0xff] }
 0x4e3   :  { %4514 = vmatpush1.bf16.msra.mxu0 %v6236_v37  ;;  %4351 = vmatprep.subr.bf16.mxu1 %v6243_v17  ;;  %v6284_v37 = vcombine.low %v1575_v10, %v1579_v24  ;;  %v6291_v17 = vcombine.high %v1582_v30, %v1586_v31  ;;  %v1116_v10 = vld [vmem:[#allocation17 + $0x70] sm:$0xff]  ;;  %v5814_v24 = vcombine.low %v1104_v52, %v1108_v5 }
 0x4e4   :  { %4515 = vmatprep.subr.bf16.mxu0 %v6245_v50  ;;  %v6293_v50 = vcombine.high %v1583_v34, %v1587_v35 }
 0x4e6   :  { %4352 = vmatpush1.bf16.msra.mxu1 %v6242_v38  ;;  %v6290_v38 = vcombine.low %v1582_v30, %v1586_v31  ;;  %v5823_v30 = vcombine.high %v1112_v21, %v1116_v10  ;;  %v1120_v31 = vld [vmem:[#allocation17 + $0x90] sm:$0xff] }
 0x4e7   :  { %4516 = vmatpush1.bf16.msra.mxu0 %v6244_v40  ;;  %4353 = vmatprep.subr.bf16.mxu1 %v6251_v41  ;;  %v6292_v40 = vcombine.low %v1583_v34, %v1587_v35  ;;  %v6299_v41 = vcombine.high %v1590_v51, %v1594_v56  ;;  %v1124_v34 = vld [vmem:[#allocation17 + $0xb0] sm:$0xff]  ;;  %v1121_v35 = vld [vmem:[#allocation17 + $0x98] sm:$0xff] }
 0x4e8   :  { %4517 = vmatprep.subr.bf16.mxu0 %v6253_v55  ;;  %v6301_v55 = vcombine.high %v1591_v58, %v1595_v59 }
 0x4ea   :  { %4354 = vmatpush1.bf16.msra.mxu1 %v6250_v4  ;;  %v6298_v4 = vcombine.low %v1590_v51, %v1594_v56  ;;  %v1128_v56 = vld [vmem:[#allocation17 + $0xd0] sm:$0xff] }
 0x4eb   :  { %4518 = vmatpush1.bf16.msra.mxu0 %v6252_v45  ;;  %4355 = vmatprep.subr.bf16.mxu1 %v6259_v61  ;;  %v6300_v45 = vcombine.low %v1591_v58, %v1595_v59  ;;  %v6307_v61 = vcombine.high %v1598_v22, %v1602_v23  ;;  %v1132_v58 = vld [vmem:[#allocation17 + $0xf0] sm:$0xff]  ;;  %v1129_v59 = vld [vmem:[#allocation17 + $0xd8] sm:$0xff] }
 0x4ec   :  { %4519 = vmatprep.subr.bf16.mxu0 %v6261_v46  ;;  %v6309_v46 = vcombine.high %v1599_v54, %v1603_v44 }
 0x4ee   :  { %4356 = vmatpush1.bf16.msra.mxu1 %v6258_v63  ;;  %v6306_v63 = vcombine.low %v1598_v22, %v1602_v23  ;;  %v1136_v23 = vld [vmem:[#allocation17 + $0x110] sm:$0xff] }
 0x4ef   :  { %4520 = vmatpush1.bf16.msra.mxu0 %v6260_v26  ;;  %4357 = vmatprep.subr.bf16.mxu1 %v6267_v2  ;;  %v6308_v26 = vcombine.low %v1599_v54, %v1603_v44  ;;  %v6315_v2 = vcombine.high %v1606_v47, %v1610_v15  ;;  %v1140_v54 = vld [vmem:[#allocation17 + $0x130] sm:$0xff]  ;;  %v1137_v44 = vld [vmem:[#allocation17 + $0x118] sm:$0xff] }
 0x4f0   :  { %4521 = vmatprep.subr.bf16.mxu0 %v6269_v60  ;;  %v6317_v60 = vcombine.high %v1607_v19, %v1611_v48 }
 0x4f2   :  { %4358 = vmatpush1.bf16.msra.mxu1 %v6266_v9  ;;  %v6314_v9 = vcombine.low %v1606_v47, %v1610_v15  ;;  %v1144_v47 = vld [vmem:[#allocation17 + $0x150] sm:$0xff] }
 0x4f3   :  { %4522 = vmatpush1.bf16.msra.mxu0 %v6268_v12  ;;  %4359 = vmatprep.subr.bf16.mxu1 %v6275_v13  ;;  %v6316_v12 = vcombine.low %v1607_v19, %v1611_v48  ;;  %v1092_v13 = vmax.f32 %v7474_v32, 0.0  ;;  %v1148_v15 = vld [vmem:[#allocation17 + $0x170] sm:$0xff]  ;;  %v1145_v19 = vld [vmem:[#allocation17 + $0x158] sm:$0xff] }
 0x4f4   :  { %4523 = vmatprep.subr.bf16.mxu0 %v6277_v14  ;;  %v5815_v14 = vcombine.high %v1104_v52, %v1108_v5  ;;  %v1149_v48 = vld [vmem:[#allocation17 + $0x178] sm:$0xff]  ;;  %v1152_v52 = vld [vmem:[#allocation17 + $0x190] sm:$0xff] }
 0x4f5   :  { %v1156_v5 = vld [vmem:[#allocation17 + $0x1b0] sm:$0xff] }
 0x4f6   :  { %4360 = vmatpush1.bf16.msra.mxu1 %v6274_v25  ;;  %v1113_v25 = vld [vmem:[#allocation17 + $0x58] sm:$0xff] }
 0x4f7   :  { %4524 = vmatpush1.bf16.msra.mxu0 %v6276_v27  ;;  %4361 = vmatprep.subr.bf16.mxu1 %v6283_v28  ;;  %v1117_v27 = vld [vmem:[#allocation17 + $0x78] sm:$0xff]  ;;  %v7499_v28 = vpack.c.bf16 %v1092_v13, %v1092_v13  ;;  %v5863_v13 = vcombine.high %v1152_v52, %v1156_v5 }
 0x4f8   :  { %4525 = vmatprep.subr.bf16.mxu0 %v6285_v29  ;;  %v5816_v29 = vcombine.low %v1105_v6, %v1109_v7  ;;  %v5825_v32 = vcombine.high %v1113_v25, %v1117_v27  ;;  %v1153_v6 = vld [vmem:[#allocation17 + $0x198] sm:$0xff] }
 0x4f9   :  { %v1157_v7 = vld [vmem:[#allocation17 + $0x1b8] sm:$0xff] }
 0x4fa   :  { %4362 = vmatpush1.bf16.msra.mxu1 %v6282_v36  ;;  %v1125_v36 = vld [vmem:[#allocation17 + $0xb8] sm:$0xff] }
 0x4fb   :  { %4526 = vmatpush1.bf16.msra.mxu0 %v6284_v37  ;;  %4363 = vmatprep.subr.bf16.mxu1 %v6291_v17  ;;  %v5822_v37 = vcombine.low %v1112_v21, %v1116_v10  ;;  %v5824_v17 = vcombine.low %v1113_v25, %v1117_v27  ;;  %v5833_v51 = vcombine.high %v1121_v35, %v1125_v36  ;;  %v1164_v21 = vld [vmem:[#allocation17 + $0x1f0] sm:$0xff]  ;;  %v1161_v10 = vld [vmem:[#allocation17 + $0x1d8] sm:$0xff] }
 0x4fc   :  { %4527 = vmatprep.subr.bf16.mxu0 %v6293_v50  ;;  %v5831_v50 = vcombine.high %v1120_v31, %v1124_v34  ;;  %v5862_v25 = vcombine.low %v1152_v52, %v1156_v5  ;;  %v5864_v27 = vcombine.low %v1153_v6, %v1157_v7  ;;  %v1204_v52 = vld [vmem:[#allocation17 + $0x330] sm:$0xff]  ;;  %v1201_v5 = vld [vmem:[#allocation17 + $0x318] sm:$0xff] }
 0x4fe   :  { %4364 = vmatpush1.bf16.msra.mxu1 %v6290_v38  ;;  %v1133_v38 = vld [vmem:[#allocation17 + $0xf8] sm:$0xff] }
 0x4ff   :  { %4528 = vmatpush1.bf16.msra.mxu0 %v6292_v40  ;;  %4365 = vmatprep.subr.bf16.mxu1 %v6299_v41  ;;  %v5830_v40 = vcombine.low %v1120_v31, %v1124_v34  ;;  %v5832_v41 = vcombine.low %v1121_v35, %v1125_v36  ;;  %v5841_v22 = vcombine.high %v1129_v59, %v1133_v38  ;;  %v1168_v31 = vld [vmem:[#allocation17 + $0x210] sm:$0xff]  ;;  %v1173_v35 = vld [vmem:[#allocation17 + $0x238] sm:$0xff] }
 0x500   :  { %4529 = vmatprep.subr.bf16.mxu0 %v6301_v55  ;;  %v5839_v55 = vcombine.high %v1128_v56, %v1132_v58  ;;  %v1172_v34 = vld [vmem:[#allocation17 + $0x230] sm:$0xff] }
 0x502   :  { %4366 = vmatpush1.bf16.msra.mxu1 %v6298_v4  ;;  %v1141_v4 = vld [vmem:[#allocation17 + $0x138] sm:$0xff] }
 0x503   :  { %4530 = vmatpush1.bf16.msra.mxu0 %v6300_v45  ;;  %4367 = vmatprep.subr.bf16.mxu1 %v6307_v61  ;;  %v5840_v45 = vcombine.low %v1129_v59, %v1133_v38  ;;  %v5847_v61 = vcombine.high %v1136_v23, %v1140_v54  ;;  %v1181_v59 = vld [vmem:[#allocation17 + $0x278] sm:$0xff]  ;;  %v5878_v38 = vcombine.low %v1168_v31, %v1172_v34 }
 0x504   :  { %4531 = vmatprep.subr.bf16.mxu0 %v6309_v46  ;;  %v5849_v46 = vcombine.high %v1137_v44, %v1141_v4 }
 0x506   :  { %4368 = vmatpush1.bf16.msra.mxu1 %v6306_v63  ;;  %v5846_v63 = vcombine.low %v1136_v23, %v1140_v54  ;;  %v1188_v23 = vld [vmem:[#allocation17 + $0x2b0] sm:$0xff]  ;;  %v1185_v54 = vld [vmem:[#allocation17 + $0x298] sm:$0xff] }
 0x507   :  { %4532 = vmatpush1.bf16.msra.mxu0 %v6308_v26  ;;  %4369 = vmatprep.subr.bf16.mxu1 %v6315_v2  ;;  %v5848_v26 = vcombine.low %v1137_v44, %v1141_v4  ;;  %v5855_v2 = vcombine.high %v1144_v47, %v1148_v15  ;;  %v1189_v44 = vld [vmem:[#allocation17 + $0x2b8] sm:$0xff] }
 0x508   :  { %4533 = vmatprep.subr.bf16.mxu0 %v6317_v60  ;;  %v5857_v60 = vcombine.high %v1145_v19, %v1149_v48 }
 0x50a   :  { %4370 = vmatpush1.bf16.msra.mxu1 %v6314_v9  ;;  %v5854_v9 = vcombine.low %v1144_v47, %v1148_v15  ;;  %v1196_v47 = vld [vmem:[#allocation17 + $0x2f0] sm:$0xff]  ;;  %v1193_v15 = vld [vmem:[#allocation17 + $0x2d8] sm:$0xff] }
 0x50b   :  { %4534 = vmatpush1.bf16.msra.mxu0 %v6316_v12  ;;  %4544 = vmatprep.subr.bf16.mxu1 %v5815_v14  ;;  %v5856_v12 = vcombine.low %v1145_v19, %v1149_v48  ;;  %v5865_v14 = vcombine.high %v1153_v6, %v1157_v7  ;;  %v1197_v19 = vld [vmem:[#allocation17 + $0x2f8] sm:$0xff] }
 0x50c   :  { %4708 = vmatprep.subr.bf16.mxu0 %v5817_v20  ;;  %v1160_v20 = vld [vmem:[#allocation17 + $0x1d0] sm:$0xff]  ;;  %v1205_v6 = vld [vmem:[#allocation17 + $0x338] sm:$0xff] }
 0x50d   :  { %4372 = vmatmul.mubr.bf16.vlgmr.msra.gmra.mrb[8].mxu1 %v7499_v28  ;;  %v5870_v36 = vcombine.low %v1160_v20, %v1164_v21 }
 0x50e   :  { %4536 = vmatmul.mubr.bf16.vlgmr.msra.gmra.mrb[12].mxu0 %v7499_v28  ;;  %4545 = vmatpush1.bf16.msra.mxu1 %v5814_v24  ;;  %v1165_v24 = vld [vmem:[#allocation17 + $0x1f8] sm:$0xff] }
 0x50f   :  { %4576 = vmatprep.mubr.bf16.mxu1 %v7452_v16  ;;  %4709 = vmatpush1.bf16.msra.mxu0 %v5816_v29  ;;  %v5871_v29 = vcombine.high %v1160_v20, %v1164_v21  ;;  %v1212_v20 = vld [vmem:[#allocation17 + $0x370] sm:$0xff]  ;;  %v1209_v21 = vld [vmem:[#allocation17 + $0x358] sm:$0xff] }
 0x510   :  { %4740 = vmatprep.mubr.bf16.mxu0 %v7452_v16  ;;  %4546 = vmatprep.subr.bf16.mxu1 %v5823_v30  ;;  %v5838_v16 = vcombine.low %v1128_v56, %v1132_v58  ;;  %v5873_v30 = vcombine.high %v1161_v10, %v1165_v24  ;;  %v1180_v56 = vld [vmem:[#allocation17 + $0x270] sm:$0xff]  ;;  %v1177_v58 = vld [vmem:[#allocation17 + $0x258] sm:$0xff] }
 0x511   :  { %4710 = vmatprep.subr.bf16.mxu0 %v5825_v32  ;;  %v1169_v32 = vld [vmem:[#allocation17 + $0x218] sm:$0xff] }
 0x512   :  { %4547 = vmatpush1.bf16.msra.mxu1 %v5822_v37  ;;  %v5872_v37 = vcombine.low %v1161_v10, %v1165_v24  ;;  %v1213_v10 = vld [vmem:[#allocation17 + $0x378] sm:$0xff] }
 0x513   :  { %4711 = vmatpush1.bf16.msra.mxu0 %v5824_v17  ;;  %4548 = vmatprep.subr.bf16.mxu1 %v5831_v50  ;;  %v5879_v17 = vcombine.high %v1168_v31, %v1172_v34  ;;  %v5881_v50 = vcombine.high %v1169_v32, %v1173_v35  ;;  %v1220_v31 = vld [vmem:[#allocation17 + $0x3b0] sm:$0xff]  ;;  %v1217_v34 = vld [vmem:[#allocation17 + $0x398] sm:$0xff] }
 0x514   :  { %4712 = vmatprep.subr.bf16.mxu0 %v5833_v51  ;;  %v1176_v51 = vld [vmem:[#allocation17 + $0x250] sm:$0xff] }
 0x515   :  { %v5886_v4 = vcombine.low %v1176_v51, %v1180_v56 }
 0x516   :  { %4549 = vmatpush1.bf16.msra.mxu1 %v5830_v40  ;;  %v5880_v40 = vcombine.low %v1169_v32, %v1173_v35  ;;  %v1221_v32 = vld [vmem:[#allocation17 + $0x3b8] sm:$0xff] }
 0x517   :  { %4713 = vmatpush1.bf16.msra.mxu0 %v5832_v41  ;;  %4550 = vmatprep.subr.bf16.mxu1 %v5839_v55  ;;  %v5887_v41 = vcombine.high %v1176_v51, %v1180_v56  ;;  %v5889_v55 = vcombine.high %v1177_v58, %v1181_v59  ;;  %v1228_v51 = vld [vmem:[#allocation17 + $0x3f0] sm:$0xff]  ;;  %v1225_v56 = vld [vmem:[#allocation17 + $0x3d8] sm:$0xff] }
 0x518   :  { %4714 = vmatprep.subr.bf16.mxu0 %v5841_v22  ;;  %v1184_v22 = vld [vmem:[#allocation17 + $0x290] sm:$0xff] }
 0x519   :  { %v5894_v48 = vcombine.low %v1184_v22, %v1188_v23 }
 0x51a   :  { %4551 = vmatpush1.bf16.msra.mxu1 %v5838_v16  ;;  %v5888_v16 = vcombine.low %v1177_v58, %v1181_v59  ;;  %v1229_v58 = vld [vmem:[#allocation17 + $0x3f8] sm:$0xff] }
 0x51b   :  { %4715 = vmatpush1.bf16.msra.mxu0 %v5840_v45  ;;  %4552 = vmatprep.subr.bf16.mxu1 %v5847_v61  ;;  %v5895_v45 = vcombine.high %v1184_v22, %v1188_v23  ;;  %v5897_v61 = vcombine.high %v1185_v54, %v1189_v44  ;;  %v1236_v22 = vld [vmem:[#allocation17 + $0x430] sm:$0xff]  ;;  %v1233_v23 = vld [vmem:[#allocation17 + $0x418] sm:$0xff] }
 0x51c   :  { %4716 = vmatprep.subr.bf16.mxu0 %v5849_v46  ;;  %v1192_v46 = vld [vmem:[#allocation17 + $0x2d0] sm:$0xff] }
 0x51d   :  { %v5902_v7 = vcombine.low %v1192_v46, %v1196_v47 }
 0x51e   :  { %4553 = vmatpush1.bf16.msra.mxu1 %v5846_v63  ;;  %v5896_v63 = vcombine.low %v1185_v54, %v1189_v44  ;;  %v1237_v54 = vld [vmem:[#allocation17 + $0x438] sm:$0xff] }
 0x51f   :  { %4717 = vmatpush1.bf16.msra.mxu0 %v5848_v26  ;;  %4554 = vmatprep.subr.bf16.mxu1 %v5855_v2  ;;  %v5903_v26 = vcombine.high %v1192_v46, %v1196_v47  ;;  %v5905_v2 = vcombine.high %v1193_v15, %v1197_v19  ;;  %v1244_v46 = vld [vmem:[#allocation17 + $0x470] sm:$0xff] }
 0x520   :  { %4718 = vmatprep.subr.bf16.mxu0 %v5857_v60  ;;  %v1200_v60 = vld [vmem:[#allocation17 + $0x310] sm:$0xff] }
 0x521   :  { %v5910_v24 = vcombine.low %v1200_v60, %v1204_v52 }
 0x522   :  { %4555 = vmatpush1.bf16.msra.mxu1 %v5854_v9  ;;  %v5904_v9 = vcombine.low %v1193_v15, %v1197_v19  ;;  %v1241_v15 = vld [vmem:[#allocation17 + $0x458] sm:$0xff] }
 0x523   :  { %4719 = vmatpush1.bf16.msra.mxu0 %v5856_v12  ;;  %4556 = vmatprep.subr.bf16.mxu1 %v5863_v13  ;;  %v5911_v12 = vcombine.high %v1200_v60, %v1204_v52  ;;  %v5913_v13 = vcombine.high %v1201_v5, %v1205_v6  ;;  %v1245_v19 = vld [vmem:[#allocation17 + $0x478] sm:$0xff] }
 0x524   :  { %4720 = vmatprep.subr.bf16.mxu0 %v5865_v14  ;;  %v1208_v14 = vld [vmem:[#allocation17 + $0x350] sm:$0xff]  ;;  %v5953_v60 = vcombine.high %v1241_v15, %v1245_v19  ;;  %v1249_v52 = vld [vmem:[#allocation17 + $0x498] sm:$0xff] }
 0x525   :  { %v5918_v35 = vcombine.low %v1208_v14, %v1212_v20 }
 0x526   :  { %4557 = vmatpush1.bf16.msra.mxu1 %v5862_v25  ;;  %v5912_v25 = vcombine.low %v1201_v5, %v1205_v6  ;;  %v1253_v5 = vld [vmem:[#allocation17 + $0x4b8] sm:$0xff] }
 0x527   :  { %4721 = vmatpush1.bf16.msra.mxu0 %v5864_v27  ;;  %4558 = vmatprep.subr.bf16.mxu1 %v5871_v29  ;;  %v5919_v27 = vcombine.high %v1208_v14, %v1212_v20  ;;  %v5921_v29 = vcombine.high %v1209_v21, %v1213_v10  ;;  %v1260_v14 = vld [vmem:[#allocation17 + $0x4f0] sm:$0xff]  ;;  %v1257_v20 = vld [vmem:[#allocation17 + $0x4d8] sm:$0xff] }
 0x528   :  { %4722 = vmatprep.subr.bf16.mxu0 %v5873_v30  ;;  %v1216_v30 = vld [vmem:[#allocation17 + $0x390] sm:$0xff] }
 0x529   :  { %v5926_v59 = vcombine.low %v1216_v30, %v1220_v31 }
 0x52a   :  { %4559 = vmatpush1.bf16.msra.mxu1 %v5870_v36  ;;  %v5920_v36 = vcombine.low %v1209_v21, %v1213_v10  ;;  %v1261_v21 = vld [vmem:[#allocation17 + $0x4f8] sm:$0xff] }
 0x52b   :  { %4723 = vmatpush1.bf16.msra.mxu0 %v5872_v37  ;;  %4560 = vmatprep.subr.bf16.mxu1 %v5879_v17  ;;  %v5927_v37 = vcombine.high %v1216_v30, %v1220_v31  ;;  %v5929_v17 = vcombine.high %v1217_v34, %v1221_v32  ;;  %v1265_v30 = vld [vmem:[#allocation17 + $0x518] sm:$0xff] }
 0x52c   :  { %4724 = vmatprep.subr.bf16.mxu0 %v5881_v50  ;;  %v1224_v50 = vld [vmem:[#allocation17 + $0x3d0] sm:$0xff]  ;;  %v1269_v31 = vld [vmem:[#allocation17 + $0x538] sm:$0xff] }
 0x52d   :  { %v5934_v44 = vcombine.low %v1224_v50, %v1228_v51 }
 0x52e   :  { %4561 = vmatpush1.bf16.msra.mxu1 %v5878_v38  ;;  %v5928_v38 = vcombine.low %v1217_v34, %v1221_v32  ;;  %v5968_v34 = vcombine.low %v1257_v20, %v1261_v21 }
 0x52f   :  { %4725 = vmatpush1.bf16.msra.mxu0 %v5880_v40  ;;  %4562 = vmatprep.subr.bf16.mxu1 %v5887_v41  ;;  %v5935_v40 = vcombine.high %v1224_v50, %v1228_v51  ;;  %v5937_v41 = vcombine.high %v1225_v56, %v1229_v58  ;;  %v1277_v50 = vld [vmem:[#allocation17 + $0x578] sm:$0xff] }
 0x530   :  { %4726 = vmatprep.subr.bf16.mxu0 %v5889_v55  ;;  %v1232_v55 = vld [vmem:[#allocation17 + $0x410] sm:$0xff] }
 0x531   :  { %v5942_v47 = vcombine.low %v1232_v55, %v1236_v22 }
 0x532   :  { %4563 = vmatpush1.bf16.msra.mxu1 %v5886_v4  ;;  %v5936_v4 = vcombine.low %v1225_v56, %v1229_v58  ;;  %v5976_v56 = vcombine.low %v1265_v30, %v1269_v31 }
 0x533   :  { %4727 = vmatpush1.bf16.msra.mxu0 %v5888_v16  ;;  %4564 = vmatprep.subr.bf16.mxu1 %v5895_v45  ;;  %v5943_v16 = vcombine.high %v1232_v55, %v1236_v22  ;;  %v5945_v45 = vcombine.high %v1233_v23, %v1237_v54  ;;  %v1285_v55 = vld [vmem:[#allocation17 + $0x5b8] sm:$0xff] }
 0x534   :  { %4728 = vmatprep.subr.bf16.mxu0 %v5897_v61  ;;  %v1240_v61 = vld [vmem:[#allocation17 + $0x450] sm:$0xff] }
 0x535   :  { %v5950_v6 = vcombine.low %v1240_v61, %v1244_v46 }
 0x536   :  { %4565 = vmatpush1.bf16.msra.mxu1 %v5894_v48  ;;  %v5944_v48 = vcombine.low %v1233_v23, %v1237_v54 }
 0x537   :  { %4729 = vmatpush1.bf16.msra.mxu0 %v5896_v63  ;;  %4566 = vmatprep.subr.bf16.mxu1 %v5903_v26  ;;  %v5951_v63 = vcombine.high %v1240_v61, %v1244_v46  ;;  %v1248_v26 = vld [vmem:[#allocation17 + $0x490] sm:$0xff]  ;;  %v1293_v61 = vld [vmem:[#allocation17 + $0x5f8] sm:$0xff] }
 0x538   :  { %4730 = vmatprep.subr.bf16.mxu0 %v5905_v2  ;;  %v1252_v2 = vld [vmem:[#allocation17 + $0x4b0] sm:$0xff] }
 0x539   :  { %v5958_v10 = vcombine.low %v1248_v26, %v1252_v2 }
 0x53a   :  { %4567 = vmatpush1.bf16.msra.mxu1 %v5902_v7  ;;  %v5952_v7 = vcombine.low %v1241_v15, %v1245_v19 }
 0x53b   :  { %4731 = vmatpush1.bf16.msra.mxu0 %v5904_v9  ;;  %4568 = vmatprep.subr.bf16.mxu1 %v5911_v12  ;;  %v5959_v9 = vcombine.high %v1248_v26, %v1252_v2  ;;  %v5961_v12 = vcombine.high %v1249_v52, %v1253_v5  ;;  %v1297_v26 = vld [vmem:[#allocation17 + $0x618] sm:$0xff] }
 0x53c   :  { %4732 = vmatprep.subr.bf16.mxu0 %v5913_v13  ;;  %v1256_v13 = vld [vmem:[#allocation17 + $0x4d0] sm:$0xff]  ;;  %v1301_v2 = vld [vmem:[#allocation17 + $0x638] sm:$0xff] }
 0x53e   :  { %4569 = vmatpush1.bf16.msra.mxu1 %v5910_v24  ;;  %v5967_v24 = vcombine.high %v1256_v13, %v1260_v14 }
 0x53f   :  { %4733 = vmatpush1.bf16.msra.mxu0 %v5912_v25  ;;  %4570 = vmatprep.subr.bf16.mxu1 %v5919_v27  ;;  %v5969_v25 = vcombine.high %v1257_v20, %v1261_v21  ;;  %v1264_v27 = vld [vmem:[#allocation17 + $0x510] sm:$0xff]  ;;  %v6008_v20 = vcombine.low %v1297_v26, %v1301_v2 }
 0x540   :  { %4734 = vmatprep.subr.bf16.mxu0 %v5921_v29  ;;  %v1268_v29 = vld [vmem:[#allocation17 + $0x530] sm:$0xff] }
 0x541   :  { %v5975_v32 = vcombine.high %v1264_v27, %v1268_v29  ;;  %v5974_v51 = vcombine.low %v1264_v27, %v1268_v29  ;;  %v1317_v27 = vld [vmem:[#allocation17 + $0x6b8] sm:$0xff] }
 0x542   :  { %4571 = vmatpush1.bf16.msra.mxu1 %v5918_v35  ;;  %v5977_v35 = vcombine.high %v1265_v30, %v1269_v31 }
 0x543   :  { %4735 = vmatpush1.bf16.msra.mxu0 %v5920_v36  ;;  %4572 = vmatprep.subr.bf16.mxu1 %v5927_v37  ;;  %v1272_v36 = vld [vmem:[#allocation17 + $0x550] sm:$0xff] }
 0x544   :  { %4736 = vmatprep.subr.bf16.mxu0 %v5929_v17  ;;  %v1276_v37 = vld [vmem:[#allocation17 + $0x570] sm:$0xff]  ;;  %v1273_v17 = vld [vmem:[#allocation17 + $0x558] sm:$0xff] }
 0x545   :  { %v5983_v58 = vcombine.high %v1272_v36, %v1276_v37  ;;  %v5982_v22 = vcombine.low %v1272_v36, %v1276_v37  ;;  %v5984_v23 = vcombine.low %v1273_v17, %v1277_v50  ;;  %v1325_v36 = vld [vmem:[#allocation17 + $0x6f8] sm:$0xff] }
 0x546   :  { %4573 = vmatpush1.bf16.msra.mxu1 %v5926_v59  ;;  %v5985_v59 = vcombine.high %v1273_v17, %v1277_v50 }
 0x547   :  { %4737 = vmatpush1.bf16.msra.mxu0 %v5928_v38  ;;  %4574 = vmatprep.subr.bf16.mxu1 %v5935_v40  ;;  %v1280_v38 = vld [vmem:[#allocation17 + $0x590] sm:$0xff] }
 0x548   :  { %4738 = vmatprep.subr.bf16.mxu0 %v5937_v41  ;;  %v1284_v40 = vld [vmem:[#allocation17 + $0x5b0] sm:$0xff]  ;;  %v1281_v41 = vld [vmem:[#allocation17 + $0x598] sm:$0xff] }
 0x549   :  { %v5991_v54 = vcombine.high %v1280_v38, %v1284_v40  ;;  %v5990_v46 = vcombine.low %v1280_v38, %v1284_v40  ;;  %v1333_v38 = vld [vmem:[#allocation17 + $0x738] sm:$0xff] }
 0x54a   :  { %4575 = vmatpush1.bf16.msra.mxu1 %v5934_v44  ;;  %v5993_v44 = vcombine.high %v1281_v41, %v1285_v55 }
 0x54b   :  { %4739 = vmatpush1.bf16.msra.mxu0 %v5936_v4  ;;  %4585 = vmatprep.subr.bf16.mxu1 %v5943_v16  ;;  %v1288_v4 = vld [vmem:[#allocation17 + $0x5d0] sm:$0xff] }
 0x54c   :  { %4749 = vmatprep.subr.bf16.mxu0 %v5945_v45  ;;  %v1292_v16 = vld [vmem:[#allocation17 + $0x5f0] sm:$0xff]  ;;  %v1289_v45 = vld [vmem:[#allocation17 + $0x5d8] sm:$0xff] }
 0x54d   :  { %4577 = vmatmul.mubr.bf16.vlgmr.msra.gmra.mrb[12].mxu1 %v7454_v18  ;;  %v5999_v15 = vcombine.high %v1288_v4, %v1292_v16  ;;  %v6001_v19 = vcombine.high %v1289_v45, %v1293_v61 }
 0x54e   :  { %4741 = vmatmul.mubr.bf16.vlgmr.msra.gmra.mrb[16].mxu0 %v7454_v18  ;;  %4586 = vmatpush1.bf16.msra.mxu1 %v5942_v47  ;;  %v5960_v18 = vcombine.low %v1249_v52, %v1253_v5  ;;  %v5992_v47 = vcombine.low %v1281_v41, %v1285_v55  ;;  %v6000_v52 = vcombine.low %v1289_v45, %v1293_v61 }
 0x54f   :  { %4617 = vmatprep.mubr.bf16.mxu1 %v7466_v11  ;;  %4750 = vmatpush1.bf16.msra.mxu0 %v5944_v48  ;;  %v1296_v48 = vld [vmem:[#allocation17 + $0x610] sm:$0xff] }
 0x550   :  { %4781 = vmatprep.mubr.bf16.mxu0 %v7466_v11  ;;  %4587 = vmatprep.subr.bf16.mxu1 %v5951_v63  ;;  %v5966_v11 = vcombine.low %v1256_v13, %v1260_v14  ;;  %v1300_v63 = vld [vmem:[#allocation17 + $0x630] sm:$0xff]  ;;  %v1309_v13 = vld [vmem:[#allocation17 + $0x678] sm:$0xff] }
 0x551   :  { %4751 = vmatprep.subr.bf16.mxu0 %v5953_v60  ;;  %v5998_v60 = vcombine.low %v1288_v4, %v1292_v16  ;;  %v6007_v5 = vcombine.high %v1296_v48, %v1300_v63  ;;  %v6006_v14 = vcombine.low %v1296_v48, %v1300_v63  ;;  %v1341_v4 = vld [vmem:[#allocation17 + $0x778] sm:$0xff] }
 0x552   :  { %4588 = vmatpush1.bf16.msra.mxu1 %v5950_v6  ;;  %v6009_v6 = vcombine.high %v1297_v26, %v1301_v2  ;;  %v1349_v48 = vld [vmem:[#allocation17 + $0x7b8] sm:$0xff] }
 0x553   :  { %4752 = vmatpush1.bf16.msra.mxu0 %v5952_v7  ;;  %4589 = vmatprep.subr.bf16.mxu1 %v5959_v9  ;;  %v1304_v7 = vld [vmem:[#allocation17 + $0x650] sm:$0xff] }
 0x554   :  { %4753 = vmatprep.subr.bf16.mxu0 %v5961_v12  ;;  %v1308_v9 = vld [vmem:[#allocation17 + $0x670] sm:$0xff]  ;;  %v1305_v12 = vld [vmem:[#allocation17 + $0x658] sm:$0xff] }
 0x555   :  { %v6015_v21 = vcombine.high %v1304_v7, %v1308_v9  ;;  %v6014_v29 = vcombine.low %v1304_v7, %v1308_v9  ;;  %v6016_v30 = vcombine.low %v1305_v12, %v1309_v13  ;;  %v1357_v7 = vld [vmem:[#allocation17 + $0x7f8] sm:$0xff] }
 0x556   :  { %4590 = vmatpush1.bf16.msra.mxu1 %v5958_v10  ;;  %v6017_v10 = vcombine.high %v1305_v12, %v1309_v13 }
 0x557   :  { %4754 = vmatpush1.bf16.msra.mxu0 %v5960_v18  ;;  %4591 = vmatprep.subr.bf16.mxu1 %v5967_v24  ;;  %v1312_v18 = vld [vmem:[#allocation17 + $0x690] sm:$0xff] }
 0x558   :  { %4755 = vmatprep.subr.bf16.mxu0 %v5969_v25  ;;  %v1316_v24 = vld [vmem:[#allocation17 + $0x6b0] sm:$0xff]  ;;  %v1313_v25 = vld [vmem:[#allocation17 + $0x698] sm:$0xff] }
 0x559   :  { %v6023_v31 = vcombine.high %v1312_v18, %v1316_v24  ;;  %v6022_v37 = vcombine.low %v1312_v18, %v1316_v24  ;;  %v6024_v17 = vcombine.low %v1313_v25, %v1317_v27  ;;  %v1365_v18 = vld [vmem:[#allocation17 + $0x838] sm:$0xff] }
 0x55a   :  { %4592 = vmatpush1.bf16.msra.mxu1 %v5966_v11  ;;  %v6025_v11 = vcombine.high %v1313_v25, %v1317_v27 }
 0x55b   :  { %4756 = vmatpush1.bf16.msra.mxu0 %v5968_v34  ;;  %4593 = vmatprep.subr.bf16.mxu1 %v5975_v32  ;;  %v1320_v34 = vld [vmem:[#allocation17 + $0x6d0] sm:$0xff] }
 0x55c   :  { %4757 = vmatprep.subr.bf16.mxu0 %v5977_v35  ;;  %v1324_v32 = vld [vmem:[#allocation17 + $0x6f0] sm:$0xff]  ;;  %v1321_v35 = vld [vmem:[#allocation17 + $0x6d8] sm:$0xff] }
 0x55d   :  { %v6031_v50 = vcombine.high %v1320_v34, %v1324_v32  ;;  %v6030_v40 = vcombine.low %v1320_v34, %v1324_v32  ;;  %v6032_v41 = vcombine.low %v1321_v35, %v1325_v36  ;;  %v1369_v34 = vld [vmem:[#allocation17 + $0x858] sm:$0xff] }
 0x55e   :  { %4594 = vmatpush1.bf16.msra.mxu1 %v5974_v51  ;;  %v6033_v51 = vcombine.high %v1321_v35, %v1325_v36  ;;  %v1373_v32 = vld [vmem:[#allocation17 + $0x878] sm:$0xff] }
 0x55f   :  { %4758 = vmatpush1.bf16.msra.mxu0 %v5976_v56  ;;  %4595 = vmatprep.subr.bf16.mxu1 %v5983_v58  ;;  %v1328_v56 = vld [vmem:[#allocation17 + $0x710] sm:$0xff] }
 0x560   :  { %4759 = vmatprep.subr.bf16.mxu0 %v5985_v59  ;;  %v1332_v58 = vld [vmem:[#allocation17 + $0x730] sm:$0xff]  ;;  %v1329_v59 = vld [vmem:[#allocation17 + $0x718] sm:$0xff] }
 0x561   :  { %v6039_v55 = vcombine.high %v1328_v56, %v1332_v58  ;;  %v6038_v16 = vcombine.low %v1328_v56, %v1332_v58  ;;  %v6040_v45 = vcombine.low %v1329_v59, %v1333_v38  ;;  %v1381_v56 = vld [vmem:[#allocation17 + $0x8b8] sm:$0xff] }
 0x562   :  { %4596 = vmatpush1.bf16.msra.mxu1 %v5982_v22  ;;  %v6041_v22 = vcombine.high %v1329_v59, %v1333_v38  ;;  %v6080_v59 = vcombine.low %v1369_v34, %v1373_v32 }
 0x563   :  { %4760 = vmatpush1.bf16.msra.mxu0 %v5984_v23  ;;  %4597 = vmatprep.subr.bf16.mxu1 %v5991_v54  ;;  %v1336_v23 = vld [vmem:[#allocation17 + $0x750] sm:$0xff] }
 0x564   :  { %4761 = vmatprep.subr.bf16.mxu0 %v5993_v44  ;;  %v1340_v54 = vld [vmem:[#allocation17 + $0x770] sm:$0xff]  ;;  %v1337_v44 = vld [vmem:[#allocation17 + $0x758] sm:$0xff] }
 0x565   :  { %v6047_v61 = vcombine.high %v1336_v23, %v1340_v54  ;;  %v6046_v63 = vcombine.low %v1336_v23, %v1340_v54  ;;  %v6048_v26 = vcombine.low %v1337_v44, %v1341_v4  ;;  %v1389_v23 = vld [vmem:[#allocation17 + $0x8f8] sm:$0xff] }
 0x566   :  { %4598 = vmatpush1.bf16.msra.mxu1 %v5990_v46  ;;  %v6049_v46 = vcombine.high %v1337_v44, %v1341_v4 }
 0x567   :  { %4762 = vmatpush1.bf16.msra.mxu0 %v5992_v47  ;;  %4599 = vmatprep.subr.bf16.mxu1 %v5999_v15  ;;  %v1344_v47 = vld [vmem:[#allocation17 + $0x790] sm:$0xff] }
 0x568   :  { %4763 = vmatprep.subr.bf16.mxu0 %v6001_v19  ;;  %v1348_v15 = vld [vmem:[#allocation17 + $0x7b0] sm:$0xff]  ;;  %v1345_v19 = vld [vmem:[#allocation17 + $0x798] sm:$0xff] }
 0x569   :  { %v6055_v2 = vcombine.high %v1344_v47, %v1348_v15  ;;  %v6054_v9 = vcombine.low %v1344_v47, %v1348_v15  ;;  %v6056_v12 = vcombine.low %v1345_v19, %v1349_v48 }
 0x56a   :  { %4600 = vmatpush1.bf16.msra.mxu1 %v5998_v60  ;;  %v6057_v60 = vcombine.high %v1345_v19, %v1349_v48  ;;  %v1400_v48 = vld [vmem:[#allocation17 + $0x950] sm:$0xff] }
 0x56b   :  { %4764 = vmatpush1.bf16.msra.mxu0 %v6000_v52  ;;  %4601 = vmatprep.subr.bf16.mxu1 %v6007_v5  ;;  %v1352_v52 = vld [vmem:[#allocation17 + $0x7d0] sm:$0xff] }
 0x56c   :  { %4765 = vmatprep.subr.bf16.mxu0 %v6009_v6  ;;  %v1356_v5 = vld [vmem:[#allocation17 + $0x7f0] sm:$0xff]  ;;  %v1353_v6 = vld [vmem:[#allocation17 + $0x7d8] sm:$0xff] }
 0x56d   :  { %v6063_v13 = vcombine.high %v1352_v52, %v1356_v5  ;;  %v6062_v24 = vcombine.low %v1352_v52, %v1356_v5  ;;  %v6064_v25 = vcombine.low %v1353_v6, %v1357_v7 }
 0x56e   :  { %4602 = vmatpush1.bf16.msra.mxu1 %v6006_v14  ;;  %v6065_v14 = vcombine.high %v1353_v6, %v1357_v7  ;;  %v1408_v7 = vld [vmem:[#allocation17 + $0x990] sm:$0xff] }
 0x56f   :  { %4766 = vmatpush1.bf16.msra.mxu0 %v6008_v20  ;;  %4603 = vmatprep.subr.bf16.mxu1 %v6015_v21  ;;  %v1360_v20 = vld [vmem:[#allocation17 + $0x810] sm:$0xff] }
 0x570   :  { %4767 = vmatprep.subr.bf16.mxu0 %v6017_v10  ;;  %v1364_v21 = vld [vmem:[#allocation17 + $0x830] sm:$0xff]  ;;  %v1361_v10 = vld [vmem:[#allocation17 + $0x818] sm:$0xff] }
 0x571   :  { %v6071_v27 = vcombine.high %v1360_v20, %v1364_v21  ;;  %v6072_v35 = vcombine.low %v1361_v10, %v1365_v18 }
 0x572   :  { %4604 = vmatpush1.bf16.msra.mxu1 %v6014_v29  ;;  %v6073_v29 = vcombine.high %v1361_v10, %v1365_v18  ;;  %v1416_v18 = vld [vmem:[#allocation17 + $0x9d0] sm:$0xff] }
 0x573   :  { %4768 = vmatpush1.bf16.msra.mxu0 %v6016_v30  ;;  %4605 = vmatprep.subr.bf16.mxu1 %v6023_v31  ;;  %v1368_v30 = vld [vmem:[#allocation17 + $0x850] sm:$0xff] }
 0x574   :  { %4769 = vmatprep.subr.bf16.mxu0 %v6025_v11  ;;  %v1372_v31 = vld [vmem:[#allocation17 + $0x870] sm:$0xff]  ;;  %v6070_v11 = vcombine.low %v1360_v20, %v1364_v21 }
 0x575   :  { %v6079_v36 = vcombine.high %v1368_v30, %v1372_v31  ;;  %v6078_v58 = vcombine.low %v1368_v30, %v1372_v31 }
 0x576   :  { %4606 = vmatpush1.bf16.msra.mxu1 %v6022_v37  ;;  %v1376_v37 = vld [vmem:[#allocation17 + $0x890] sm:$0xff] }
 0x577   :  { %4770 = vmatpush1.bf16.msra.mxu0 %v6024_v17  ;;  %4607 = vmatprep.subr.bf16.mxu1 %v6031_v50  ;;  %v1380_v17 = vld [vmem:[#allocation17 + $0x8b0] sm:$0xff]  ;;  %v6081_v50 = vcombine.high %v1369_v34, %v1373_v32 }
 0x578   :  { %4771 = vmatprep.subr.bf16.mxu0 %v6033_v51  ;;  %v1377_v51 = vld [vmem:[#allocation17 + $0x898] sm:$0xff]  ;;  %v6087_v38 = vcombine.high %v1376_v37, %v1380_v17  ;;  %v6086_v54 = vcombine.low %v1376_v37, %v1380_v17  ;;  %v1424_v34 = vld [vmem:[#allocation17 + $0xa10] sm:$0xff] }
 0x579   :  { %v1428_v32 = vld [vmem:[#allocation17 + $0xa30] sm:$0xff] }
 0x57a   :  { %4608 = vmatpush1.bf16.msra.mxu1 %v6030_v40  ;;  %v6089_v40 = vcombine.high %v1377_v51, %v1381_v56 }
 0x57b   :  { %4772 = vmatpush1.bf16.msra.mxu0 %v6032_v41  ;;  %4609 = vmatprep.subr.bf16.mxu1 %v6039_v55  ;;  %v1384_v41 = vld [vmem:[#allocation17 + $0x8d0] sm:$0xff] }
 0x57c   :  { %4773 = vmatprep.subr.bf16.mxu0 %v6041_v22  ;;  %v1388_v55 = vld [vmem:[#allocation17 + $0x8f0] sm:$0xff]  ;;  %v1385_v22 = vld [vmem:[#allocation17 + $0x8d8] sm:$0xff] }
 0x57d   :  { %v6095_v44 = vcombine.high %v1384_v41, %v1388_v55  ;;  %v6097_v4 = vcombine.high %v1385_v22, %v1389_v23  ;;  %v6096_v47 = vcombine.low %v1385_v22, %v1389_v23  ;;  %v1440_v23 = vld [vmem:[#allocation17 + $0xa90] sm:$0xff] }
 0x57e   :  { %4610 = vmatpush1.bf16.msra.mxu1 %v6038_v16  ;;  %v1392_v16 = vld [vmem:[#allocation17 + $0x910] sm:$0xff] }
 0x57f   :  { %4774 = vmatpush1.bf16.msra.mxu0 %v6040_v45  ;;  %4611 = vmatprep.subr.bf16.mxu1 %v6047_v61  ;;  %v1396_v45 = vld [vmem:[#allocation17 + $0x930] sm:$0xff]  ;;  %v1393_v61 = vld [vmem:[#allocation17 + $0x918] sm:$0xff] }
 0x580   :  { %4775 = vmatprep.subr.bf16.mxu0 %v6049_v46  ;;  %v1397_v46 = vld [vmem:[#allocation17 + $0x938] sm:$0xff]  ;;  %v6103_v15 = vcombine.high %v1392_v16, %v1396_v45 }
 0x581   :  { %v6105_v19 = vcombine.high %v1393_v61, %v1397_v46  ;;  %v6104_v52 = vcombine.low %v1393_v61, %v1397_v46  ;;  %v1448_v46 = vld [vmem:[#allocation17 + $0xad0] sm:$0xff] }
 0x582   :  { %4612 = vmatpush1.bf16.msra.mxu1 %v6046_v63  ;;  %v1404_v63 = vld [vmem:[#allocation17 + $0x970] sm:$0xff] }
 0x583   :  { %4776 = vmatpush1.bf16.msra.mxu0 %v6048_v26  ;;  %4613 = vmatprep.subr.bf16.mxu1 %v6055_v2  ;;  %v1401_v26 = vld [vmem:[#allocation17 + $0x958] sm:$0xff]  ;;  %v6111_v5 = vcombine.high %v1400_v48, %v1404_v63 }
 0x584   :  { %4777 = vmatprep.subr.bf16.mxu0 %v6057_v60  ;;  %v1405_v2 = vld [vmem:[#allocation17 + $0x978] sm:$0xff]  ;;  %v6102_v60 = vcombine.low %v1392_v16, %v1396_v45 }
 0x585   :  { %v6113_v6 = vcombine.high %v1401_v26, %v1405_v2  ;;  %v6112_v20 = vcombine.low %v1401_v26, %v1405_v2  ;;  %v1456_v2 = vld [vmem:[#allocation17 + $0xb10] sm:$0xff] }
 0x586   :  { %4614 = vmatpush1.bf16.msra.mxu1 %v6054_v9  ;;  %v1412_v9 = vld [vmem:[#allocation17 + $0x9b0] sm:$0xff] }
 0x587   :  { %4778 = vmatpush1.bf16.msra.mxu0 %v6056_v12  ;;  %4615 = vmatprep.subr.bf16.mxu1 %v6063_v13  ;;  %v1409_v12 = vld [vmem:[#allocation17 + $0x998] sm:$0xff]  ;;  %v6119_v21 = vcombine.high %v1408_v7, %v1412_v9 }
 0x588   :  { %4779 = vmatprep.subr.bf16.mxu0 %v6065_v14  ;;  %v1413_v13 = vld [vmem:[#allocation17 + $0x9b8] sm:$0xff]  ;;  %v6110_v14 = vcombine.low %v1400_v48, %v1404_v63 }
 0x589   :  { %v6121_v10 = vcombine.high %v1409_v12, %v1413_v13  ;;  %v6120_v30 = vcombine.low %v1409_v12, %v1413_v13  ;;  %v1464_v13 = vld [vmem:[#allocation17 + $0xb50] sm:$0xff] }
 0x58a   :  { %4616 = vmatpush1.bf16.msra.mxu1 %v6062_v24  ;;  %v1420_v24 = vld [vmem:[#allocation17 + $0x9f0] sm:$0xff] }
 0x58b   :  { %4780 = vmatpush1.bf16.msra.mxu0 %v6064_v25  ;;  %4626 = vmatprep.subr.bf16.mxu1 %v6071_v27  ;;  %v1417_v25 = vld [vmem:[#allocation17 + $0x9d8] sm:$0xff]  ;;  %v6127_v31 = vcombine.high %v1416_v18, %v1420_v24  ;;  %v6126_v37 = vcombine.low %v1416_v18, %v1420_v24 }
 0x58c   :  { %4790 = vmatprep.subr.bf16.mxu0 %v6073_v29  ;;  %v1421_v27 = vld [vmem:[#allocation17 + $0x9f8] sm:$0xff]  ;;  %v6118_v29 = vcombine.low %v1408_v7, %v1412_v9 }
 0x58d   :  { %4618 = vmatmul.mubr.bf16.vlgmr.msra.gmra.mrb[12].mxu1 %v7480_v33  ;;  %v6128_v17 = vcombine.low %v1417_v25, %v1421_v27 }
 0x58e   :  { %4782 = vmatmul.mubr.bf16.vlgmr.msra.gmra.mrb[16].mxu0 %v7480_v33  ;;  %4627 = vmatpush1.bf16.msra.mxu1 %v6070_v11  ;;  %v6088_v33 = vcombine.low %v1377_v51, %v1381_v56  ;;  %v6129_v11 = vcombine.high %v1417_v25, %v1421_v27  ;;  %v1432_v56 = vld [vmem:[#allocation17 + $0xa50] sm:$0xff] }
 0x58f   :  { %4658 = vmatprep.mubr.bf16.mxu1 %v7482_v62  ;;  %4791 = vmatpush1.bf16.msra.mxu0 %v6072_v35  ;;  %v1425_v35 = vld [vmem:[#allocation17 + $0xa18] sm:$0xff]  ;;  %v1472_v27 = vld [vmem:[#allocation17 + $0xb90] sm:$0xff] }
 0x590   :  { %4822 = vmatprep.mubr.bf16.mxu0 %v7482_v62  ;;  %4628 = vmatprep.subr.bf16.mxu1 %v6079_v36  ;;  %v6094_v62 = vcombine.low %v1384_v41, %v1388_v55  ;;  %v1429_v36 = vld [vmem:[#allocation17 + $0xa38] sm:$0xff] }
 0x591   :  { %4792 = vmatprep.subr.bf16.mxu0 %v6081_v50  ;;  %v6135_v50 = vcombine.high %v1424_v34, %v1428_v32  ;;  %v6137_v51 = vcombine.high %v1425_v35, %v1429_v36  ;;  %v6136_v41 = vcombine.low %v1425_v35, %v1429_v36  ;;  %v1480_v36 = vld [vmem:[#allocation17 + $0xbd0] sm:$0xff] }
 0x592   :  { %4629 = vmatpush1.bf16.msra.mxu1 %v6078_v58  ;;  %v1436_v58 = vld [vmem:[#allocation17 + $0xa70] sm:$0xff] }
 0x593   :  { %4793 = vmatpush1.bf16.msra.mxu0 %v6080_v59  ;;  %4630 = vmatprep.subr.bf16.mxu1 %v6087_v38  ;;  %v1433_v59 = vld [vmem:[#allocation17 + $0xa58] sm:$0xff]  ;;  %v6143_v55 = vcombine.high %v1432_v56, %v1436_v58 }
 0x594   :  { %4794 = vmatprep.subr.bf16.mxu0 %v6089_v40  ;;  %v1437_v38 = vld [vmem:[#allocation17 + $0xa78] sm:$0xff]  ;;  %v6134_v40 = vcombine.low %v1424_v34, %v1428_v32 }
 0x595   :  { %v6145_v22 = vcombine.high %v1433_v59, %v1437_v38  ;;  %v6144_v16 = vcombine.low %v1433_v59, %v1437_v38  ;;  %v1488_v38 = vld [vmem:[#allocation17 + $0xc10] sm:$0xff] }
 0x596   :  { %4631 = vmatpush1.bf16.msra.mxu1 %v6086_v54  ;;  %v1444_v54 = vld [vmem:[#allocation17 + $0xab0] sm:$0xff] }
 0x597   :  { %4795 = vmatpush1.bf16.msra.mxu0 %v6088_v33  ;;  %4632 = vmatprep.subr.bf16.mxu1 %v6095_v44  ;;  %v1441_v33 = vld [vmem:[#allocation17 + $0xa98] sm:$0xff]  ;;  %v6151_v45 = vcombine.high %v1440_v23, %v1444_v54 }
 0x598   :  { %4796 = vmatprep.subr.bf16.mxu0 %v6097_v4  ;;  %v1445_v44 = vld [vmem:[#allocation17 + $0xab8] sm:$0xff]  ;;  %v6142_v4 = vcombine.low %v1432_v56, %v1436_v58 }
 0x599   :  { %v6153_v61 = vcombine.high %v1441_v33, %v1445_v44  ;;  %v6152_v48 = vcombine.low %v1441_v33, %v1445_v44  ;;  %v1496_v44 = vld [vmem:[#allocation17 + $0xc50] sm:$0xff] }
 0x59a   :  { %4633 = vmatpush1.bf16.msra.mxu1 %v6094_v62  ;;  %v1452_v62 = vld [vmem:[#allocation17 + $0xaf0] sm:$0xff] }
 0x59b   :  { %4797 = vmatpush1.bf16.msra.mxu0 %v6096_v47  ;;  %4634 = vmatprep.subr.bf16.mxu1 %v6103_v15  ;;  %v1449_v47 = vld [vmem:[#allocation17 + $0xad8] sm:$0xff]  ;;  %v6159_v63 = vcombine.high %v1448_v46, %v1452_v62 }
 0x59c   :  { %4798 = vmatprep.subr.bf16.mxu0 %v6105_v19  ;;  %v1453_v15 = vld [vmem:[#allocation17 + $0xaf8] sm:$0xff]  ;;  %v6150_v19 = vcombine.low %v1440_v23, %v1444_v54 }
 0x59d   :  { %v6161_v26 = vcombine.high %v1449_v47, %v1453_v15  ;;  %v6160_v7 = vcombine.low %v1449_v47, %v1453_v15  ;;  %v1504_v47 = vld [vmem:[#allocation17 + $0xc90] sm:$0xff] }
 0x59e   :  { %4635 = vmatpush1.bf16.msra.mxu1 %v6102_v60  ;;  %v1460_v60 = vld [vmem:[#allocation17 + $0xb30] sm:$0xff] }
 0x59f   :  { %4799 = vmatpush1.bf16.msra.mxu0 %v6104_v52  ;;  %4636 = vmatprep.subr.bf16.mxu1 %v6111_v5  ;;  %v1457_v52 = vld [vmem:[#allocation17 + $0xb18] sm:$0xff]  ;;  %v6167_v9 = vcombine.high %v1456_v2, %v1460_v60  ;;  %v1508_v15 = vld [vmem:[#allocation17 + $0xcb0] sm:$0xff] }
 0x5a0   :  { %4800 = vmatprep.subr.bf16.mxu0 %v6113_v6  ;;  %v1461_v5 = vld [vmem:[#allocation17 + $0xb38] sm:$0xff]  ;;  %v6158_v6 = vcombine.low %v1448_v46, %v1452_v62 }
 0x5a1   :  { %v6169_v12 = vcombine.high %v1457_v52, %v1461_v5  ;;  %v6168_v18 = vcombine.low %v1457_v52, %v1461_v5  ;;  %v1512_v5 = vld [vmem:[#allocation17 + $0xcd0] sm:$0xff] }
 0x5a2   :  { %4637 = vmatpush1.bf16.msra.mxu1 %v6110_v14  ;;  %v1468_v14 = vld [vmem:[#allocation17 + $0xb70] sm:$0xff] }
 0x5a3   :  { %4801 = vmatpush1.bf16.msra.mxu0 %v6112_v20  ;;  %4638 = vmatprep.subr.bf16.mxu1 %v6119_v21  ;;  %v1465_v20 = vld [vmem:[#allocation17 + $0xb58] sm:$0xff]  ;;  %v6175_v24 = vcombine.high %v1464_v13, %v1468_v14 }
 0x5a4   :  { %4802 = vmatprep.subr.bf16.mxu0 %v6121_v10  ;;  %v1469_v21 = vld [vmem:[#allocation17 + $0xb78] sm:$0xff]  ;;  %v6166_v10 = vcombine.low %v1456_v2, %v1460_v60  ;;  %v6215_v60 = vcombine.high %v1504_v47, %v1508_v15 }
 0x5a5   :  { %v6177_v25 = vcombine.high %v1465_v20, %v1469_v21  ;;  %v6176_v34 = vcombine.low %v1465_v20, %v1469_v21  ;;  %v1520_v20 = vld [vmem:[#allocation17 + $0xd10] sm:$0xff] }
 0x5a6   :  { %4639 = vmatpush1.bf16.msra.mxu1 %v6118_v29  ;;  %v1476_v29 = vld [vmem:[#allocation17 + $0xbb0] sm:$0xff] }
 0x5a7   :  { %4803 = vmatpush1.bf16.msra.mxu0 %v6120_v30  ;;  %4640 = vmatprep.subr.bf16.mxu1 %v6127_v31  ;;  %v1473_v30 = vld [vmem:[#allocation17 + $0xb98] sm:$0xff]  ;;  %v6183_v32 = vcombine.high %v1472_v27, %v1476_v29  ;;  %v1524_v21 = vld [vmem:[#allocation17 + $0xd30] sm:$0xff] }
 0x5a8   :  { %4804 = vmatprep.subr.bf16.mxu0 %v6129_v11  ;;  %v1477_v31 = vld [vmem:[#allocation17 + $0xbb8] sm:$0xff]  ;;  %v6174_v11 = vcombine.low %v1464_v13, %v1468_v14 }
 0x5a9   :  { %v6185_v35 = vcombine.high %v1473_v30, %v1477_v31  ;;  %v6184_v56 = vcombine.low %v1473_v30, %v1477_v31  ;;  %v1532_v30 = vld [vmem:[#allocation17 + $0xd70] sm:$0xff]  ;;  %v1529_v31 = vld [vmem:[#allocation17 + $0xd58] sm:$0xff] }
 0x5aa   :  { %4641 = vmatpush1.bf16.msra.mxu1 %v6126_v37  ;;  %v1484_v37 = vld [vmem:[#allocation17 + $0xbf0] sm:$0xff] }
 0x5ab   :  { %4805 = vmatpush1.bf16.msra.mxu0 %v6128_v17  ;;  %4642 = vmatprep.subr.bf16.mxu1 %v6135_v50  ;;  %v1481_v17 = vld [vmem:[#allocation17 + $0xbd8] sm:$0xff]  ;;  %v6191_v58 = vcombine.high %v1480_v36, %v1484_v37 }
 0x5ac   :  { %4806 = vmatprep.subr.bf16.mxu0 %v6137_v51  ;;  %v1485_v50 = vld [vmem:[#allocation17 + $0xbf8] sm:$0xff]  ;;  %v6182_v51 = vcombine.low %v1472_v27, %v1476_v29  ;;  %v1528_v29 = vld [vmem:[#allocation17 + $0xd50] sm:$0xff] }
 0x5ad   :  { %v6193_v59 = vcombine.high %v1481_v17, %v1485_v50  ;;  %v6192_v23 = vcombine.low %v1481_v17, %v1485_v50  ;;  %v1540_v17 = vld [vmem:[#allocation17 + $0xdb0] sm:$0xff]  ;;  %v1537_v50 = vld [vmem:[#allocation17 + $0xd98] sm:$0xff] }
 0x5ae   :  { %4643 = vmatpush1.bf16.msra.mxu1 %v6134_v40  ;;  %v1492_v40 = vld [vmem:[#allocation17 + $0xc30] sm:$0xff] }
 0x5af   :  { %4807 = vmatpush1.bf16.msra.mxu0 %v6136_v41  ;;  %4644 = vmatprep.subr.bf16.mxu1 %v6143_v55  ;;  %v1489_v41 = vld [vmem:[#allocation17 + $0xc18] sm:$0xff]  ;;  %v6199_v54 = vcombine.high %v1488_v38, %v1492_v40 }
 0x5b0   :  { %4808 = vmatprep.subr.bf16.mxu0 %v6145_v22  ;;  %v1493_v55 = vld [vmem:[#allocation17 + $0xc38] sm:$0xff]  ;;  %v6190_v22 = vcombine.low %v1480_v36, %v1484_v37  ;;  %v1536_v37 = vld [vmem:[#allocation17 + $0xd90] sm:$0xff] }
 0x5b1   :  { %v6201_v33 = vcombine.high %v1489_v41, %v1493_v55  ;;  %v6200_v46 = vcombine.low %v1489_v41, %v1493_v55  ;;  %v1544_v41 = vld [vmem:[#allocation17 + $0xdd0] sm:$0xff] }
 0x5b2   :  { %4645 = vmatpush1.bf16.msra.mxu1 %v6142_v4  ;;  %v1500_v4 = vld [vmem:[#allocation17 + $0xc70] sm:$0xff] }
 0x5b3   :  { %4809 = vmatpush1.bf16.msra.mxu0 %v6144_v16  ;;  %4646 = vmatprep.subr.bf16.mxu1 %v6151_v45  ;;  %v6198_v16 = vcombine.low %v1488_v38, %v1492_v40  ;;  %v1497_v45 = vld [vmem:[#allocation17 + $0xc58] sm:$0xff]  ;;  %v6207_v62 = vcombine.high %v1496_v44, %v1500_v4  ;;  %v1548_v55 = vld [vmem:[#allocation17 + $0xdf0] sm:$0xff] }
 0x5b4   :  { %4810 = vmatprep.subr.bf16.mxu0 %v6153_v61  ;;  %v1501_v61 = vld [vmem:[#allocation17 + $0xc78] sm:$0xff] }
 0x5b5   :  { %v6208_v2 = vcombine.low %v1497_v45, %v1501_v61 }
 0x5b6   :  { %4647 = vmatpush1.bf16.msra.mxu1 %v6150_v19  ;;  %v6209_v19 = vcombine.high %v1497_v45, %v1501_v61 }
 0x5b7   :  { %4811 = vmatpush1.bf16.msra.mxu0 %v6152_v48  ;;  %4648 = vmatprep.subr.bf16.mxu1 %v6159_v63  ;;  %v1505_v48 = vld [vmem:[#allocation17 + $0xc98] sm:$0xff] }
 0x5b8   :  { %4812 = vmatprep.subr.bf16.mxu0 %v6161_v26  ;;  %v1509_v63 = vld [vmem:[#allocation17 + $0xcb8] sm:$0xff]  ;;  %v6206_v26 = vcombine.low %v1496_v44, %v1500_v4 }
 0x5b9   :  { %v6217_v52 = vcombine.high %v1505_v48, %v1509_v63 }
 0x5ba   :  { %4649 = vmatpush1.bf16.msra.mxu1 %v6158_v6  ;;  %v1516_v6 = vld [vmem:[#allocation17 + $0xcf0] sm:$0xff] }
 0x5bb   :  { %4813 = vmatpush1.bf16.msra.mxu0 %v6160_v7  ;;  %4650 = vmatprep.subr.bf16.mxu1 %v6167_v9  ;;  %v1513_v7 = vld [vmem:[#allocation17 + $0xcd8] sm:$0xff]  ;;  %v6223_v13 = vcombine.high %v1512_v5, %v1516_v6 }
 0x5bc   :  { %4814 = vmatprep.subr.bf16.mxu0 %v6169_v12  ;;  %v1517_v9 = vld [vmem:[#allocation17 + $0xcf8] sm:$0xff]  ;;  %v6214_v12 = vcombine.low %v1504_v47, %v1508_v15 }
 0x5bd   :  { %v6225_v14 = vcombine.high %v1513_v7, %v1517_v9 }
 0x5be   :  { %4651 = vmatpush1.bf16.msra.mxu1 %v6166_v10  ;;  %v1521_v10 = vld [vmem:[#allocation17 + $0xd18] sm:$0xff] }
 0x5bf   :  { %4815 = vmatpush1.bf16.msra.mxu0 %v6168_v18  ;;  %4652 = vmatprep.subr.bf16.mxu1 %v6175_v24  ;;  %v1525_v18 = vld [vmem:[#allocation17 + $0xd38] sm:$0xff]  ;;  %v6224_v24 = vcombine.low %v1513_v7, %v1517_v9  ;;  %v1564_v7 = vld [vmem:[#allocation17 + $0xe70] sm:$0xff] }
 0x5c0   :  { %4816 = vmatprep.subr.bf16.mxu0 %v6177_v25  ;;  %v6231_v25 = vcombine.high %v1520_v20, %v1524_v21  ;;  %v6233_v27 = vcombine.high %v1521_v10, %v1525_v18  ;;  %v1561_v9 = vld [vmem:[#allocation17 + $0xe58] sm:$0xff] }
 0x5c2   :  { %4653 = vmatpush1.bf16.msra.mxu1 %v6174_v11  ;;  %v1533_v11 = vld [vmem:[#allocation17 + $0xd78] sm:$0xff] }
 0x5c3   :  { %4817 = vmatpush1.bf16.msra.mxu0 %v6176_v34  ;;  %4654 = vmatprep.subr.bf16.mxu1 %v6183_v32  ;;  %v6230_v34 = vcombine.low %v1520_v20, %v1524_v21  ;;  %v6232_v32 = vcombine.low %v1521_v10, %v1525_v18  ;;  %v6241_v36 = vcombine.high %v1529_v31, %v1533_v11  ;;  %v1568_v21 = vld [vmem:[#allocation17 + $0xe90] sm:$0xff]  ;;  %v1569_v18 = vld [vmem:[#allocation17 + $0xe98] sm:$0xff] }
 0x5c4   :  { %4818 = vmatprep.subr.bf16.mxu0 %v6185_v35  ;;  %v6239_v35 = vcombine.high %v1528_v29, %v1532_v30  ;;  %v1572_v10 = vld [vmem:[#allocation17 + $0xeb0] sm:$0xff] }
 0x5c6   :  { %4655 = vmatpush1.bf16.msra.mxu1 %v6182_v51  ;;  %v1541_v51 = vld [vmem:[#allocation17 + $0xdb8] sm:$0xff] }
 0x5c7   :  { %4819 = vmatpush1.bf16.msra.mxu0 %v6184_v56  ;;  %4656 = vmatprep.subr.bf16.mxu1 %v6191_v58  ;;  %v6238_v56 = vcombine.low %v1528_v29, %v1532_v30  ;;  %v6240_v58 = vcombine.low %v1529_v31, %v1533_v11  ;;  %v6249_v40 = vcombine.high %v1537_v50, %v1541_v51  ;;  %v1576_v30 = vld [vmem:[#allocation17 + $0xed0] sm:$0xff]  ;;  %v1577_v11 = vld [vmem:[#allocation17 + $0xed8] sm:$0xff] }
 0x5c8   :  { %4820 = vmatprep.subr.bf16.mxu0 %v6193_v59  ;;  %v6247_v59 = vcombine.high %v1536_v37, %v1540_v17  ;;  %v1580_v31 = vld [vmem:[#allocation17 + $0xef0] sm:$0xff] }
 0x5ca   :  { %4657 = vmatpush1.bf16.msra.mxu1 %v6190_v22 }
 0x5cb   :  { %4821 = vmatpush1.bf16.msra.mxu0 %v6192_v23  ;;  %4667 = vmatprep.subr.bf16.mxu1 %v6199_v54  ;;  %v1545_v54 = vld [vmem:[#allocation17 + $0xdd8] sm:$0xff] }
 0x5cc   :  { %4831 = vmatprep.subr.bf16.mxu0 %v6201_v33  ;;  %v1549_v33 = vld [vmem:[#allocation17 + $0xdf8] sm:$0xff] }
 0x5cd   :  { %4659 = vmatmul.mubr.bf16.vlgmr.msra.gmra.mrb[12].mxu1 %v7490_v39  ;;  %v6257_v15 = vcombine.high %v1545_v54, %v1549_v33 }
 0x5ce   :  { %4823 = vmatmul.mubr.bf16.vlgmr.msra.gmra.mrb[16].mxu0 %v7490_v39  ;;  %4668 = vmatpush1.bf16.msra.mxu1 %v6198_v16  ;;  %v6216_v39 = vcombine.low %v1505_v48, %v1509_v63  ;;  %v6246_v16 = vcombine.low %v1536_v37, %v1540_v17  ;;  %v1556_v48 = vld [vmem:[#allocation17 + $0xe30] sm:$0xff]  ;;  %v1553_v63 = vld [vmem:[#allocation17 + $0xe18] sm:$0xff] }
 0x5cf   :  { %4699 = vmatprep.mubr.bf16.mxu1 %v7493_v43  ;;  %4832 = vmatpush1.bf16.msra.mxu0 %v6200_v46  ;;  %v6248_v46 = vcombine.low %v1537_v50, %v1541_v51  ;;  %v1584_v17 = vld [vmem:[#allocation17 + $0xf10] sm:$0xff]  ;;  %v1585_v51 = vld [vmem:[#allocation17 + $0xf18] sm:$0xff] }
 0x5d0   :  { %4863 = vmatprep.mubr.bf16.mxu0 %v7493_v43  ;;  %4669 = vmatprep.subr.bf16.mxu1 %v6207_v62  ;;  %v6222_v43 = vcombine.low %v1512_v5, %v1516_v6  ;;  %v6255_v62 = vcombine.high %v1544_v41, %v1548_v55  ;;  %v1560_v6 = vld [vmem:[#allocation17 + $0xe50] sm:$0xff] }
 0x5d1   :  { %4833 = vmatprep.subr.bf16.mxu0 %v6209_v19  ;;  %v1552_v19 = vld [vmem:[#allocation17 + $0xe10] sm:$0xff] }
 0x5d2   :  { %4670 = vmatpush1.bf16.msra.mxu1 %v6206_v26  ;;  %v1557_v26 = vld [vmem:[#allocation17 + $0xe38] sm:$0xff]  ;;  %v1588_v50 = vld [vmem:[#allocation17 + $0xf30] sm:$0xff] }
 0x5d3   :  { %4834 = vmatpush1.bf16.msra.mxu0 %v6208_v2  ;;  %4671 = vmatprep.subr.bf16.mxu1 %v6215_v60  ;;  %v6254_v2 = vcombine.low %v1544_v41, %v1548_v55  ;;  %v6256_v60 = vcombine.low %v1545_v54, %v1549_v33  ;;  %v6265_v5 = vcombine.high %v1553_v63, %v1557_v26  ;;  %v1592_v55 = vld [vmem:[#allocation17 + $0xf50] sm:$0xff]  ;;  %v1593_v33 = vld [vmem:[#allocation17 + $0xf58] sm:$0xff] }
 0x5d4   :  { %4835 = vmatprep.subr.bf16.mxu0 %v6217_v52  ;;  %v6263_v52 = vcombine.high %v1552_v19, %v1556_v48  ;;  %v1596_v54 = vld [vmem:[#allocation17 + $0xf70] sm:$0xff] }
 0x5d6   :  { %4672 = vmatpush1.bf16.msra.mxu1 %v6214_v12  ;;  %v1565_v12 = vld [vmem:[#allocation17 + $0xe78] sm:$0xff] }
 0x5d7   :  { %4836 = vmatpush1.bf16.msra.mxu0 %v6216_v39  ;;  %4673 = vmatprep.subr.bf16.mxu1 %v6223_v13  ;;  %v6262_v39 = vcombine.low %v1552_v19, %v1556_v48  ;;  %v6264_v13 = vcombine.low %v1553_v63, %v1557_v26  ;;  %v6273_v20 = vcombine.high %v1561_v9, %v1565_v12  ;;  %v1605_v19 = vld [vmem:[#allocation17 + $0xfb8] sm:$0xff] }
 0x5d8   :  { %4837 = vmatprep.subr.bf16.mxu0 %v6225_v14  ;;  %v6271_v14 = vcombine.high %v1560_v6, %v1564_v7  ;;  %v6302_v48 = vcombine.low %v1592_v55, %v1596_v54 }
 0x5da   :  { %4674 = vmatpush1.bf16.msra.mxu1 %v6222_v43  ;;  %v1573_v43 = vld [vmem:[#allocation17 + $0xeb8] sm:$0xff] }
 0x5db   :  { %4838 = vmatpush1.bf16.msra.mxu0 %v6224_v24  ;;  %4675 = vmatprep.subr.bf16.mxu1 %v6231_v25  ;;  %v6270_v24 = vcombine.low %v1560_v6, %v1564_v7  ;;  %v6272_v25 = vcombine.low %v1561_v9, %v1565_v12  ;;  %v6281_v29 = vcombine.high %v1569_v18, %v1573_v43  ;;  %v1613_v6 = vld [vmem:[#allocation17 + $0xff8] sm:$0xff] }
 0x5dc   :  { %4839 = vmatprep.subr.bf16.mxu0 %v6233_v27  ;;  %v6279_v27 = vcombine.high %v1568_v21, %v1572_v10 }
 0x5de   :  { %4676 = vmatpush1.bf16.msra.mxu1 %v6230_v34  ;;  %v1581_v34 = vld [vmem:[#allocation17 + $0xef8] sm:$0xff] }
 0x5df   :  { %4840 = vmatpush1.bf16.msra.mxu0 %v6232_v32  ;;  %4677 = vmatprep.subr.bf16.mxu1 %v6239_v35  ;;  %v6278_v32 = vcombine.low %v1568_v21, %v1572_v10  ;;  %v6280_v35 = vcombine.low %v1569_v18, %v1573_v43  ;;  %v6289_v37 = vcombine.high %v1577_v11, %v1581_v34  ;;  %v6576_v21 = vld [vmem:[#allocation23 + $0xc0] sm:$0xff]   ;;  %v1614_v43 = vld [vmem:[#allocation19] sm:$0xff] }
 0x5e0   :  { %v7517_v38 = vpop.f32.mrb[8].mxu1  ;;  %4841 = vmatprep.subr.bf16.mxu0 %v6241_v36  ;;  %v6287_v36 = vcombine.high %v1576_v30, %v1580_v31  ;;  %v6577_v10 = vld [vmem:[#allocation23] sm:$0xff]  }
 0x5e1   :  { %v7519_v22 = vpop.f32.mrb[12].mxu0  ;;  %v7521_v23 = vpop.f32.mrb[9].mxu1  ;;  %v6578_v18 = vld [vmem:[#allocation23 + $0x80] sm:$0xff]  }
 0x5e2   :  { %v7523_v44 = vpop.f32.mrb[13].mxu0  ;;  %v4377_v4 = vpop.f32.mrb[10].mxu1  ;;  %4678 = vmatpush1.bf16.msra.mxu1 %v6238_v56  ;;  %v1589_v56 = vld [vmem:[#allocation17 + $0xf38] sm:$0xff] }
 0x5e3   :  { %v4541_v45 = vpop.f32.mrb[14].mxu0  ;;  %4842 = vmatpush1.bf16.msra.mxu0 %v6240_v58  ;;  %v4378_v61 = vpop.f32.mrb[11].mxu1  ;;  %4679 = vmatprep.subr.bf16.mxu1 %v6247_v59  ;;  %v6286_v58 = vcombine.low %v1576_v30, %v1580_v31  ;;  %v6288_v59 = vcombine.low %v1577_v11, %v1581_v34  ;;  %v6297_v41 = vcombine.high %v1585_v51, %v1589_v56  ;;  %v1597_v4 = vld [vmem:[#allocation17 + $0xf78] sm:$0xff] }
 0x5e4   :  { %v4542_v47 = vpop.f32.mrb[15].mxu0  ;;  %4843 = vmatprep.subr.bf16.mxu0 %v6249_v40  ;;  %v6295_v40 = vcombine.high %v1584_v17, %v1588_v50  ;;  %v6296_v45 = vcombine.low %v1585_v51, %v1589_v56  ;;  %v6303_v61 = vcombine.high %v1592_v55, %v1596_v54  ;;  %v6304_v63 = vcombine.low %v1593_v33, %v1597_v4 }
 0x5e5   :  { %v1604_v47 = vld [vmem:[#allocation17 + $0xfb0] sm:$0xff] }
 0x5e6   :  { %4680 = vmatpush1.bf16.msra.mxu1 %v6246_v16  ;;  %v6294_v16 = vcombine.low %v1584_v17, %v1588_v50  ;;  %v1639_v17 = vrot.slane %v1614_v43, %v7352_v1  ;;  %v1643_v50 = vrot.slane %v1614_v43, %v7354_v3 }
 0x5e7   :  { %4844 = vmatpush1.bf16.msra.mxu0 %v6248_v46  ;;  %4681 = vmatprep.subr.bf16.mxu1 %v6255_v62  ;;  %v6305_v46 = vcombine.high %v1593_v33, %v1597_v4  ;;  %v1600_v62 = vld [vmem:[#allocation17 + $0xf90] sm:$0xff] }
 0x5e8   :  { %4845 = vmatprep.subr.bf16.mxu0 %v6257_v15  ;;  %v1601_v15 = vld [vmem:[#allocation17 + $0xf98] sm:$0xff]  ;;  %v6311_v26 = vcombine.high %v1600_v62, %v1604_v47  ;;  %v6310_v7 = vcombine.low %v1600_v62, %v1604_v47 }
 0x5e9   :  { %v6312_v9 = vcombine.low %v1601_v15, %v1605_v19 }
 0x5ea   :  { %4682 = vmatpush1.bf16.msra.mxu1 %v6254_v2  ;;  %v6313_v2 = vcombine.high %v1601_v15, %v1605_v19 }
 0x5eb   :  { %4846 = vmatpush1.bf16.msra.mxu0 %v6256_v60  ;;  %4683 = vmatprep.subr.bf16.mxu1 %v6263_v52  ;;  %v1608_v60 = vld [vmem:[#allocation17 + $0xfd0] sm:$0xff] }
 0x5ec   :  { %4847 = vmatprep.subr.bf16.mxu0 %v6265_v5  ;;  %v1612_v52 = vld [vmem:[#allocation17 + $0xff0] sm:$0xff]  ;;  %v1609_v5 = vld [vmem:[#allocation17 + $0xfd8] sm:$0xff] }
 0x5ed   :  { %v6319_v12 = vcombine.high %v1608_v60, %v1612_v52 }
 0x5ee   :  { %4684 = vmatpush1.bf16.msra.mxu1 %v6262_v39  ;;  %v6321_v39 = vcombine.high %v1609_v5, %v1613_v6 }
 0x5ef   :  { %4848 = vmatpush1.bf16.msra.mxu0 %v6264_v13  ;;  %4685 = vmatprep.subr.bf16.mxu1 %v6271_v14  ;;  %v6318_v13 = vcombine.low %v1608_v60, %v1612_v52  ;;  %v6320_v14 = vcombine.low %v1609_v5, %v1613_v6 }
 0x5f0   :  { %4849 = vmatprep.subr.bf16.mxu0 %v6273_v20  ;;  %v6575_v20 = vld [vmem:[#allocation23 + $0x40] sm:$0xff]  }
 0x5f2   :  { %4686 = vmatpush1.bf16.msra.mxu1 %v6270_v24  ;;  %v1619_v24 = vrot.slane %v1614_v43, %v7326_v42 }
 0x5f3   :  { %4850 = vmatpush1.bf16.msra.mxu0 %v6272_v25  ;;  %4687 = vmatprep.subr.bf16.mxu1 %v6279_v27  ;;  %v1623_v25 = vrot.slane %v1614_v43, %v7328_v49 }
 0x5f4   :  { %4851 = vmatprep.subr.bf16.mxu0 %v6281_v29  ;;  %v7530_v27 = vadd.f32 %v7517_v38, %v1619_v24  ;;  %v1631_v38 = vrot.slane %v1614_v43, %v7339_v57  ;;  %v6589_v24 = vld [vmem:[#allocation23 + $0x18] sm:$0xff]  }
 0x5f5   :  { %v7533_v29 = vadd.f32 %v7521_v23, %v1623_v25  ;;  %v6590_v25 = vld [vmem:[#allocation23 + $0x98] sm:$0xff]  }
 0x5f6   :  { %4688 = vmatpush1.bf16.msra.mxu1 %v6278_v32  ;;  %v4883_v30 = vmul.f32 %v7530_v27, %v7530_v27 }
 0x5f7   :  { %4852 = vmatpush1.bf16.msra.mxu0 %v6280_v35  ;;  %4689 = vmatprep.subr.bf16.mxu1 %v6287_v36  ;;  %v4884_v31 = vmul.f32 %v7533_v29, %v7533_v29  ;;  %v4874_v34 = vadd.f32 %v7533_v29, %v7530_v27  ;;  %v7549_v35 = vadd.f32 %v7523_v44, %v1631_v38  ;;  %v6595_v38 = vld [vmem:[#allocation23 + $0x68] sm:$0xff]  }
 0x5f8   :  { %4853 = vmatprep.subr.bf16.mxu0 %v6289_v37  ;;  %v1635_v37 = vrot.slane %v1614_v43, %v7350_v0 }
 0x5f9   :  { %v4891_v32 = vadd.f32 %v4884_v31, %v4883_v30  ;;  %v6592_v30 = vld [vmem:[#allocation23 + $0xe0] sm:$0xff]  }
 0x5fa   :  { %4690 = vmatpush1.bf16.msra.mxu1 %v6286_v58  ;;  %v4886_v58 = vmul.f32 %v7549_v35, %v7549_v35  ;;  %v6593_v31 = vld [vmem:[#allocation23 + $0x20] sm:$0xff]  }
 0x5fb   :  { %4854 = vmatpush1.bf16.msra.mxu0 %v6288_v59  ;;  %4691 = vmatprep.subr.bf16.mxu1 %v6295_v40 }
 0x5fc   :  { %4855 = vmatprep.subr.bf16.mxu0 %v6297_v41  ;;  %v1647_v41 = vrot.slane %v1614_v43, %v7363_v8 }
 0x5fe   :  { %4692 = vmatpush1.bf16.msra.mxu1 %v6294_v16 }
 0x5ff   :  { %4856 = vmatpush1.bf16.msra.mxu0 %v6296_v45  ;;  %4693 = vmatprep.subr.bf16.mxu1 %v6303_v61 }
 0x600   :  { %4857 = vmatprep.subr.bf16.mxu0 %v6305_v46 }
 0x602   :  { %4694 = vmatpush1.bf16.msra.mxu1 %v6302_v48 }
 0x603   :  { %4858 = vmatpush1.bf16.msra.mxu0 %v6304_v63  ;;  %4695 = vmatprep.subr.bf16.mxu1 %v6311_v26 }
 0x604   :  { %4859 = vmatprep.subr.bf16.mxu0 %v6313_v2 }
 0x606   :  { %4696 = vmatpush1.bf16.msra.mxu1 %v6310_v7 }
 0x607   :  { %4860 = vmatpush1.bf16.msra.mxu0 %v6312_v9  ;;  %4697 = vmatprep.subr.bf16.mxu1 %v6319_v12  ;;  %v6579_v9 = vld [vmem:[#allocation23 + $0x48] sm:$0xff]  }
 0x608   :  { %4861 = vmatprep.subr.bf16.mxu0 %v6321_v39  ;;  %v6580_v12 = vld [vmem:[#allocation23 + $0xc8] sm:$0xff]  }
 0x609   :  { %v6581_v39 = vld [vmem:[#allocation23 + $0x8] sm:$0xff]  }
 0x60a   :  { %4698 = vmatpush1.bf16.msra.mxu1 %v6318_v13  ;;  %v6582_v13 = vld [vmem:[#allocation23 + $0x88] sm:$0xff]  }
 0x60b   :  { %4862 = vmatpush1.bf16.msra.mxu0 %v6320_v14  ;;  %6392 = vmatprep.subr.bf16.mxu1 %v6575_v20  ;;  %v6583_v14 = vld [vmem:[#allocation23 + $0x50] sm:$0xff]  }
 0x60c   :  { %6414 = vmatprep.subr.bf16.mxu0 %v6576_v21  ;;  %v6584_v20 = vld [vmem:[#allocation23 + $0xd0] sm:$0xff]  }
 0x60d   :  { %4700 = vmatmul.mubr.bf16.vlgmr.msra.gmra.mrb[12].mxu1 %v7499_v28  ;;  %v6585_v21 = vld [vmem:[#allocation23 + $0x10] sm:$0xff]  }
 0x60e   :  { %4864 = vmatmul.mubr.bf16.vlgmr.msra.gmra.mrb[16].mxu0 %v7499_v28  ;;  %6393 = vmatpush3.bf16.msra.mxu1 %v6577_v10  ;;  %v1627_v28 = vrot.slane %v1614_v43, %v7332_v53  ;;  %v6586_v10 = vld [vmem:[#allocation23 + $0x90] sm:$0xff]   ;;  %v6588_v43 = vld [vmem:[#allocation23 + $0xd8] sm:$0xff]  }
 0x60f   :  { %6415 = vmatpush3.bf16.msra.mxu0 %v6578_v18  ;;  %6394 = vmatprep.subr.bf16.mxu1 %v6579_v9  ;;  %v6587_v18 = vld [vmem:[#allocation23 + $0x58] sm:$0xff]  }
 0x610   :  { %v7541_v11 = vadd.f32 %v7519_v22, %v1627_v28  ;;  %6416 = vmatprep.subr.bf16.mxu0 %v6580_v12  ;;  %v6591_v28 = vld [vmem:[#allocation23 + $0x60] sm:$0xff]  }
 0x612   :  { %v4885_v23 = vmul.f32 %v7541_v11, %v7541_v11  ;;  %v4875_v36 = vadd.f32 %v7541_v11, %v4874_v34  ;;  %6395 = vmatpush3.bf16.msra.mxu1 %v6581_v39  ;;  %v6594_v34 = vld [vmem:[#allocation23 + $0xa0] sm:$0xff]  }
 0x613   :  { %6417 = vmatpush3.bf16.msra.mxu0 %v6582_v13  ;;  %6396 = vmatprep.subr.bf16.mxu1 %v6583_v14 }
 0x614   :  { %v4892_v22 = vadd.f32 %v4891_v32, %v4885_v23  ;;  %v4876_v56 = vadd.f32 %v7549_v35, %v4875_v36  ;;  %6418 = vmatprep.subr.bf16.mxu0 %v6584_v20  ;;  %v6596_v32 = vld [vmem:[#allocation23 + $0xe8] sm:$0xff]  }
 0x615   :  { %v6597_v23 = vld [vmem:[#allocation23 + $0x28] sm:$0xff]  }
 0x616   :  { %v4893_v4 = vadd.f32 %v4892_v22, %v4886_v58  ;;  %6397 = vmatpush3.bf16.msra.mxu1 %v6585_v21  ;;  %v6598_v36 = vld [vmem:[#allocation23 + $0xa8] sm:$0xff]   ;;  %v6601_v22 = vld [vmem:[#allocation23 + $0x30] sm:$0xff]   ;;  %v6605_v58 = vld [vmem:[#allocation23 + $0x38] sm:$0xff]  }
 0x617   :  { %6419 = vmatpush3.bf16.msra.mxu0 %v6586_v10  ;;  %6398 = vmatprep.subr.bf16.mxu1 %v6587_v18 }
 0x618   :  { %6420 = vmatprep.subr.bf16.mxu0 %v6588_v43 }
 0x61a   :  { %6399 = vmatpush3.bf16.msra.mxu1 %v6589_v24 }
 0x61b   :  { %6421 = vmatpush3.bf16.msra.mxu0 %v6590_v25  ;;  %6400 = vmatprep.subr.bf16.mxu1 %v6591_v28 }
 0x61c   :  { %6422 = vmatprep.subr.bf16.mxu0 %v6592_v30 }
 0x61e   :  { %6401 = vmatpush3.bf16.msra.mxu1 %v6593_v31 }
 0x61f   :  { %6423 = vmatpush3.bf16.msra.mxu0 %v6594_v34  ;;  %6402 = vmatprep.subr.bf16.mxu1 %v6595_v38 }
 0x620   :  { %6424 = vmatprep.subr.bf16.mxu0 %v6596_v32 }
 0x622   :  { %6403 = vmatpush3.bf16.msra.mxu1 %v6597_v23 }
 0x623   :  { %6425 = vmatpush3.bf16.msra.mxu0 %v6598_v36 }
 0x6e0   :  { %v4701_v51 = vpop.f32.mrb[12].mxu1 }
 0x6e1   :  { %v7558_v59 = vadd.f32 %v4701_v51, %v1635_v37  ;;  %v4865_v40 = vpop.f32.mrb[16].mxu0  ;;  %v4703_v44 = vpop.f32.mrb[13].mxu1  ;;  %v6599_v37 = vld [vmem:[#allocation23 + $0x70] sm:$0xff]   ;;  %v6603_v51 = vld [vmem:[#allocation23 + $0x78] sm:$0xff]  }
 0x6e2   :  { %v7561_v55 = vadd.f32 %v4703_v44, %v1639_v17  ;;  %v4867_v54 = vpop.f32.mrb[17].mxu0  ;;  %v4705_v33 = vpop.f32.mrb[14].mxu1  ;;  %v7566_v61 = vadd.f32 %v4865_v40, %v1643_v50  ;;  %v6600_v17 = vld [vmem:[#allocation23 + $0xf0] sm:$0xff]   ;;  %6404 = vmatprep.subr.bf16.mxu1 %v6599_v37  ;;  %v6606_v40 = vld [vmem:[#allocation23 + $0xb8] sm:$0xff]   ;;  %v6607_v44 = vld [vmem:[#allocation23 + $0x140] sm:$0xff]  }
 0x6e3   :  { %v4877_v16 = vadd.f32 %v7558_v59, %v4876_v56  ;;  %v4887_v45 = vmul.f32 %v7558_v59, %v7558_v59  ;;  %v4869_v46 = vpop.f32.mrb[18].mxu0  ;;  %v4706_v62 = vpop.f32.mrb[15].mxu1  ;;  %v7571_v63 = vadd.f32 %v4867_v54, %v1647_v41  ;;  %v6602_v50 = vld [vmem:[#allocation23 + $0xb0] sm:$0xff]   ;;  %6426 = vmatprep.subr.bf16.mxu0 %v6600_v17  ;;  %v6604_v56 = vld [vmem:[#allocation23 + $0xf8] sm:$0xff]   ;;  %6405 = vmatpush3.bf16.msra.mxu1 %v6601_v22  ;;  %v6608_v41 = vld [vmem:[#allocation23 + $0x1c0] sm:$0xff]  }
 0x6e4   :  { %v4888_v47 = vmul.f32 %v7561_v55, %v7561_v55  ;;  %v4870_v15 = vpop.f32.mrb[19].mxu0  ;;  %v4889_v26 = vmul.f32 %v7566_v61, %v7566_v61  ;;  %6427 = vmatpush3.bf16.msra.mxu0 %v6602_v50  ;;  %6406 = vmatprep.subr.bf16.mxu1 %v6603_v51 }
 0x6e5   :  { %v4894_v19 = vadd.f32 %v4893_v4, %v4887_v45  ;;  %v4878_v48 = vadd.f32 %v7561_v55, %v4877_v16  ;;  %v4890_v5 = vmul.f32 %v7571_v63, %v7571_v63  ;;  %6428 = vmatprep.subr.bf16.mxu0 %v6604_v56  ;;  %v7585_v15 = vld [vmem:[#allocation22] sm:$0xff] }
 0x6e6   :  { %v4975_v39 = vrot.slane %v7585_v15, %v7326_v42  ;;  %v4983_v13 = vrot.slane %v7585_v15, %v7332_v53 }
 0x6e7   :  { %v4879_v2 = vadd.f32 %v7566_v61, %v4878_v48  ;;  %v4895_v60 = vadd.f32 %v4894_v19, %v4888_v47  ;;  %6407 = vmatpush3.bf16.msra.mxu1 %v6605_v58  ;;  %v7583_v47 = vld [vmem:[#allocation20] sm:$0xff]  ;;  %v4979_v48 = vrot.slane %v7585_v15, %v7328_v49  ;;  %v6609_v58 = vld [vmem:[#allocation23 + $0x100] sm:$0xff]  }
 0x6e8   :  { %6429 = vmatpush3.bf16.msra.mxu0 %v6606_v40  ;;  %6436 = vmatprep.subr.bf16.mxu1 %v6607_v44  ;;  %v4930_v19 = vrot.slane %v7583_v47, %v7328_v49  ;;  %v6610_v40 = vld [vmem:[#allocation23 + $0x180] sm:$0xff]   ;;  %v6611_v44 = vld [vmem:[#allocation23 + $0x148] sm:$0xff]  }
 0x6e9   :  { %v4880_v52 = vadd.f32 %v7571_v63, %v4879_v2  ;;  %v4896_v6 = vadd.f32 %v4895_v60, %v4889_v26  ;;  %6458 = vmatprep.subr.bf16.mxu0 %v6608_v41  ;;  %v4938_v26 = vrot.slane %v7583_v47, %v7339_v57  ;;  %v4926_v2 = vrot.slane %v7583_v47, %v7326_v42  ;;  %v6612_v41 = vld [vmem:[#allocation23 + $0x1c8] sm:$0xff]  }
 0x6ea   :  { %v4987_v60 = vrot.slane %v7585_v15, %v7339_v57  ;;  %v4995_v42 = vrot.slane %v7585_v15, %v7352_v1 }
 0x6eb   :  { %4881 = vadd.xlane.f32.xlu0 %v4880_v52  ;;  %v4897_v7 = vadd.f32 %v4896_v6, %v4890_v5  ;;  %v4934_v52 = vrot.slane %v7583_v47, %v7332_v53  ;;  %v4946_v5 = vrot.slane %v7583_v47, %v7352_v1  ;;  %v4954_v6 = vrot.slane %v7583_v47, %v7363_v8 }
 0x6ed   :  { %4898 = vadd.xlane.f32.xlu1 %v4897_v7 }
 0x778   :  { %v4882_v54 = vpop.xlane.xlu0 %4881 }
 0x779   :  { %v7579_v33 = vmul.f32 0.001, %v4882_v54 }
 0x77a   :  { %v4899_v4 = vpop.xlane.xlu1 %4898 }
 0x77b   :  { %v4901_v16 = vmul.f32 0.001, %v4899_v4  ;;  %v4902_v45 = vmul.f32 %v7579_v33, %v7579_v33  ;;  %v4905_v49 = vsub.f32 %v7533_v29, %v7579_v33  ;;  %v4907_v7 = vsub.f32 %v7549_v35, %v7579_v33 }
 0x77c   :  { %v4904_v9 = vsub.f32 %v7530_v27, %v7579_v33  ;;  %v4906_v57 = vsub.f32 %v7541_v11, %v7579_v33  ;;  %v4909_v29 = vsub.f32 %v7561_v55, %v7579_v33  ;;  %v4911_v35 = vsub.f32 %v7571_v63, %v7579_v33 }
 0x77d   :  { %v4903_v46 = vsub.f32 %v4901_v16, %v4902_v45  ;;  %v5003_v55 = vrot.slane %v7585_v15, %v7363_v8  ;;  %v6613_v16 = vld [vmem:[#allocation23 + $0x108] sm:$0xff]  }
 0x77e   :  { %v6614_v45 = vld [vmem:[#allocation23 + $0x188] sm:$0xff]  }
 0x77f   :  { %v4912_v62 = vadd.f32 1e-05, %v4903_v46  ;;  %v6615_v46 = vld [vmem:[#allocation23 + $0x150] sm:$0xff]  }
 0x781   :  { %6643 = vrsqrt.f32 %v4912_v62  ;;  %v6616_v62 = vld [vmem:[#allocation23 + $0x1d0] sm:$0xff]  }
 0x78b   :  { %v7611_v12 = vpop.eup %6643 }
 0x78c   :  { %v4915_v14 = vmul.f32 %v7611_v12, %v4905_v49  ;;  %v4917_v27 = vmul.f32 %v7611_v12, %v4907_v7  ;;  %v4914_v11 = vmul.f32 %v7611_v12, %v4904_v9  ;;  %v4916_v20 = vmul.f32 %v7611_v12, %v4906_v57  ;;  %v6625_v9 = vld [vmem:[#allocation23 + $0x120] sm:$0xff]  }
 0x78d   :  { %v4919_v21 = vmul.f32 %v7611_v12, %v4909_v29  ;;  %v4921_v53 = vmul.f32 %v7611_v12, %v4911_v35  ;;  %v4908_v49 = vsub.f32 %v7558_v59, %v7579_v33  ;;  %v4910_v7 = vsub.f32 %v7566_v61, %v7579_v33  ;;  %v6626_v57 = vld [vmem:[#allocation23 + $0x1a0] sm:$0xff]   ;;  %v6628_v29 = vld [vmem:[#allocation23 + $0x1e8] sm:$0xff]  }
 0x78e   :  { %v4964_v10 = vmul.f32 %v4930_v19, %v4915_v14  ;;  %v4966_v63 = vmul.f32 %v4938_v26, %v4917_v27  ;;  %v4963_v18 = vmul.f32 %v4926_v2, %v4914_v11  ;;  %v4965_v43 = vmul.f32 %v4934_v52, %v4916_v20  ;;  %v6617_v19 = vld [vmem:[#allocation23 + $0x110] sm:$0xff]   ;;  %v6619_v26 = vld [vmem:[#allocation23 + $0x158] sm:$0xff]   ;;  %v6629_v61 = vld [vmem:[#allocation23 + $0x128] sm:$0xff]  }
 0x78f   :  { %v4968_v24 = vmul.f32 %v4946_v5, %v4919_v21  ;;  %v4970_v25 = vmul.f32 %v4954_v6, %v4921_v53  ;;  %v6620_v2 = vld [vmem:[#allocation23 + $0x1d8] sm:$0xff]   ;;  %v6623_v5 = vld [vmem:[#allocation23 + $0x160] sm:$0xff]   ;;  %v4918_v35 = vmul.f32 %v7611_v12, %v4908_v49  ;;  %v4920_v14 = vmul.f32 %v7611_v12, %v4910_v7  ;;  %v6630_v33 = vld [vmem:[#allocation23 + $0x1a8] sm:$0xff]  }
 0x790   :  { %v5013_v28 = vadd.f32 %v4979_v48, %v4964_v10  ;;  %v5015_v30 = vadd.f32 %v4987_v60, %v4966_v63  ;;  %v5012_v31 = vadd.f32 %v4975_v39, %v4963_v18  ;;  %v5014_v34 = vadd.f32 %v4983_v13, %v4965_v43  ;;  %v6618_v48 = vld [vmem:[#allocation23 + $0x190] sm:$0xff]   ;;  %v6621_v60 = vld [vmem:[#allocation23 + $0x118] sm:$0xff]   ;;  %v6624_v6 = vld [vmem:[#allocation23 + $0x1e0] sm:$0xff]  }
 0x791   :  { %v5017_v38 = vadd.f32 %v4995_v42, %v4968_v24  ;;  %v5019_v32 = vadd.f32 %v5003_v55, %v4970_v25  ;;  %v6622_v52 = vld [vmem:[#allocation23 + $0x198] sm:$0xff]   ;;  %v4942_v39 = vrot.slane %v7583_v47, %v7350_v0  ;;  %v6627_v13 = vld [vmem:[#allocation23 + $0x168] sm:$0xff]   ;;  %v4950_v59 = vrot.slane %v7583_v47, %v7354_v3  ;;  %v6631_v11 = vld [vmem:[#allocation23 + $0x170] sm:$0xff]  }
 0x792   :  { %v5021_v23 = vmax.f32 %v5013_v28, 0.0  ;;  %v5023_v36 = vmax.f32 %v5015_v30, 0.0  ;;  %v5020_v1 = vmax.f32 %v5012_v31, 0.0  ;;  %v5022_v37 = vmax.f32 %v5014_v34, 0.0  ;;  %v6632_v20 = vld [vmem:[#allocation23 + $0x1f0] sm:$0xff]   ;;  %v6635_v55 = vld [vmem:[#allocation23 + $0x178] sm:$0xff]  }
 0x793   :  { %v5025_v17 = vmax.f32 %v5017_v38, 0.0  ;;  %v5027_v22 = vmax.f32 %v5019_v32, 0.0  ;;  %v4991_v27 = vrot.slane %v7585_v15, %v7350_v0  ;;  %v4967_v21 = vmul.f32 %v4942_v39, %v4918_v35  ;;  %v6633_v12 = vld [vmem:[#allocation23 + $0x130] sm:$0xff]   ;;  %v6636_v10 = vld [vmem:[#allocation23 + $0x1f8] sm:$0xff]   ;;  %v6322_v31 = vld [vmem:[#allocation25] ss:$0 sm:$0xff] }
 0x794   :  { %v5029_v50 = vpack.c.bf16 %v5021_v23, %v5021_v23  ;;  %v5031_v8 = vpack.c.bf16 %v5023_v36, %v5023_v36  ;;  %v5028_v51 = vpack.c.bf16 %v5020_v1, %v5020_v1  ;;  %v5030_v56 = vpack.c.bf16 %v5022_v37, %v5022_v37  ;;  %v6634_v47 = vld [vmem:[#allocation23 + $0x1b0] sm:$0xff]   ;;  %v6637_v0 = vld [vmem:[#allocation23 + $0x138] sm:$0xff]  }
 0x795   :  { %v5033_v54 = vpack.c.bf16 %v5025_v17, %v5025_v17  ;;  %v5035_v4 = vpack.c.bf16 %v5027_v22, %v5027_v22  ;;  %v4969_v42 = vmul.f32 %v4950_v59, %v4920_v14  ;;  %v4999_v53 = vrot.slane %v7585_v15, %v7354_v3  ;;  %v6638_v43 = vld [vmem:[#allocation23 + $0x1b8] sm:$0xff]  }
 0x796   :  { %5587 = vmatprep.mubr.bf16.mxu1 %v5029_v50  ;;  %5627 = vmatprep.mubr.bf16.mxu0 %v5031_v8  ;;  %v5016_v63 = vadd.f32 %v4991_v27, %v4967_v21 }
 0x797   :  { %5588 = vmatmul.mubr.bf16.vlgmr.msra.gmra.mrb[16].mxu1 %v5028_v51  ;;  %5628 = vmatmul.mubr.bf16.vlgmr.msra.gmra.mrb[20].mxu0 %v5030_v56  ;;  %v5018_v18 = vadd.f32 %v4999_v53, %v4969_v42 }
 0x798   :  { %6437 = vmatpush3.bf16.msra.mxu1 %v6609_v58  ;;  %6459 = vmatpush3.bf16.msra.mxu0 %v6610_v40  ;;  %v5024_v24 = vmax.f32 %v5016_v63, 0.0 }
 0x799   :  { %5667 = vmatprep.mubr.bf16.mxu1 %v5033_v54  ;;  %5707 = vmatprep.mubr.bf16.mxu0 %v5035_v4  ;;  %v5026_v25 = vmax.f32 %v5018_v18, 0.0 }
 0x79a   :  { %6438 = vmatprep.subr.bf16.mxu1 %v6611_v44  ;;  %6460 = vmatprep.subr.bf16.mxu0 %v6612_v41  ;;  %v5032_v3 = vpack.c.bf16 %v5024_v24, %v5024_v24 }
 0x79b   :  { %v5034_v15 = vpack.c.bf16 %v5026_v25, %v5026_v25 }
 0x79c   :  { %6439 = vmatpush3.bf16.msra.mxu1 %v6613_v16  ;;  %6461 = vmatpush3.bf16.msra.mxu0 %v6614_v45 }
 0x79d   :  { %6440 = vmatprep.subr.bf16.mxu1 %v6615_v46  ;;  %6462 = vmatprep.subr.bf16.mxu0 %v6616_v62 }
 0x7a0   :  { %6441 = vmatpush3.bf16.msra.mxu1 %v6617_v19  ;;  %6463 = vmatpush3.bf16.msra.mxu0 %v6618_v48 }
 0x7a1   :  { %6442 = vmatprep.subr.bf16.mxu1 %v6619_v26  ;;  %6464 = vmatprep.subr.bf16.mxu0 %v6620_v2 }
 0x7a4   :  { %6443 = vmatpush3.bf16.msra.mxu1 %v6621_v60  ;;  %6465 = vmatpush3.bf16.msra.mxu0 %v6622_v52 }
 0x7a5   :  { %6444 = vmatprep.subr.bf16.mxu1 %v6623_v5  ;;  %6466 = vmatprep.subr.bf16.mxu0 %v6624_v6 }
 0x7a8   :  { %6445 = vmatpush3.bf16.msra.mxu1 %v6625_v9  ;;  %6467 = vmatpush3.bf16.msra.mxu0 %v6626_v57 }
 0x7a9   :  { %6446 = vmatprep.subr.bf16.mxu1 %v6627_v13  ;;  %6468 = vmatprep.subr.bf16.mxu0 %v6628_v29 }
 0x7ac   :  { %6447 = vmatpush3.bf16.msra.mxu1 %v6629_v61  ;;  %6469 = vmatpush3.bf16.msra.mxu0 %v6630_v33 }
 0x7ad   :  { %6448 = vmatprep.subr.bf16.mxu1 %v6631_v11  ;;  %6470 = vmatprep.subr.bf16.mxu0 %v6632_v20 }
 0x7b0   :  { %6449 = vmatpush3.bf16.msra.mxu1 %v6633_v12  ;;  %6471 = vmatpush3.bf16.msra.mxu0 %v6634_v47 }
 0x7b1   :  { %6450 = vmatprep.subr.bf16.mxu1 %v6635_v55  ;;  %6472 = vmatprep.subr.bf16.mxu0 %v6636_v10 }
 0x7b4   :  { %6451 = vmatpush3.bf16.msra.mxu1 %v6637_v0  ;;  %6473 = vmatpush3.bf16.msra.mxu0 %v6638_v43 }
 0x7b7   :  { %5668 = vmatmul.mubr.bf16.vlgmr.msra.gmra.mrb[20].mxu1 %v5032_v3  ;;  %5708 = vmatmul.mubr.bf16.vlgmr.msra.gmra.mrb[24].mxu0 %v5034_v15 }
 0x86a   :  { %v6408_v28 = vpop.f32.mrb[16].mxu1  ;;  %v6430_v30 = vpop.f32.mrb[20].mxu0 }
 0x86b   :  { %v6409_v34 = vpop.f32.mrb[17].mxu1  ;;  %v6431_v38 = vpop.f32.mrb[21].mxu0 }
 0x86c   :  { %v6410_v32 = vadd.f32 %v6409_v34, %v6408_v28  ;;  %v6432_v23 = vadd.f32 %v6431_v38, %v6430_v30  ;;  %v6411_v36 = vpop.f32.mrb[18].mxu1  ;;  %v6433_v1 = vpop.f32.mrb[22].mxu0 }
 0x86d   :  { %v6412_v37 = vpop.f32.mrb[19].mxu1  ;;  %v6434_v17 = vpop.f32.mrb[23].mxu0 }
 0x86e   :  { %v5590_v22 = vadd.f32 %v6410_v32, %v6322_v31 }
 0x870   :  { %v5630_v50 = vadd.f32 %v6432_v23, %v5590_v22 }
 0x88a   :  { %v6452_v8 = vpop.f32.mrb[20].mxu1  ;;  %v6474_v51 = vpop.f32.mrb[24].mxu0 }
 0x88b   :  { %v6453_v56 = vpop.f32.mrb[21].mxu1  ;;  %v6475_v58 = vpop.f32.mrb[25].mxu0 }
 0x88c   :  { %v6454_v40 = vadd.f32 %v6453_v56, %v6452_v8  ;;  %v6476_v44 = vadd.f32 %v6475_v58, %v6474_v51  ;;  %v6455_v41 = vpop.f32.mrb[22].mxu1  ;;  %v6477_v54 = vpop.f32.mrb[26].mxu0 }
 0x88d   :  { %v6456_v4 = vpop.f32.mrb[23].mxu1  ;;  %v6478_v16 = vpop.f32.mrb[27].mxu0 }
 0x88e   :  { %v5670_v45 = vadd.f32 %v6454_v40, %v5630_v50 }
 0x890   :  { %v5710_v46 = vadd.f32 %v6476_v44, %v5670_v45 }
 0x892   :  { %5715 = vst [vmem:[#allocation26] sm:$0xff] %v5710_v46 }
 0x893   :  { %6986 = shalt.err (!%p6983_p12)
}
 0x894   :  { %s7675_s27 = sld [smem:[#allocation36_spill]] }
 0x89a   :  { %s6987_s11 = scalar_lea.hbm %s7675_s27, 128 }
 0x89b   :  { %p6988_p13 = scmp.ne.s32.totalorder %s7675_s27, %s6987_s11  ;;  %p6991_p0 = scmp.lt.u32.totalorder %s6987_s11, %s7675_s27 }
 0x89d   :  { %p6993_p1 = pnand %p6991_p0, %p6988_p13 }
 0x89f   :  { %6996 = shalt.err (!%p6993_p1)
}
 0x8a0   :  { %5725 = dma.vmem_to_hbm [thread:$0]  %s5723_s30, 128, %s7675_s27, [#allocation4]  }
 0x8a1   :  { %7013 = dma.done.wait [#allocation4], 128  }
 0x8a2   :  { %7014 = vsyncadd [#allocation4], 4294967168 }
 0x8a3   :  { %5729 = vsyncpa [#allocation3], 1 }
 0x8a4   :  { %5730 = vsyncpa [#allocation6], 1 }
 0x8a5   :  { %5731 = vsyncpa [#allocation9], 1 }
 0x8a6   :  { %5732 = vsyncpa [#allocation12], 1 }
 0x8a7   :  { %5733 = vsyncpa [#allocation15], 1 }
 0x8a8   :  { %5734 = vsyncpa [#allocation18], 1 }
 0x8a9   :  { %5735 = vsyncpa [#allocation21], 1 }
 0x8aa   :  { %5736 = vsyncpa [#allocation24], 1 }
 0x8ab   :  { %5737 = vsyncpa [#allocation4], 1 }

</bundles_post_ra>
